<compile_context>
chip_gen: v7x
topology: tpu7x:2x2x1
jax: 0.10.0
libtpu: 0.0.40
codegen_flags: <defaults>
</compile_context>

<pallas_src>
import functools

import jax
import jax.numpy as jnp
from jax.experimental import pallas as pl
from jax.experimental.pallas import tpu as pltpu

LEAKY_SLOPE = 0.01
BN_EPS = 1e-5
COMPUTE_DTYPE = jnp.bfloat16   # MXU-facing dtype; accumulate/epilogue in f32


# ---------------------------------------------------------------------------
# Conv kernel: 3x3 conv = 9 accumulated tap matmuls over a VMEM-resident slab,
# fused with folded-BN bias and LeakyReLU.
# ---------------------------------------------------------------------------
def _conv3x3_kernel(x_ref, w_ref, b_ref, o_ref, *, stride, wo, tm, cout):
    # x_ref: (1, 3*stride, R, cin)  tap slabs for one batch element (bf16)
    # w_ref: (9, cin, cout)         BN-scale-folded weights (bf16)
    # b_ref: (1, cout)              folded conv+BN bias (f32)
    # o_ref: (1, tm, cout)          output tile (bf16)
    m0 = pl.multiple_of(pl.program_id(1) * tm, tm)
    acc = jnp.zeros((tm, cout), jnp.float32)
    for ky in range(3):
        for kx in range(3):
            slab = kx * stride + (ky % stride)
            oy = ky // stride
            a = x_ref[0, slab, pl.ds(m0 + oy * wo, tm), :]
            acc = acc + jnp.dot(a, w_ref[ky * 3 + kx],
                                preferred_element_type=jnp.float32)
    acc = acc + b_ref[...]
    acc = jnp.maximum(acc, LEAKY_SLOPE * acc)          # LeakyReLU
    o_ref[0] = acc.astype(o_ref.dtype)


def conv3x3_bn_lrelu(x_nhwc, w_hwio, conv_b, gamma, beta, mean, var, stride):
    """x_nhwc: (N,H,W,Cin) bf16 -> (N, Ho*Wo, Cout) bf16 (NHWC-order rows)."""
    n, h, w, cin = x_nhwc.shape
    kh, kw, cin_w, cout = w_hwio.shape
    assert (kh, kw) == (3, 3) and cin_w == cin
    ho = (h + 2 - 3) // stride + 1
    wo = (w + 2 - 3) // stride + 1

    # Pad Cin up to a multiple of 8 (conv1 has Cin=3); zero padding, exact math.
    cpad = (-cin) % 8
    if cpad:
        x_nhwc = jnp.pad(x_nhwc, ((0, 0), (0, 0), (0, 0), (0, cpad)))
        w_hwio = jnp.pad(w_hwio, ((0, 0), (0, 0), (0, cpad), (0, 0)))
        cin += cpad

    # Spatial zero padding (padding=1).
    xp = jnp.pad(x_nhwc, ((0, 0), (1, 1), (1, 1), (0, 0)))
    hp = h + 2
    hps = hp // stride

    # Build 3*stride tap slabs (cheap layout shuffle, done by XLA):
    # slab[kx*stride + a] = padded rows a::stride restricted to column tap kx,
    # flattened over (rows, wo). Tap (ky,kx) of output element m = y*wo + x then
    # sits at slab row m + (ky//stride)*wo -> contiguous, aligned in-kernel slices.
    slabs = []
    for kx in range(3):
        xc = xp[:, :, kx:kx + stride * (wo - 1) + 1:stride, :]    # (N, hp, wo, cin)
        for a in range(stride):
            slabs.append(xc[:, a::stride, :, :])                  # (N, hps, wo, cin)
    slabs = jnp.stack(slabs, axis=1).reshape(n, 3 * stride, hps * wo, cin)
    slabs = slabs.astype(COMPUTE_DTYPE)

    # Fold eval-mode BatchNorm: scale into the weights, bias kept separate (f32).
    inv_std = 1.0 / jnp.sqrt(var + BN_EPS)
    scale = gamma * inv_std
    bias = (beta + scale * (conv_b - mean)).reshape(1, cout).astype(jnp.float32)
    wmat = (w_hwio * scale[None, None, None, :]).reshape(9, cin, cout)
    wmat = wmat.astype(COMPUTE_DTYPE)

    m_total = ho * wo
    tm = min(m_total, 256)
    assert m_total % tm == 0
    m_tiles = m_total // tm
    r = hps * wo

    kernel = functools.partial(_conv3x3_kernel, stride=stride, wo=wo, tm=tm,
                               cout=cout)
    out = pl.pallas_call(
        kernel,
        out_shape=jax.ShapeDtypeStruct((n, m_total, cout), COMPUTE_DTYPE),
        grid=(n, m_tiles),
        in_specs=[
            pl.BlockSpec((1, 3 * stride, r, cin), lambda b, m: (b, 0, 0, 0)),
            pl.BlockSpec((9, cin, cout), lambda b, m: (0, 0, 0)),
            pl.BlockSpec((1, cout), lambda b, m: (0, 0)),
        ],
        out_specs=pl.BlockSpec((1, tm, cout), lambda b, m: (b, m, 0)),
        compiler_params=pltpu.CompilerParams(
            dimension_semantics=("parallel", "parallel")),
    )(slabs, wmat, bias)
    return out, (ho, wo)


# ---------------------------------------------------------------------------
# Fused classifier head: fc1 (K-tiled, VMEM accumulator) + bn5 + LeakyReLU + fc2.
# ---------------------------------------------------------------------------
def _fc_head_kernel(x_ref, w1_ref, b1_ref, w2_ref, b2_ref, o_ref, h_ref):
    k = pl.program_id(0)

    @pl.when(k == 0)
    def _():
        h_ref[...] = jnp.zeros_like(h_ref)

    h_ref[...] += jnp.dot(x_ref[...], w1_ref[...],
                          preferred_element_type=jnp.float32)

    @pl.when(k == pl.num_programs(0) - 1)
    def _():
        h = h_ref[...] + b1_ref[...]
        h = jnp.maximum(h, LEAKY_SLOPE * h)           # LeakyReLU after bn5
        # TODO(synk): training-mode dropout (p=0.5 mask + 1/(1-p) scale) omitted;
        # eval-mode dropout is the identity.
        logits = jnp.dot(h.astype(COMPUTE_DTYPE), w2_ref[...],
                         preferred_element_type=jnp.float32)
        o_ref[...] = (logits + b2_ref[...]).astype(o_ref.dtype)


def fc_head(x, fc1_w_hwc, fc1_b, bn5, fc2_w, fc2_b, *, tk=1024):
    n, kdim = x.shape
    g5, b5, m5, v5 = bn5
    inv_std = 1.0 / jnp.sqrt(v5 + BN_EPS)
    scale = g5 * inv_std
    bias1 = (b5 + scale * (fc1_b - m5)).reshape(1, -1).astype(jnp.float32)
    w1 = (fc1_w_hwc * scale[None, :]).astype(COMPUTE_DTYPE)
    w2 = fc2_w.astype(COMPUTE_DTYPE)
    bias2 = fc2_b.reshape(1, -1).astype(jnp.float32)
    hidden = w1.shape[1]
    nout = w2.shape[1]

    tk = min(tk, kdim)
    assert kdim % tk == 0
    return pl.pallas_call(
        _fc_head_kernel,
        out_shape=jax.ShapeDtypeStruct((n, nout), jnp.float32),
        grid=(kdim // tk,),
        in_specs=[
            pl.BlockSpec((n, tk), lambda k: (0, k)),
            pl.BlockSpec((tk, hidden), lambda k: (k, 0)),
            pl.BlockSpec((1, hidden), lambda k: (0, 0)),
            pl.BlockSpec((hidden, nout), lambda k: (0, 0)),
            pl.BlockSpec((1, nout), lambda k: (0, 0)),
        ],
        out_specs=pl.BlockSpec((n, nout), lambda k: (0, 0)),
        scratch_shapes=[pltpu.VMEM((n, hidden), jnp.float32)],
        compiler_params=pltpu.CompilerParams(
            dimension_semantics=("arbitrary",)),
    )(x, w1, bias1, w2, bias2)


# ---------------------------------------------------------------------------
# Deterministic parameter init (shapes from CNN.__init__)
# ---------------------------------------------------------------------------
def init_params(key):
    ks = jax.random.split(key, 8)

    def conv_w(k, kh, kw, cin, cout):
        bound = 1.0 / (cin * kh * kw) ** 0.5
        return jax.random.uniform(k, (kh, kw, cin, cout), jnp.float32, -bound, bound)

    def lin_w(k, fin, fout):
        bound = 1.0 / fin ** 0.5
        return jax.random.uniform(k, (fin, fout), jnp.float32, -bound, bound)

    def bn(c):
        # fresh PyTorch BatchNorm: gamma=1, beta=0, running_mean=0, running_var=1
        return (jnp.ones((c,), jnp.float32), jnp.zeros((c,), jnp.float32),
                jnp.zeros((c,), jnp.float32), jnp.ones((c,), jnp.float32))

    p = {}
    p["w1"], p["b1"] = conv_w(ks[0], 3, 3, 3, 32), jnp.zeros((32,), jnp.float32)
    p["bn1"] = bn(32)
    p["w2"], p["b2"] = conv_w(ks[1], 3, 3, 32, 32), jnp.zeros((32,), jnp.float32)
    p["bn2"] = bn(32)
    p["w3"], p["b3"] = conv_w(ks[2], 3, 3, 32, 64), jnp.zeros((64,), jnp.float32)
    p["bn3"] = bn(64)
    p["w4"], p["b4"] = conv_w(ks[3], 3, 3, 64, 64), jnp.zeros((64,), jnp.float32)
    p["bn4"] = bn(64)
    p["fc1_w"], p["fc1_b"] = lin_w(ks[4], 64 * 8 * 8, 128), jnp.zeros((128,), jnp.float32)
    p["bn5"] = bn(128)
    p["fc2_w"], p["fc2_b"] = lin_w(ks[5], 128, 10), jnp.zeros((10,), jnp.float32)
    return p


# ---------------------------------------------------------------------------
# Forward pass (matches CNN.forward in eval mode)
# ---------------------------------------------------------------------------
def forward(params, x_nchw):
    n = x_nchw.shape[0]
    x = jnp.transpose(x_nchw, (0, 2, 3, 1)).astype(COMPUTE_DTYPE)  # NCHW -> NHWC

    x, (h, w) = conv3x3_bn_lrelu(x, params["w1"], params["b1"], *params["bn1"], stride=1)
    x = x.reshape(n, h, w, -1)
    x, (h, w) = conv3x3_bn_lrelu(x, params["w2"], params["b2"], *params["bn2"], stride=2)
    x = x.reshape(n, h, w, -1)
    x, (h, w) = conv3x3_bn_lrelu(x, params["w3"], params["b3"], *params["bn3"], stride=1)
    x = x.reshape(n, h, w, -1)
    x, (h, w) = conv3x3_bn_lrelu(x, params["w4"], params["b4"], *params["bn4"], stride=2)
    cout = x.shape[-1]
    x = x.reshape(n, h * w * cout)          # NHWC-order flatten (no HBM transpose)

    # PyTorch's x.view(N,-1) flattens in CHW order; instead of transposing the
    # activations, permute fc1's input rows once to NHWC order (same result).
    fc1_w = params["fc1_w"].reshape(cout, h, w, -1)
    fc1_w = jnp.transpose(fc1_w, (1, 2, 0, 3)).reshape(h * w * cout, -1)

    return fc_head(x, fc1_w, params["fc1_b"], params["bn5"],
                   params["fc2_w"], params["fc2_b"])


if __name__ == "__main__":
    key = jax.random.PRNGKey(0)
    k_param, k_data = jax.random.split(key)
    params = init_params(k_param)
    # fc1 = Linear(64*8*8, 128) forces 3x32x32 inputs; batch kept small.
    x = jax.random.normal(k_data, (2, 3, 32, 32), dtype=jnp.float32)
    out = jax.jit(forward)(params, x)
    out = jax.block_until_ready(out)
    assert out.shape == (2, 10) and out.dtype == jnp.float32
    print("KERNEL_OK")
</pallas_src>

<mosaic_0001>
module attributes {stable_mosaic.version = 11 : i64} {
  func.func @_conv3x3_kernel(%arg0: i32, %arg1: i32, %arg2: memref<1x3x1088x8xbf16, #tpu.memory_space<vmem>>, %arg3: memref<9x8x32xbf16, #tpu.memory_space<vmem>>, %arg4: memref<1x32xf32, #tpu.memory_space<vmem>>, %arg5: memref<1x256x32xbf16, #tpu.memory_space<vmem>>) attributes {dimension_semantics = [#tpu.dimension_semantics<parallel>, #tpu.dimension_semantics<parallel>], iteration_bounds = array<i64: 2, 4>, scalar_prefetch = 0 : i64, scratch_operands = 0 : i64, tpu.core_type = #tpu.core_type<tc>, window_params = [{transform_indices = @transform_0, window_bounds = array<i64: 1, 3, 1088, 8>}, {pipeline_mode = #tpu.pipeline_mode<synchronous>, transform_indices = @transform_1, window_bounds = array<i64: 9, 8, 32>}, {pipeline_mode = #tpu.pipeline_mode<synchronous>, transform_indices = @transform_2, window_bounds = array<i64: 1, 32>}, {transform_indices = @transform_3, window_bounds = array<i64: 1, 256, 32>}]} {
    %c256_i32 = arith.constant 256 : i32
    %0 = arith.muli %arg1, %c256_i32 : i32
    %1 = tpu.assume_multiple %0, 256 : i32
    %cst = arith.constant 0.000000e+00 : f32
    %2 = vector.broadcast %cst : f32 to vector<256x32xf32>
    %c0_i32 = arith.constant 0 : i32
    %3 = arith.addi %1, %c0_i32 : i32
    %c0 = arith.constant 0 : index
    %c0_0 = arith.constant 0 : index
    %4 = arith.index_cast %3 : i32 to index
    %c0_1 = arith.constant 0 : index
    %5 = vector.load %arg2[%c0, %c0_0, %4, %c0_1] : memref<1x3x1088x8xbf16, #tpu.memory_space<vmem>>, vector<1x1x256x8xbf16>
    %6 = vector.shape_cast %5 : vector<1x1x256x8xbf16> to vector<256x8xbf16>
    %c0_2 = arith.constant 0 : index
    %c0_3 = arith.constant 0 : index
    %c0_4 = arith.constant 0 : index
    %7 = vector.load %arg3[%c0_2, %c0_3, %c0_4] : memref<9x8x32xbf16, #tpu.memory_space<vmem>>, vector<1x8x32xbf16>
    %8 = vector.shape_cast %7 : vector<1x8x32xbf16> to vector<8x32xbf16>
    %cst_5 = arith.constant dense<0.000000e+00> : vector<256x32xf32>
    %9 = tpu.matmul %6, %8, %cst_5 {dimension_numbers = #tpu.dot_dimension_numbers<[1], [0], [0], [1], [0, 0, 1, 1], [], []>} : vector<256x8xbf16>, vector<8x32xbf16>, vector<256x32xf32> -> vector<256x32xf32>
    %10 = arith.addf %2, %9 : vector<256x32xf32>
    %c0_i32_6 = arith.constant 0 : i32
    %11 = arith.addi %1, %c0_i32_6 : i32
    %c0_7 = arith.constant 0 : index
    %c1 = arith.constant 1 : index
    %12 = arith.index_cast %11 : i32 to index
    %c0_8 = arith.constant 0 : index
    %13 = vector.load %arg2[%c0_7, %c1, %12, %c0_8] : memref<1x3x1088x8xbf16, #tpu.memory_space<vmem>>, vector<1x1x256x8xbf16>
    %14 = vector.shape_cast %13 : vector<1x1x256x8xbf16> to vector<256x8xbf16>
    %c1_9 = arith.constant 1 : index
    %c0_10 = arith.constant 0 : index
    %c0_11 = arith.constant 0 : index
    %15 = vector.load %arg3[%c1_9, %c0_10, %c0_11] : memref<9x8x32xbf16, #tpu.memory_space<vmem>>, vector<1x8x32xbf16>
    %16 = vector.shape_cast %15 : vector<1x8x32xbf16> to vector<8x32xbf16>
    %cst_12 = arith.constant dense<0.000000e+00> : vector<256x32xf32>
    %17 = tpu.matmul %14, %16, %cst_12 {dimension_numbers = #tpu.dot_dimension_numbers<[1], [0], [0], [1], [0, 0, 1, 1], [], []>} : vector<256x8xbf16>, vector<8x32xbf16>, vector<256x32xf32> -> vector<256x32xf32>
    %18 = arith.addf %10, %17 : vector<256x32xf32>
    %c0_i32_13 = arith.constant 0 : i32
    %19 = arith.addi %1, %c0_i32_13 : i32
    %c0_14 = arith.constant 0 : index
    %c2 = arith.constant 2 : index
    %20 = arith.index_cast %19 : i32 to index
    %c0_15 = arith.constant 0 : index
    %21 = vector.load %arg2[%c0_14, %c2, %20, %c0_15] : memref<1x3x1088x8xbf16, #tpu.memory_space<vmem>>, vector<1x1x256x8xbf16>
    %22 = vector.shape_cast %21 : vector<1x1x256x8xbf16> to vector<256x8xbf16>
    %c2_16 = arith.constant 2 : index
    %c0_17 = arith.constant 0 : index
    %c0_18 = arith.constant 0 : index
    %23 = vector.load %arg3[%c2_16, %c0_17, %c0_18] : memref<9x8x32xbf16, #tpu.memory_space<vmem>>, vector<1x8x32xbf16>
    %24 = vector.shape_cast %23 : vector<1x8x32xbf16> to vector<8x32xbf16>
    %cst_19 = arith.constant dense<0.000000e+00> : vector<256x32xf32>
    %25 = tpu.matmul %22, %24, %cst_19 {dimension_numbers = #tpu.dot_dimension_numbers<[1], [0], [0], [1], [0, 0, 1, 1], [], []>} : vector<256x8xbf16>, vector<8x32xbf16>, vector<256x32xf32> -> vector<256x32xf32>
    %26 = arith.addf %18, %25 : vector<256x32xf32>
    %c32_i32 = arith.constant 32 : i32
    %27 = arith.addi %1, %c32_i32 : i32
    %c0_20 = arith.constant 0 : index
    %c0_21 = arith.constant 0 : index
    %28 = arith.index_cast %27 : i32 to index
    %c0_22 = arith.constant 0 : index
    %29 = vector.load %arg2[%c0_20, %c0_21, %28, %c0_22] : memref<1x3x1088x8xbf16, #tpu.memory_space<vmem>>, vector<1x1x256x8xbf16>
    %30 = vector.shape_cast %29 : vector<1x1x256x8xbf16> to vector<256x8xbf16>
    %c3 = arith.constant 3 : index
    %c0_23 = arith.constant 0 : index
    %c0_24 = arith.constant 0 : index
    %31 = vector.load %arg3[%c3, %c0_23, %c0_24] : memref<9x8x32xbf16, #tpu.memory_space<vmem>>, vector<1x8x32xbf16>
    %32 = vector.shape_cast %31 : vector<1x8x32xbf16> to vector<8x32xbf16>
    %cst_25 = arith.constant dense<0.000000e+00> : vector<256x32xf32>
    %33 = tpu.matmul %30, %32, %cst_25 {dimension_numbers = #tpu.dot_dimension_numbers<[1], [0], [0], [1], [0, 0, 1, 1], [], []>} : vector<256x8xbf16>, vector<8x32xbf16>, vector<256x32xf32> -> vector<256x32xf32>
    %34 = arith.addf %26, %33 : vector<256x32xf32>
    %c32_i32_26 = arith.constant 32 : i32
    %35 = arith.addi %1, %c32_i32_26 : i32
    %c0_27 = arith.constant 0 : index
    %c1_28 = arith.constant 1 : index
    %36 = arith.index_cast %35 : i32 to index
    %c0_29 = arith.constant 0 : index
    %37 = vector.load %arg2[%c0_27, %c1_28, %36, %c0_29] : memref<1x3x1088x8xbf16, #tpu.memory_space<vmem>>, vector<1x1x256x8xbf16>
    %38 = vector.shape_cast %37 : vector<1x1x256x8xbf16> to vector<256x8xbf16>
    %c4 = arith.constant 4 : index
    %c0_30 = arith.constant 0 : index
    %c0_31 = arith.constant 0 : index
    %39 = vector.load %arg3[%c4, %c0_30, %c0_31] : memref<9x8x32xbf16, #tpu.memory_space<vmem>>, vector<1x8x32xbf16>
    %40 = vector.shape_cast %39 : vector<1x8x32xbf16> to vector<8x32xbf16>
    %cst_32 = arith.constant dense<0.000000e+00> : vector<256x32xf32>
    %41 = tpu.matmul %38, %40, %cst_32 {dimension_numbers = #tpu.dot_dimension_numbers<[1], [0], [0], [1], [0, 0, 1, 1], [], []>} : vector<256x8xbf16>, vector<8x32xbf16>, vector<256x32xf32> -> vector<256x32xf32>
    %42 = arith.addf %34, %41 : vector<256x32xf32>
    %c32_i32_33 = arith.constant 32 : i32
    %43 = arith.addi %1, %c32_i32_33 : i32
    %c0_34 = arith.constant 0 : index
    %c2_35 = arith.constant 2 : index
    %44 = arith.index_cast %43 : i32 to index
    %c0_36 = arith.constant 0 : index
    %45 = vector.load %arg2[%c0_34, %c2_35, %44, %c0_36] : memref<1x3x1088x8xbf16, #tpu.memory_space<vmem>>, vector<1x1x256x8xbf16>
    %46 = vector.shape_cast %45 : vector<1x1x256x8xbf16> to vector<256x8xbf16>
    %c5 = arith.constant 5 : index
    %c0_37 = arith.constant 0 : index
    %c0_38 = arith.constant 0 : index
    %47 = vector.load %arg3[%c5, %c0_37, %c0_38] : memref<9x8x32xbf16, #tpu.memory_space<vmem>>, vector<1x8x32xbf16>
    %48 = vector.shape_cast %47 : vector<1x8x32xbf16> to vector<8x32xbf16>
    %cst_39 = arith.constant dense<0.000000e+00> : vector<256x32xf32>
    %49 = tpu.matmul %46, %48, %cst_39 {dimension_numbers = #tpu.dot_dimension_numbers<[1], [0], [0], [1], [0, 0, 1, 1], [], []>} : vector<256x8xbf16>, vector<8x32xbf16>, vector<256x32xf32> -> vector<256x32xf32>
    %50 = arith.addf %42, %49 : vector<256x32xf32>
    %c64_i32 = arith.constant 64 : i32
    %51 = arith.addi %1, %c64_i32 : i32
    %c0_40 = arith.constant 0 : index
    %c0_41 = arith.constant 0 : index
    %52 = arith.index_cast %51 : i32 to index
    %c0_42 = arith.constant 0 : index
    %53 = vector.load %arg2[%c0_40, %c0_41, %52, %c0_42] : memref<1x3x1088x8xbf16, #tpu.memory_space<vmem>>, vector<1x1x256x8xbf16>
    %54 = vector.shape_cast %53 : vector<1x1x256x8xbf16> to vector<256x8xbf16>
    %c6 = arith.constant 6 : index
    %c0_43 = arith.constant 0 : index
    %c0_44 = arith.constant 0 : index
    %55 = vector.load %arg3[%c6, %c0_43, %c0_44] : memref<9x8x32xbf16, #tpu.memory_space<vmem>>, vector<1x8x32xbf16>
    %56 = vector.shape_cast %55 : vector<1x8x32xbf16> to vector<8x32xbf16>
    %cst_45 = arith.constant dense<0.000000e+00> : vector<256x32xf32>
    %57 = tpu.matmul %54, %56, %cst_45 {dimension_numbers = #tpu.dot_dimension_numbers<[1], [0], [0], [1], [0, 0, 1, 1], [], []>} : vector<256x8xbf16>, vector<8x32xbf16>, vector<256x32xf32> -> vector<256x32xf32>
    %58 = arith.addf %50, %57 : vector<256x32xf32>
    %c64_i32_46 = arith.constant 64 : i32
    %59 = arith.addi %1, %c64_i32_46 : i32
    %c0_47 = arith.constant 0 : index
    %c1_48 = arith.constant 1 : index
    %60 = arith.index_cast %59 : i32 to index
    %c0_49 = arith.constant 0 : index
    %61 = vector.load %arg2[%c0_47, %c1_48, %60, %c0_49] : memref<1x3x1088x8xbf16, #tpu.memory_space<vmem>>, vector<1x1x256x8xbf16>
    %62 = vector.shape_cast %61 : vector<1x1x256x8xbf16> to vector<256x8xbf16>
    %c7 = arith.constant 7 : index
    %c0_50 = arith.constant 0 : index
    %c0_51 = arith.constant 0 : index
    %63 = vector.load %arg3[%c7, %c0_50, %c0_51] : memref<9x8x32xbf16, #tpu.memory_space<vmem>>, vector<1x8x32xbf16>
    %64 = vector.shape_cast %63 : vector<1x8x32xbf16> to vector<8x32xbf16>
    %cst_52 = arith.constant dense<0.000000e+00> : vector<256x32xf32>
    %65 = tpu.matmul %62, %64, %cst_52 {dimension_numbers = #tpu.dot_dimension_numbers<[1], [0], [0], [1], [0, 0, 1, 1], [], []>} : vector<256x8xbf16>, vector<8x32xbf16>, vector<256x32xf32> -> vector<256x32xf32>
    %66 = arith.addf %58, %65 : vector<256x32xf32>
    %c64_i32_53 = arith.constant 64 : i32
    %67 = arith.addi %1, %c64_i32_53 : i32
    %c0_54 = arith.constant 0 : index
    %c2_55 = arith.constant 2 : index
    %68 = arith.index_cast %67 : i32 to index
    %c0_56 = arith.constant 0 : index
    %69 = vector.load %arg2[%c0_54, %c2_55, %68, %c0_56] : memref<1x3x1088x8xbf16, #tpu.memory_space<vmem>>, vector<1x1x256x8xbf16>
    %70 = vector.shape_cast %69 : vector<1x1x256x8xbf16> to vector<256x8xbf16>
    %c8 = arith.constant 8 : index
    %c0_57 = arith.constant 0 : index
    %c0_58 = arith.constant 0 : index
    %71 = vector.load %arg3[%c8, %c0_57, %c0_58] : memref<9x8x32xbf16, #tpu.memory_space<vmem>>, vector<1x8x32xbf16>
    %72 = vector.shape_cast %71 : vector<1x8x32xbf16> to vector<8x32xbf16>
    %cst_59 = arith.constant dense<0.000000e+00> : vector<256x32xf32>
    %73 = tpu.matmul %70, %72, %cst_59 {dimension_numbers = #tpu.dot_dimension_numbers<[1], [0], [0], [1], [0, 0, 1, 1], [], []>} : vector<256x8xbf16>, vector<8x32xbf16>, vector<256x32xf32> -> vector<256x32xf32>
    %74 = arith.addf %66, %73 : vector<256x32xf32>
    %c0_60 = arith.constant 0 : index
    %c0_61 = arith.constant 0 : index
    %75 = vector.load %arg4[%c0_60, %c0_61] : memref<1x32xf32, #tpu.memory_space<vmem>>, vector<1x32xf32>
    %76 = vector.broadcast %75 : vector<1x32xf32> to vector<256x32xf32>
    %77 = arith.addf %74, %76 : vector<256x32xf32>
    %cst_62 = arith.constant 0.00999999977 : f32
    %78 = vector.broadcast %cst_62 : f32 to vector<256x32xf32>
    %79 = arith.mulf %78, %77 : vector<256x32xf32>
    %80 = arith.maximumf %77, %79 : vector<256x32xf32>
    %81 = arith.truncf %80 : vector<256x32xf32> to vector<256x32xbf16>
    %c0_63 = arith.constant 0 : index
    %c0_64 = arith.constant 0 : index
    %c0_65 = arith.constant 0 : index
    %82 = vector.load %arg5[%c0_63, %c0_64, %c0_65] : memref<1x256x32xbf16, #tpu.memory_space<vmem>>, vector<1x256x32xbf16>
    %83 = vector.shape_cast %82 : vector<1x256x32xbf16> to vector<256x32xbf16>
    %84 = vector.shape_cast %81 : vector<256x32xbf16> to vector<1x256x32xbf16>
    tpu.vector_store %arg5[%c0_63, %c0_64, %c0_65], %84 {strides = array<i32>} : memref<1x256x32xbf16, #tpu.memory_space<vmem>>, vector<1x256x32xbf16>,
    return
  }
  func.func @transform_0(%arg0: i32, %arg1: i32) -> (i32, i32, i32, i32) {
    %c0_i32 = arith.constant 0 : i32
    %c0_i32_0 = arith.constant 0 : i32
    %c0_i32_1 = arith.constant 0 : i32
    %c0_i32_2 = arith.constant 0 : i32
    return %arg0, %c0_i32, %c0_i32_0, %c0_i32_1 : i32, i32, i32, i32
  }
  func.func @transform_1(%arg0: i32, %arg1: i32) -> (i32, i32, i32) {
    %c0_i32 = arith.constant 0 : i32
    %c0_i32_0 = arith.constant 0 : i32
    %c0_i32_1 = arith.constant 0 : i32
    %c0_i32_2 = arith.constant 0 : i32
    return %c0_i32, %c0_i32_0, %c0_i32_1 : i32, i32, i32
  }
  func.func @transform_2(%arg0: i32, %arg1: i32) -> (i32, i32) {
    %c0_i32 = arith.constant 0 : i32
    %c0_i32_0 = arith.constant 0 : i32
    %c0_i32_1 = arith.constant 0 : i32
    return %c0_i32, %c0_i32_0 : i32, i32
  }
  func.func @transform_3(%arg0: i32, %arg1: i32) -> (i32, i32, i32) {
    %c0_i32 = arith.constant 0 : i32
    %c0_i32_0 = arith.constant 0 : i32
    return %arg0, %arg1, %c0_i32 : i32, i32, i32
  }
}

module attributes {stable_mosaic.version = 11 : i64} {
  func.func @_conv3x3_kernel(%arg0: i32, %arg1: i32, %arg2: memref<1x6x272x32xbf16, #tpu.memory_space<vmem>>, %arg3: memref<9x32x32xbf16, #tpu.memory_space<vmem>>, %arg4: memref<1x32xf32, #tpu.memory_space<vmem>>, %arg5: memref<1x256x32xbf16, #tpu.memory_space<vmem>>) attributes {dimension_semantics = [#tpu.dimension_semantics<parallel>, #tpu.dimension_semantics<parallel>], iteration_bounds = array<i64: 2, 1>, scalar_prefetch = 0 : i64, scratch_operands = 0 : i64, tpu.core_type = #tpu.core_type<tc>, window_params = [{transform_indices = @transform_0, window_bounds = array<i64: 1, 6, 272, 32>}, {pipeline_mode = #tpu.pipeline_mode<synchronous>, transform_indices = @transform_1, window_bounds = array<i64: 9, 32, 32>}, {pipeline_mode = #tpu.pipeline_mode<synchronous>, transform_indices = @transform_2, window_bounds = array<i64: 1, 32>}, {transform_indices = @transform_3, window_bounds = array<i64: 1, 256, 32>}]} {
    %c256_i32 = arith.constant 256 : i32
    %0 = arith.muli %arg1, %c256_i32 : i32
    %1 = tpu.assume_multiple %0, 256 : i32
    %cst = arith.constant 0.000000e+00 : f32
    %2 = vector.broadcast %cst : f32 to vector<256x32xf32>
    %c0_i32 = arith.constant 0 : i32
    %3 = arith.addi %1, %c0_i32 : i32
    %c0 = arith.constant 0 : index
    %c0_0 = arith.constant 0 : index
    %4 = arith.index_cast %3 : i32 to index
    %c0_1 = arith.constant 0 : index
    %5 = vector.load %arg2[%c0, %c0_0, %4, %c0_1] : memref<1x6x272x32xbf16, #tpu.memory_space<vmem>>, vector<1x1x256x32xbf16>
    %6 = vector.shape_cast %5 : vector<1x1x256x32xbf16> to vector<256x32xbf16>
    %c0_2 = arith.constant 0 : index
    %c0_3 = arith.constant 0 : index
    %c0_4 = arith.constant 0 : index
    %7 = vector.load %arg3[%c0_2, %c0_3, %c0_4] : memref<9x32x32xbf16, #tpu.memory_space<vmem>>, vector<1x32x32xbf16>
    %8 = vector.shape_cast %7 : vector<1x32x32xbf16> to vector<32x32xbf16>
    %cst_5 = arith.constant dense<0.000000e+00> : vector<256x32xf32>
    %9 = tpu.matmul %6, %8, %cst_5 {dimension_numbers = #tpu.dot_dimension_numbers<[1], [0], [0], [1], [0, 0, 1, 1], [], []>} : vector<256x32xbf16>, vector<32x32xbf16>, vector<256x32xf32> -> vector<256x32xf32>
    %10 = arith.addf %2, %9 : vector<256x32xf32>
    %c0_i32_6 = arith.constant 0 : i32
    %11 = arith.addi %1, %c0_i32_6 : i32
    %c0_7 = arith.constant 0 : index
    %c2 = arith.constant 2 : index
    %12 = arith.index_cast %11 : i32 to index
    %c0_8 = arith.constant 0 : index
    %13 = vector.load %arg2[%c0_7, %c2, %12, %c0_8] : memref<1x6x272x32xbf16, #tpu.memory_space<vmem>>, vector<1x1x256x32xbf16>
    %14 = vector.shape_cast %13 : vector<1x1x256x32xbf16> to vector<256x32xbf16>
    %c1 = arith.constant 1 : index
    %c0_9 = arith.constant 0 : index
    %c0_10 = arith.constant 0 : index
    %15 = vector.load %arg3[%c1, %c0_9, %c0_10] : memref<9x32x32xbf16, #tpu.memory_space<vmem>>, vector<1x32x32xbf16>
    %16 = vector.shape_cast %15 : vector<1x32x32xbf16> to vector<32x32xbf16>
    %cst_11 = arith.constant dense<0.000000e+00> : vector<256x32xf32>
    %17 = tpu.matmul %14, %16, %cst_11 {dimension_numbers = #tpu.dot_dimension_numbers<[1], [0], [0], [1], [0, 0, 1, 1], [], []>} : vector<256x32xbf16>, vector<32x32xbf16>, vector<256x32xf32> -> vector<256x32xf32>
    %18 = arith.addf %10, %17 : vector<256x32xf32>
    %c0_i32_12 = arith.constant 0 : i32
    %19 = arith.addi %1, %c0_i32_12 : i32
    %c0_13 = arith.constant 0 : index
    %c4 = arith.constant 4 : index
    %20 = arith.index_cast %19 : i32 to index
    %c0_14 = arith.constant 0 : index
    %21 = vector.load %arg2[%c0_13, %c4, %20, %c0_14] : memref<1x6x272x32xbf16, #tpu.memory_space<vmem>>, vector<1x1x256x32xbf16>
    %22 = vector.shape_cast %21 : vector<1x1x256x32xbf16> to vector<256x32xbf16>
    %c2_15 = arith.constant 2 : index
    %c0_16 = arith.constant 0 : index
    %c0_17 = arith.constant 0 : index
    %23 = vector.load %arg3[%c2_15, %c0_16, %c0_17] : memref<9x32x32xbf16, #tpu.memory_space<vmem>>, vector<1x32x32xbf16>
    %24 = vector.shape_cast %23 : vector<1x32x32xbf16> to vector<32x32xbf16>
    %cst_18 = arith.constant dense<0.000000e+00> : vector<256x32xf32>
    %25 = tpu.matmul %22, %24, %cst_18 {dimension_numbers = #tpu.dot_dimension_numbers<[1], [0], [0], [1], [0, 0, 1, 1], [], []>} : vector<256x32xbf16>, vector<32x32xbf16>, vector<256x32xf32> -> vector<256x32xf32>
    %26 = arith.addf %18, %25 : vector<256x32xf32>
    %c0_i32_19 = arith.constant 0 : i32
    %27 = arith.addi %1, %c0_i32_19 : i32
    %c0_20 = arith.constant 0 : index
    %c1_21 = arith.constant 1 : index
    %28 = arith.index_cast %27 : i32 to index
    %c0_22 = arith.constant 0 : index
    %29 = vector.load %arg2[%c0_20, %c1_21, %28, %c0_22] : memref<1x6x272x32xbf16, #tpu.memory_space<vmem>>, vector<1x1x256x32xbf16>
    %30 = vector.shape_cast %29 : vector<1x1x256x32xbf16> to vector<256x32xbf16>
    %c3 = arith.constant 3 : index
    %c0_23 = arith.constant 0 : index
    %c0_24 = arith.constant 0 : index
    %31 = vector.load %arg3[%c3, %c0_23, %c0_24] : memref<9x32x32xbf16, #tpu.memory_space<vmem>>, vector<1x32x32xbf16>
    %32 = vector.shape_cast %31 : vector<1x32x32xbf16> to vector<32x32xbf16>
    %cst_25 = arith.constant dense<0.000000e+00> : vector<256x32xf32>
    %33 = tpu.matmul %30, %32, %cst_25 {dimension_numbers = #tpu.dot_dimension_numbers<[1], [0], [0], [1], [0, 0, 1, 1], [], []>} : vector<256x32xbf16>, vector<32x32xbf16>, vector<256x32xf32> -> vector<256x32xf32>
    %34 = arith.addf %26, %33 : vector<256x32xf32>
    %c0_i32_26 = arith.constant 0 : i32
    %35 = arith.addi %1, %c0_i32_26 : i32
    %c0_27 = arith.constant 0 : index
    %c3_28 = arith.constant 3 : index
    %36 = arith.index_cast %35 : i32 to index
    %c0_29 = arith.constant 0 : index
    %37 = vector.load %arg2[%c0_27, %c3_28, %36, %c0_29] : memref<1x6x272x32xbf16, #tpu.memory_space<vmem>>, vector<1x1x256x32xbf16>
    %38 = vector.shape_cast %37 : vector<1x1x256x32xbf16> to vector<256x32xbf16>
    %c4_30 = arith.constant 4 : index
    %c0_31 = arith.constant 0 : index
    %c0_32 = arith.constant 0 : index
    %39 = vector.load %arg3[%c4_30, %c0_31, %c0_32] : memref<9x32x32xbf16, #tpu.memory_space<vmem>>, vector<1x32x32xbf16>
    %40 = vector.shape_cast %39 : vector<1x32x32xbf16> to vector<32x32xbf16>
    %cst_33 = arith.constant dense<0.000000e+00> : vector<256x32xf32>
    %41 = tpu.matmul %38, %40, %cst_33 {dimension_numbers = #tpu.dot_dimension_numbers<[1], [0], [0], [1], [0, 0, 1, 1], [], []>} : vector<256x32xbf16>, vector<32x32xbf16>, vector<256x32xf32> -> vector<256x32xf32>
    %42 = arith.addf %34, %41 : vector<256x32xf32>
    %c0_i32_34 = arith.constant 0 : i32
    %43 = arith.addi %1, %c0_i32_34 : i32
    %c0_35 = arith.constant 0 : index
    %c5 = arith.constant 5 : index
    %44 = arith.index_cast %43 : i32 to index
    %c0_36 = arith.constant 0 : index
    %45 = vector.load %arg2[%c0_35, %c5, %44, %c0_36] : memref<1x6x272x32xbf16, #tpu.memory_space<vmem>>, vector<1x1x256x32xbf16>
    %46 = vector.shape_cast %45 : vector<1x1x256x32xbf16> to vector<256x32xbf16>
    %c5_37 = arith.constant 5 : index
    %c0_38 = arith.constant 0 : index
    %c0_39 = arith.constant 0 : index
    %47 = vector.load %arg3[%c5_37, %c0_38, %c0_39] : memref<9x32x32xbf16, #tpu.memory_space<vmem>>, vector<1x32x32xbf16>
    %48 = vector.shape_cast %47 : vector<1x32x32xbf16> to vector<32x32xbf16>
    %cst_40 = arith.constant dense<0.000000e+00> : vector<256x32xf32>
    %49 = tpu.matmul %46, %48, %cst_40 {dimension_numbers = #tpu.dot_dimension_numbers<[1], [0], [0], [1], [0, 0, 1, 1], [], []>} : vector<256x32xbf16>, vector<32x32xbf16>, vector<256x32xf32> -> vector<256x32xf32>
    %50 = arith.addf %42, %49 : vector<256x32xf32>
    %c16_i32 = arith.constant 16 : i32
    %51 = arith.addi %1, %c16_i32 : i32
    %c0_41 = arith.constant 0 : index
    %c0_42 = arith.constant 0 : index
    %52 = arith.index_cast %51 : i32 to index
    %c0_43 = arith.constant 0 : index
    %53 = vector.load %arg2[%c0_41, %c0_42, %52, %c0_43] : memref<1x6x272x32xbf16, #tpu.memory_space<vmem>>, vector<1x1x256x32xbf16>
    %54 = vector.shape_cast %53 : vector<1x1x256x32xbf16> to vector<256x32xbf16>
    %c6 = arith.constant 6 : index
    %c0_44 = arith.constant 0 : index
    %c0_45 = arith.constant 0 : index
    %55 = vector.load %arg3[%c6, %c0_44, %c0_45] : memref<9x32x32xbf16, #tpu.memory_space<vmem>>, vector<1x32x32xbf16>
    %56 = vector.shape_cast %55 : vector<1x32x32xbf16> to vector<32x32xbf16>
    %cst_46 = arith.constant dense<0.000000e+00> : vector<256x32xf32>
    %57 = tpu.matmul %54, %56, %cst_46 {dimension_numbers = #tpu.dot_dimension_numbers<[1], [0], [0], [1], [0, 0, 1, 1], [], []>} : vector<256x32xbf16>, vector<32x32xbf16>, vector<256x32xf32> -> vector<256x32xf32>
    %58 = arith.addf %50, %57 : vector<256x32xf32>
    %c16_i32_47 = arith.constant 16 : i32
    %59 = arith.addi %1, %c16_i32_47 : i32
    %c0_48 = arith.constant 0 : index
    %c2_49 = arith.constant 2 : index
    %60 = arith.index_cast %59 : i32 to index
    %c0_50 = arith.constant 0 : index
    %61 = vector.load %arg2[%c0_48, %c2_49, %60, %c0_50] : memref<1x6x272x32xbf16, #tpu.memory_space<vmem>>, vector<1x1x256x32xbf16>
    %62 = vector.shape_cast %61 : vector<1x1x256x32xbf16> to vector<256x32xbf16>
    %c7 = arith.constant 7 : index
    %c0_51 = arith.constant 0 : index
    %c0_52 = arith.constant 0 : index
    %63 = vector.load %arg3[%c7, %c0_51, %c0_52] : memref<9x32x32xbf16, #tpu.memory_space<vmem>>, vector<1x32x32xbf16>
    %64 = vector.shape_cast %63 : vector<1x32x32xbf16> to vector<32x32xbf16>
    %cst_53 = arith.constant dense<0.000000e+00> : vector<256x32xf32>
    %65 = tpu.matmul %62, %64, %cst_53 {dimension_numbers = #tpu.dot_dimension_numbers<[1], [0], [0], [1], [0, 0, 1, 1], [], []>} : vector<256x32xbf16>, vector<32x32xbf16>, vector<256x32xf32> -> vector<256x32xf32>
    %66 = arith.addf %58, %65 : vector<256x32xf32>
    %c16_i32_54 = arith.constant 16 : i32
    %67 = arith.addi %1, %c16_i32_54 : i32
    %c0_55 = arith.constant 0 : index
    %c4_56 = arith.constant 4 : index
    %68 = arith.index_cast %67 : i32 to index
    %c0_57 = arith.constant 0 : index
    %69 = vector.load %arg2[%c0_55, %c4_56, %68, %c0_57] : memref<1x6x272x32xbf16, #tpu.memory_space<vmem>>, vector<1x1x256x32xbf16>
    %70 = vector.shape_cast %69 : vector<1x1x256x32xbf16> to vector<256x32xbf16>
    %c8 = arith.constant 8 : index
    %c0_58 = arith.constant 0 : index
    %c0_59 = arith.constant 0 : index
    %71 = vector.load %arg3[%c8, %c0_58, %c0_59] : memref<9x32x32xbf16, #tpu.memory_space<vmem>>, vector<1x32x32xbf16>
    %72 = vector.shape_cast %71 : vector<1x32x32xbf16> to vector<32x32xbf16>
    %cst_60 = arith.constant dense<0.000000e+00> : vector<256x32xf32>
    %73 = tpu.matmul %70, %72, %cst_60 {dimension_numbers = #tpu.dot_dimension_numbers<[1], [0], [0], [1], [0, 0, 1, 1], [], []>} : vector<256x32xbf16>, vector<32x32xbf16>, vector<256x32xf32> -> vector<256x32xf32>
    %74 = arith.addf %66, %73 : vector<256x32xf32>
    %c0_61 = arith.constant 0 : index
    %c0_62 = arith.constant 0 : index
    %75 = vector.load %arg4[%c0_61, %c0_62] : memref<1x32xf32, #tpu.memory_space<vmem>>, vector<1x32xf32>
    %76 = vector.broadcast %75 : vector<1x32xf32> to vector<256x32xf32>
    %77 = arith.addf %74, %76 : vector<256x32xf32>
    %cst_63 = arith.constant 0.00999999977 : f32
    %78 = vector.broadcast %cst_63 : f32 to vector<256x32xf32>
    %79 = arith.mulf %78, %77 : vector<256x32xf32>
    %80 = arith.maximumf %77, %79 : vector<256x32xf32>
    %81 = arith.truncf %80 : vector<256x32xf32> to vector<256x32xbf16>
    %c0_64 = arith.constant 0 : index
    %c0_65 = arith.constant 0 : index
    %c0_66 = arith.constant 0 : index
    %82 = vector.load %arg5[%c0_64, %c0_65, %c0_66] : memref<1x256x32xbf16, #tpu.memory_space<vmem>>, vector<1x256x32xbf16>
    %83 = vector.shape_cast %82 : vector<1x256x32xbf16> to vector<256x32xbf16>
    %84 = vector.shape_cast %81 : vector<256x32xbf16> to vector<1x256x32xbf16>
    tpu.vector_store %arg5[%c0_64, %c0_65, %c0_66], %84 {strides = array<i32>} : memref<1x256x32xbf16, #tpu.memory_space<vmem>>, vector<1x256x32xbf16>,
    return
  }
  func.func @transform_0(%arg0: i32, %arg1: i32) -> (i32, i32, i32, i32) {
    %c0_i32 = arith.constant 0 : i32
    %c0_i32_0 = arith.constant 0 : i32
    %c0_i32_1 = arith.constant 0 : i32
    %c0_i32_2 = arith.constant 0 : i32
    return %arg0, %c0_i32, %c0_i32_0, %c0_i32_1 : i32, i32, i32, i32
  }
  func.func @transform_1(%arg0: i32, %arg1: i32) -> (i32, i32, i32) {
    %c0_i32 = arith.constant 0 : i32
    %c0_i32_0 = arith.constant 0 : i32
    %c0_i32_1 = arith.constant 0 : i32
    %c0_i32_2 = arith.constant 0 : i32
    return %c0_i32, %c0_i32_0, %c0_i32_1 : i32, i32, i32
  }
  func.func @transform_2(%arg0: i32, %arg1: i32) -> (i32, i32) {
    %c0_i32 = arith.constant 0 : i32
    %c0_i32_0 = arith.constant 0 : i32
    %c0_i32_1 = arith.constant 0 : i32
    return %c0_i32, %c0_i32_0 : i32, i32
  }
  func.func @transform_3(%arg0: i32, %arg1: i32) -> (i32, i32, i32) {
    %c0_i32 = arith.constant 0 : i32
    %c0_i32_0 = arith.constant 0 : i32
    return %arg0, %arg1, %c0_i32 : i32, i32, i32
  }
}

module attributes {stable_mosaic.version = 11 : i64} {
  func.func @_conv3x3_kernel(%arg0: i32, %arg1: i32, %arg2: memref<1x3x288x32xbf16, #tpu.memory_space<vmem>>, %arg3: memref<9x32x64xbf16, #tpu.memory_space<vmem>>, %arg4: memref<1x64xf32, #tpu.memory_space<vmem>>, %arg5: memref<1x256x64xbf16, #tpu.memory_space<vmem>>) attributes {dimension_semantics = [#tpu.dimension_semantics<parallel>, #tpu.dimension_semantics<parallel>], iteration_bounds = array<i64: 2, 1>, scalar_prefetch = 0 : i64, scratch_operands = 0 : i64, tpu.core_type = #tpu.core_type<tc>, window_params = [{transform_indices = @transform_0, window_bounds = array<i64: 1, 3, 288, 32>}, {pipeline_mode = #tpu.pipeline_mode<synchronous>, transform_indices = @transform_1, window_bounds = array<i64: 9, 32, 64>}, {pipeline_mode = #tpu.pipeline_mode<synchronous>, transform_indices = @transform_2, window_bounds = array<i64: 1, 64>}, {transform_indices = @transform_3, window_bounds = array<i64: 1, 256, 64>}]} {
    %c256_i32 = arith.constant 256 : i32
    %0 = arith.muli %arg1, %c256_i32 : i32
    %1 = tpu.assume_multiple %0, 256 : i32
    %cst = arith.constant 0.000000e+00 : f32
    %2 = vector.broadcast %cst : f32 to vector<256x64xf32>
    %c0_i32 = arith.constant 0 : i32
    %3 = arith.addi %1, %c0_i32 : i32
    %c0 = arith.constant 0 : index
    %c0_0 = arith.constant 0 : index
    %4 = arith.index_cast %3 : i32 to index
    %c0_1 = arith.constant 0 : index
    %5 = vector.load %arg2[%c0, %c0_0, %4, %c0_1] : memref<1x3x288x32xbf16, #tpu.memory_space<vmem>>, vector<1x1x256x32xbf16>
    %6 = vector.shape_cast %5 : vector<1x1x256x32xbf16> to vector<256x32xbf16>
    %c0_2 = arith.constant 0 : index
    %c0_3 = arith.constant 0 : index
    %c0_4 = arith.constant 0 : index
    %7 = vector.load %arg3[%c0_2, %c0_3, %c0_4] : memref<9x32x64xbf16, #tpu.memory_space<vmem>>, vector<1x32x64xbf16>
    %8 = vector.shape_cast %7 : vector<1x32x64xbf16> to vector<32x64xbf16>
    %cst_5 = arith.constant dense<0.000000e+00> : vector<256x64xf32>
    %9 = tpu.matmul %6, %8, %cst_5 {dimension_numbers = #tpu.dot_dimension_numbers<[1], [0], [0], [1], [0, 0, 1, 1], [], []>} : vector<256x32xbf16>, vector<32x64xbf16>, vector<256x64xf32> -> vector<256x64xf32>
    %10 = arith.addf %2, %9 : vector<256x64xf32>
    %c0_i32_6 = arith.constant 0 : i32
    %11 = arith.addi %1, %c0_i32_6 : i32
    %c0_7 = arith.constant 0 : index
    %c1 = arith.constant 1 : index
    %12 = arith.index_cast %11 : i32 to index
    %c0_8 = arith.constant 0 : index
    %13 = vector.load %arg2[%c0_7, %c1, %12, %c0_8] : memref<1x3x288x32xbf16, #tpu.memory_space<vmem>>, vector<1x1x256x32xbf16>
    %14 = vector.shape_cast %13 : vector<1x1x256x32xbf16> to vector<256x32xbf16>
    %c1_9 = arith.constant 1 : index
    %c0_10 = arith.constant 0 : index
    %c0_11 = arith.constant 0 : index
    %15 = vector.load %arg3[%c1_9, %c0_10, %c0_11] : memref<9x32x64xbf16, #tpu.memory_space<vmem>>, vector<1x32x64xbf16>
    %16 = vector.shape_cast %15 : vector<1x32x64xbf16> to vector<32x64xbf16>
    %cst_12 = arith.constant dense<0.000000e+00> : vector<256x64xf32>
    %17 = tpu.matmul %14, %16, %cst_12 {dimension_numbers = #tpu.dot_dimension_numbers<[1], [0], [0], [1], [0, 0, 1, 1], [], []>} : vector<256x32xbf16>, vector<32x64xbf16>, vector<256x64xf32> -> vector<256x64xf32>
    %18 = arith.addf %10, %17 : vector<256x64xf32>
    %c0_i32_13 = arith.constant 0 : i32
    %19 = arith.addi %1, %c0_i32_13 : i32
    %c0_14 = arith.constant 0 : index
    %c2 = arith.constant 2 : index
    %20 = arith.index_cast %19 : i32 to index
    %c0_15 = arith.constant 0 : index
    %21 = vector.load %arg2[%c0_14, %c2, %20, %c0_15] : memref<1x3x288x32xbf16, #tpu.memory_space<vmem>>, vector<1x1x256x32xbf16>
    %22 = vector.shape_cast %21 : vector<1x1x256x32xbf16> to vector<256x32xbf16>
    %c2_16 = arith.constant 2 : index
    %c0_17 = arith.constant 0 : index
    %c0_18 = arith.constant 0 : index
    %23 = vector.load %arg3[%c2_16, %c0_17, %c0_18] : memref<9x32x64xbf16, #tpu.memory_space<vmem>>, vector<1x32x64xbf16>
    %24 = vector.shape_cast %23 : vector<1x32x64xbf16> to vector<32x64xbf16>
    %cst_19 = arith.constant dense<0.000000e+00> : vector<256x64xf32>
    %25 = tpu.matmul %22, %24, %cst_19 {dimension_numbers = #tpu.dot_dimension_numbers<[1], [0], [0], [1], [0, 0, 1, 1], [], []>} : vector<256x32xbf16>, vector<32x64xbf16>, vector<256x64xf32> -> vector<256x64xf32>
    %26 = arith.addf %18, %25 : vector<256x64xf32>
    %c16_i32 = arith.constant 16 : i32
    %27 = arith.addi %1, %c16_i32 : i32
    %c0_20 = arith.constant 0 : index
    %c0_21 = arith.constant 0 : index
    %28 = arith.index_cast %27 : i32 to index
    %c0_22 = arith.constant 0 : index
    %29 = vector.load %arg2[%c0_20, %c0_21, %28, %c0_22] : memref<1x3x288x32xbf16, #tpu.memory_space<vmem>>, vector<1x1x256x32xbf16>
    %30 = vector.shape_cast %29 : vector<1x1x256x32xbf16> to vector<256x32xbf16>
    %c3 = arith.constant 3 : index
    %c0_23 = arith.constant 0 : index
    %c0_24 = arith.constant 0 : index
    %31 = vector.load %arg3[%c3, %c0_23, %c0_24] : memref<9x32x64xbf16, #tpu.memory_space<vmem>>, vector<1x32x64xbf16>
    %32 = vector.shape_cast %31 : vector<1x32x64xbf16> to vector<32x64xbf16>
    %cst_25 = arith.constant dense<0.000000e+00> : vector<256x64xf32>
    %33 = tpu.matmul %30, %32, %cst_25 {dimension_numbers = #tpu.dot_dimension_numbers<[1], [0], [0], [1], [0, 0, 1, 1], [], []>} : vector<256x32xbf16>, vector<32x64xbf16>, vector<256x64xf32> -> vector<256x64xf32>
    %34 = arith.addf %26, %33 : vector<256x64xf32>
    %c16_i32_26 = arith.constant 16 : i32
    %35 = arith.addi %1, %c16_i32_26 : i32
    %c0_27 = arith.constant 0 : index
    %c1_28 = arith.constant 1 : index
    %36 = arith.index_cast %35 : i32 to index
    %c0_29 = arith.constant 0 : index
    %37 = vector.load %arg2[%c0_27, %c1_28, %36, %c0_29] : memref<1x3x288x32xbf16, #tpu.memory_space<vmem>>, vector<1x1x256x32xbf16>
    %38 = vector.shape_cast %37 : vector<1x1x256x32xbf16> to vector<256x32xbf16>
    %c4 = arith.constant 4 : index
    %c0_30 = arith.constant 0 : index
    %c0_31 = arith.constant 0 : index
    %39 = vector.load %arg3[%c4, %c0_30, %c0_31] : memref<9x32x64xbf16, #tpu.memory_space<vmem>>, vector<1x32x64xbf16>
    %40 = vector.shape_cast %39 : vector<1x32x64xbf16> to vector<32x64xbf16>
    %cst_32 = arith.constant dense<0.000000e+00> : vector<256x64xf32>
    %41 = tpu.matmul %38, %40, %cst_32 {dimension_numbers = #tpu.dot_dimension_numbers<[1], [0], [0], [1], [0, 0, 1, 1], [], []>} : vector<256x32xbf16>, vector<32x64xbf16>, vector<256x64xf32> -> vector<256x64xf32>
    %42 = arith.addf %34, %41 : vector<256x64xf32>
    %c16_i32_33 = arith.constant 16 : i32
    %43 = arith.addi %1, %c16_i32_33 : i32
    %c0_34 = arith.constant 0 : index
    %c2_35 = arith.constant 2 : index
    %44 = arith.index_cast %43 : i32 to index
    %c0_36 = arith.constant 0 : index
    %45 = vector.load %arg2[%c0_34, %c2_35, %44, %c0_36] : memref<1x3x288x32xbf16, #tpu.memory_space<vmem>>, vector<1x1x256x32xbf16>
    %46 = vector.shape_cast %45 : vector<1x1x256x32xbf16> to vector<256x32xbf16>
    %c5 = arith.constant 5 : index
    %c0_37 = arith.constant 0 : index
    %c0_38 = arith.constant 0 : index
    %47 = vector.load %arg3[%c5, %c0_37, %c0_38] : memref<9x32x64xbf16, #tpu.memory_space<vmem>>, vector<1x32x64xbf16>
    %48 = vector.shape_cast %47 : vector<1x32x64xbf16> to vector<32x64xbf16>
    %cst_39 = arith.constant dense<0.000000e+00> : vector<256x64xf32>
    %49 = tpu.matmul %46, %48, %cst_39 {dimension_numbers = #tpu.dot_dimension_numbers<[1], [0], [0], [1], [0, 0, 1, 1], [], []>} : vector<256x32xbf16>, vector<32x64xbf16>, vector<256x64xf32> -> vector<256x64xf32>
    %50 = arith.addf %42, %49 : vector<256x64xf32>
    %c32_i32 = arith.constant 32 : i32
    %51 = arith.addi %1, %c32_i32 : i32
    %c0_40 = arith.constant 0 : index
    %c0_41 = arith.constant 0 : index
    %52 = arith.index_cast %51 : i32 to index
    %c0_42 = arith.constant 0 : index
    %53 = vector.load %arg2[%c0_40, %c0_41, %52, %c0_42] : memref<1x3x288x32xbf16, #tpu.memory_space<vmem>>, vector<1x1x256x32xbf16>
    %54 = vector.shape_cast %53 : vector<1x1x256x32xbf16> to vector<256x32xbf16>
    %c6 = arith.constant 6 : index
    %c0_43 = arith.constant 0 : index
    %c0_44 = arith.constant 0 : index
    %55 = vector.load %arg3[%c6, %c0_43, %c0_44] : memref<9x32x64xbf16, #tpu.memory_space<vmem>>, vector<1x32x64xbf16>
    %56 = vector.shape_cast %55 : vector<1x32x64xbf16> to vector<32x64xbf16>
    %cst_45 = arith.constant dense<0.000000e+00> : vector<256x64xf32>
    %57 = tpu.matmul %54, %56, %cst_45 {dimension_numbers = #tpu.dot_dimension_numbers<[1], [0], [0], [1], [0, 0, 1, 1], [], []>} : vector<256x32xbf16>, vector<32x64xbf16>, vector<256x64xf32> -> vector<256x64xf32>
    %58 = arith.addf %50, %57 : vector<256x64xf32>
    %c32_i32_46 = arith.constant 32 : i32
    %59 = arith.addi %1, %c32_i32_46 : i32
    %c0_47 = arith.constant 0 : index
    %c1_48 = arith.constant 1 : index
    %60 = arith.index_cast %59 : i32 to index
    %c0_49 = arith.constant 0 : index
    %61 = vector.load %arg2[%c0_47, %c1_48, %60, %c0_49] : memref<1x3x288x32xbf16, #tpu.memory_space<vmem>>, vector<1x1x256x32xbf16>
    %62 = vector.shape_cast %61 : vector<1x1x256x32xbf16> to vector<256x32xbf16>
    %c7 = arith.constant 7 : index
    %c0_50 = arith.constant 0 : index
    %c0_51 = arith.constant 0 : index
    %63 = vector.load %arg3[%c7, %c0_50, %c0_51] : memref<9x32x64xbf16, #tpu.memory_space<vmem>>, vector<1x32x64xbf16>
    %64 = vector.shape_cast %63 : vector<1x32x64xbf16> to vector<32x64xbf16>
    %cst_52 = arith.constant dense<0.000000e+00> : vector<256x64xf32>
    %65 = tpu.matmul %62, %64, %cst_52 {dimension_numbers = #tpu.dot_dimension_numbers<[1], [0], [0], [1], [0, 0, 1, 1], [], []>} : vector<256x32xbf16>, vector<32x64xbf16>, vector<256x64xf32> -> vector<256x64xf32>
    %66 = arith.addf %58, %65 : vector<256x64xf32>
    %c32_i32_53 = arith.constant 32 : i32
    %67 = arith.addi %1, %c32_i32_53 : i32
    %c0_54 = arith.constant 0 : index
    %c2_55 = arith.constant 2 : index
    %68 = arith.index_cast %67 : i32 to index
    %c0_56 = arith.constant 0 : index
    %69 = vector.load %arg2[%c0_54, %c2_55, %68, %c0_56] : memref<1x3x288x32xbf16, #tpu.memory_space<vmem>>, vector<1x1x256x32xbf16>
    %70 = vector.shape_cast %69 : vector<1x1x256x32xbf16> to vector<256x32xbf16>
    %c8 = arith.constant 8 : index
    %c0_57 = arith.constant 0 : index
    %c0_58 = arith.constant 0 : index
    %71 = vector.load %arg3[%c8, %c0_57, %c0_58] : memref<9x32x64xbf16, #tpu.memory_space<vmem>>, vector<1x32x64xbf16>
    %72 = vector.shape_cast %71 : vector<1x32x64xbf16> to vector<32x64xbf16>
    %cst_59 = arith.constant dense<0.000000e+00> : vector<256x64xf32>
    %73 = tpu.matmul %70, %72, %cst_59 {dimension_numbers = #tpu.dot_dimension_numbers<[1], [0], [0], [1], [0, 0, 1, 1], [], []>} : vector<256x32xbf16>, vector<32x64xbf16>, vector<256x64xf32> -> vector<256x64xf32>
    %74 = arith.addf %66, %73 : vector<256x64xf32>
    %c0_60 = arith.constant 0 : index
    %c0_61 = arith.constant 0 : index
    %75 = vector.load %arg4[%c0_60, %c0_61] : memref<1x64xf32, #tpu.memory_space<vmem>>, vector<1x64xf32>
    %76 = vector.broadcast %75 : vector<1x64xf32> to vector<256x64xf32>
    %77 = arith.addf %74, %76 : vector<256x64xf32>
    %cst_62 = arith.constant 0.00999999977 : f32
    %78 = vector.broadcast %cst_62 : f32 to vector<256x64xf32>
    %79 = arith.mulf %78, %77 : vector<256x64xf32>
    %80 = arith.maximumf %77, %79 : vector<256x64xf32>
    %81 = arith.truncf %80 : vector<256x64xf32> to vector<256x64xbf16>
    %c0_63 = arith.constant 0 : index
    %c0_64 = arith.constant 0 : index
    %c0_65 = arith.constant 0 : index
    %82 = vector.load %arg5[%c0_63, %c0_64, %c0_65] : memref<1x256x64xbf16, #tpu.memory_space<vmem>>, vector<1x256x64xbf16>
    %83 = vector.shape_cast %82 : vector<1x256x64xbf16> to vector<256x64xbf16>
    %84 = vector.shape_cast %81 : vector<256x64xbf16> to vector<1x256x64xbf16>
    tpu.vector_store %arg5[%c0_63, %c0_64, %c0_65], %84 {strides = array<i32>} : memref<1x256x64xbf16, #tpu.memory_space<vmem>>, vector<1x256x64xbf16>,
    return
  }
  func.func @transform_0(%arg0: i32, %arg1: i32) -> (i32, i32, i32, i32) {
    %c0_i32 = arith.constant 0 : i32
    %c0_i32_0 = arith.constant 0 : i32
    %c0_i32_1 = arith.constant 0 : i32
    %c0_i32_2 = arith.constant 0 : i32
    return %arg0, %c0_i32, %c0_i32_0, %c0_i32_1 : i32, i32, i32, i32
  }
  func.func @transform_1(%arg0: i32, %arg1: i32) -> (i32, i32, i32) {
    %c0_i32 = arith.constant 0 : i32
    %c0_i32_0 = arith.constant 0 : i32
    %c0_i32_1 = arith.constant 0 : i32
    %c0_i32_2 = arith.constant 0 : i32
    return %c0_i32, %c0_i32_0, %c0_i32_1 : i32, i32, i32
  }
  func.func @transform_2(%arg0: i32, %arg1: i32) -> (i32, i32) {
    %c0_i32 = arith.constant 0 : i32
    %c0_i32_0 = arith.constant 0 : i32
    %c0_i32_1 = arith.constant 0 : i32
    return %c0_i32, %c0_i32_0 : i32, i32
  }
  func.func @transform_3(%arg0: i32, %arg1: i32) -> (i32, i32, i32) {
    %c0_i32 = arith.constant 0 : i32
    %c0_i32_0 = arith.constant 0 : i32
    return %arg0, %arg1, %c0_i32 : i32, i32, i32
  }
}

module attributes {stable_mosaic.version = 11 : i64} {
  func.func @_conv3x3_kernel(%arg0: i32, %arg1: i32, %arg2: memref<1x6x72x64xbf16, #tpu.memory_space<vmem>>, %arg3: memref<9x64x64xbf16, #tpu.memory_space<vmem>>, %arg4: memref<1x64xf32, #tpu.memory_space<vmem>>, %arg5: memref<1x64x64xbf16, #tpu.memory_space<vmem>>) attributes {dimension_semantics = [#tpu.dimension_semantics<parallel>, #tpu.dimension_semantics<parallel>], iteration_bounds = array<i64: 2, 1>, scalar_prefetch = 0 : i64, scratch_operands = 0 : i64, tpu.core_type = #tpu.core_type<tc>, window_params = [{transform_indices = @transform_0, window_bounds = array<i64: 1, 6, 72, 64>}, {pipeline_mode = #tpu.pipeline_mode<synchronous>, transform_indices = @transform_1, window_bounds = array<i64: 9, 64, 64>}, {pipeline_mode = #tpu.pipeline_mode<synchronous>, transform_indices = @transform_2, window_bounds = array<i64: 1, 64>}, {transform_indices = @transform_3, window_bounds = array<i64: 1, 64, 64>}]} {
    %c64_i32 = arith.constant 64 : i32
    %0 = arith.muli %arg1, %c64_i32 : i32
    %1 = tpu.assume_multiple %0, 64 : i32
    %cst = arith.constant 0.000000e+00 : f32
    %2 = vector.broadcast %cst : f32 to vector<64x64xf32>
    %c0_i32 = arith.constant 0 : i32
    %3 = arith.addi %1, %c0_i32 : i32
    %c0 = arith.constant 0 : index
    %c0_0 = arith.constant 0 : index
    %4 = arith.index_cast %3 : i32 to index
    %c0_1 = arith.constant 0 : index
    %5 = vector.load %arg2[%c0, %c0_0, %4, %c0_1] : memref<1x6x72x64xbf16, #tpu.memory_space<vmem>>, vector<1x1x64x64xbf16>
    %6 = vector.shape_cast %5 : vector<1x1x64x64xbf16> to vector<64x64xbf16>
    %c0_2 = arith.constant 0 : index
    %c0_3 = arith.constant 0 : index
    %c0_4 = arith.constant 0 : index
    %7 = vector.load %arg3[%c0_2, %c0_3, %c0_4] : memref<9x64x64xbf16, #tpu.memory_space<vmem>>, vector<1x64x64xbf16>
    %8 = vector.shape_cast %7 : vector<1x64x64xbf16> to vector<64x64xbf16>
    %cst_5 = arith.constant dense<0.000000e+00> : vector<64x64xf32>
    %9 = tpu.matmul %6, %8, %cst_5 {dimension_numbers = #tpu.dot_dimension_numbers<[1], [0], [0], [1], [0, 0, 1, 1], [], []>} : vector<64x64xbf16>, vector<64x64xbf16>, vector<64x64xf32> -> vector<64x64xf32>
    %10 = arith.addf %2, %9 : vector<64x64xf32>
    %c0_i32_6 = arith.constant 0 : i32
    %11 = arith.addi %1, %c0_i32_6 : i32
    %c0_7 = arith.constant 0 : index
    %c2 = arith.constant 2 : index
    %12 = arith.index_cast %11 : i32 to index
    %c0_8 = arith.constant 0 : index
    %13 = vector.load %arg2[%c0_7, %c2, %12, %c0_8] : memref<1x6x72x64xbf16, #tpu.memory_space<vmem>>, vector<1x1x64x64xbf16>
    %14 = vector.shape_cast %13 : vector<1x1x64x64xbf16> to vector<64x64xbf16>
    %c1 = arith.constant 1 : index
    %c0_9 = arith.constant 0 : index
    %c0_10 = arith.constant 0 : index
    %15 = vector.load %arg3[%c1, %c0_9, %c0_10] : memref<9x64x64xbf16, #tpu.memory_space<vmem>>, vector<1x64x64xbf16>
    %16 = vector.shape_cast %15 : vector<1x64x64xbf16> to vector<64x64xbf16>
    %cst_11 = arith.constant dense<0.000000e+00> : vector<64x64xf32>
    %17 = tpu.matmul %14, %16, %cst_11 {dimension_numbers = #tpu.dot_dimension_numbers<[1], [0], [0], [1], [0, 0, 1, 1], [], []>} : vector<64x64xbf16>, vector<64x64xbf16>, vector<64x64xf32> -> vector<64x64xf32>
    %18 = arith.addf %10, %17 : vector<64x64xf32>
    %c0_i32_12 = arith.constant 0 : i32
    %19 = arith.addi %1, %c0_i32_12 : i32
    %c0_13 = arith.constant 0 : index
    %c4 = arith.constant 4 : index
    %20 = arith.index_cast %19 : i32 to index
    %c0_14 = arith.constant 0 : index
    %21 = vector.load %arg2[%c0_13, %c4, %20, %c0_14] : memref<1x6x72x64xbf16, #tpu.memory_space<vmem>>, vector<1x1x64x64xbf16>
    %22 = vector.shape_cast %21 : vector<1x1x64x64xbf16> to vector<64x64xbf16>
    %c2_15 = arith.constant 2 : index
    %c0_16 = arith.constant 0 : index
    %c0_17 = arith.constant 0 : index
    %23 = vector.load %arg3[%c2_15, %c0_16, %c0_17] : memref<9x64x64xbf16, #tpu.memory_space<vmem>>, vector<1x64x64xbf16>
    %24 = vector.shape_cast %23 : vector<1x64x64xbf16> to vector<64x64xbf16>
    %cst_18 = arith.constant dense<0.000000e+00> : vector<64x64xf32>
    %25 = tpu.matmul %22, %24, %cst_18 {dimension_numbers = #tpu.dot_dimension_numbers<[1], [0], [0], [1], [0, 0, 1, 1], [], []>} : vector<64x64xbf16>, vector<64x64xbf16>, vector<64x64xf32> -> vector<64x64xf32>
    %26 = arith.addf %18, %25 : vector<64x64xf32>
    %c0_i32_19 = arith.constant 0 : i32
    %27 = arith.addi %1, %c0_i32_19 : i32
    %c0_20 = arith.constant 0 : index
    %c1_21 = arith.constant 1 : index
    %28 = arith.index_cast %27 : i32 to index
    %c0_22 = arith.constant 0 : index
    %29 = vector.load %arg2[%c0_20, %c1_21, %28, %c0_22] : memref<1x6x72x64xbf16, #tpu.memory_space<vmem>>, vector<1x1x64x64xbf16>
    %30 = vector.shape_cast %29 : vector<1x1x64x64xbf16> to vector<64x64xbf16>
    %c3 = arith.constant 3 : index
    %c0_23 = arith.constant 0 : index
    %c0_24 = arith.constant 0 : index
    %31 = vector.load %arg3[%c3, %c0_23, %c0_24] : memref<9x64x64xbf16, #tpu.memory_space<vmem>>, vector<1x64x64xbf16>
    %32 = vector.shape_cast %31 : vector<1x64x64xbf16> to vector<64x64xbf16>
    %cst_25 = arith.constant dense<0.000000e+00> : vector<64x64xf32>
    %33 = tpu.matmul %30, %32, %cst_25 {dimension_numbers = #tpu.dot_dimension_numbers<[1], [0], [0], [1], [0, 0, 1, 1], [], []>} : vector<64x64xbf16>, vector<64x64xbf16>, vector<64x64xf32> -> vector<64x64xf32>
    %34 = arith.addf %26, %33 : vector<64x64xf32>
    %c0_i32_26 = arith.constant 0 : i32
    %35 = arith.addi %1, %c0_i32_26 : i32
    %c0_27 = arith.constant 0 : index
    %c3_28 = arith.constant 3 : index
    %36 = arith.index_cast %35 : i32 to index
    %c0_29 = arith.constant 0 : index
    %37 = vector.load %arg2[%c0_27, %c3_28, %36, %c0_29] : memref<1x6x72x64xbf16, #tpu.memory_space<vmem>>, vector<1x1x64x64xbf16>
    %38 = vector.shape_cast %37 : vector<1x1x64x64xbf16> to vector<64x64xbf16>
    %c4_30 = arith.constant 4 : index
    %c0_31 = arith.constant 0 : index
    %c0_32 = arith.constant 0 : index
    %39 = vector.load %arg3[%c4_30, %c0_31, %c0_32] : memref<9x64x64xbf16, #tpu.memory_space<vmem>>, vector<1x64x64xbf16>
    %40 = vector.shape_cast %39 : vector<1x64x64xbf16> to vector<64x64xbf16>
    %cst_33 = arith.constant dense<0.000000e+00> : vector<64x64xf32>
    %41 = tpu.matmul %38, %40, %cst_33 {dimension_numbers = #tpu.dot_dimension_numbers<[1], [0], [0], [1], [0, 0, 1, 1], [], []>} : vector<64x64xbf16>, vector<64x64xbf16>, vector<64x64xf32> -> vector<64x64xf32>
    %42 = arith.addf %34, %41 : vector<64x64xf32>
    %c0_i32_34 = arith.constant 0 : i32
    %43 = arith.addi %1, %c0_i32_34 : i32
    %c0_35 = arith.constant 0 : index
    %c5 = arith.constant 5 : index
    %44 = arith.index_cast %43 : i32 to index
    %c0_36 = arith.constant 0 : index
    %45 = vector.load %arg2[%c0_35, %c5, %44, %c0_36] : memref<1x6x72x64xbf16, #tpu.memory_space<vmem>>, vector<1x1x64x64xbf16>
    %46 = vector.shape_cast %45 : vector<1x1x64x64xbf16> to vector<64x64xbf16>
    %c5_37 = arith.constant 5 : index
    %c0_38 = arith.constant 0 : index
    %c0_39 = arith.constant 0 : index
    %47 = vector.load %arg3[%c5_37, %c0_38, %c0_39] : memref<9x64x64xbf16, #tpu.memory_space<vmem>>, vector<1x64x64xbf16>
    %48 = vector.shape_cast %47 : vector<1x64x64xbf16> to vector<64x64xbf16>
    %cst_40 = arith.constant dense<0.000000e+00> : vector<64x64xf32>
    %49 = tpu.matmul %46, %48, %cst_40 {dimension_numbers = #tpu.dot_dimension_numbers<[1], [0], [0], [1], [0, 0, 1, 1], [], []>} : vector<64x64xbf16>, vector<64x64xbf16>, vector<64x64xf32> -> vector<64x64xf32>
    %50 = arith.addf %42, %49 : vector<64x64xf32>
    %c8_i32 = arith.constant 8 : i32
    %51 = arith.addi %1, %c8_i32 : i32
    %c0_41 = arith.constant 0 : index
    %c0_42 = arith.constant 0 : index
    %52 = arith.index_cast %51 : i32 to index
    %c0_43 = arith.constant 0 : index
    %53 = vector.load %arg2[%c0_41, %c0_42, %52, %c0_43] : memref<1x6x72x64xbf16, #tpu.memory_space<vmem>>, vector<1x1x64x64xbf16>
    %54 = vector.shape_cast %53 : vector<1x1x64x64xbf16> to vector<64x64xbf16>
    %c6 = arith.constant 6 : index
    %c0_44 = arith.constant 0 : index
    %c0_45 = arith.constant 0 : index
    %55 = vector.load %arg3[%c6, %c0_44, %c0_45] : memref<9x64x64xbf16, #tpu.memory_space<vmem>>, vector<1x64x64xbf16>
    %56 = vector.shape_cast %55 : vector<1x64x64xbf16> to vector<64x64xbf16>
    %cst_46 = arith.constant dense<0.000000e+00> : vector<64x64xf32>
    %57 = tpu.matmul %54, %56, %cst_46 {dimension_numbers = #tpu.dot_dimension_numbers<[1], [0], [0], [1], [0, 0, 1, 1], [], []>} : vector<64x64xbf16>, vector<64x64xbf16>, vector<64x64xf32> -> vector<64x64xf32>
    %58 = arith.addf %50, %57 : vector<64x64xf32>
    %c8_i32_47 = arith.constant 8 : i32
    %59 = arith.addi %1, %c8_i32_47 : i32
    %c0_48 = arith.constant 0 : index
    %c2_49 = arith.constant 2 : index
    %60 = arith.index_cast %59 : i32 to index
    %c0_50 = arith.constant 0 : index
    %61 = vector.load %arg2[%c0_48, %c2_49, %60, %c0_50] : memref<1x6x72x64xbf16, #tpu.memory_space<vmem>>, vector<1x1x64x64xbf16>
    %62 = vector.shape_cast %61 : vector<1x1x64x64xbf16> to vector<64x64xbf16>
    %c7 = arith.constant 7 : index
    %c0_51 = arith.constant 0 : index
    %c0_52 = arith.constant 0 : index
    %63 = vector.load %arg3[%c7, %c0_51, %c0_52] : memref<9x64x64xbf16, #tpu.memory_space<vmem>>, vector<1x64x64xbf16>
    %64 = vector.shape_cast %63 : vector<1x64x64xbf16> to vector<64x64xbf16>
    %cst_53 = arith.constant dense<0.000000e+00> : vector<64x64xf32>
    %65 = tpu.matmul %62, %64, %cst_53 {dimension_numbers = #tpu.dot_dimension_numbers<[1], [0], [0], [1], [0, 0, 1, 1], [], []>} : vector<64x64xbf16>, vector<64x64xbf16>, vector<64x64xf32> -> vector<64x64xf32>
    %66 = arith.addf %58, %65 : vector<64x64xf32>
    %c8_i32_54 = arith.constant 8 : i32
    %67 = arith.addi %1, %c8_i32_54 : i32
    %c0_55 = arith.constant 0 : index
    %c4_56 = arith.constant 4 : index
    %68 = arith.index_cast %67 : i32 to index
    %c0_57 = arith.constant 0 : index
    %69 = vector.load %arg2[%c0_55, %c4_56, %68, %c0_57] : memref<1x6x72x64xbf16, #tpu.memory_space<vmem>>, vector<1x1x64x64xbf16>
    %70 = vector.shape_cast %69 : vector<1x1x64x64xbf16> to vector<64x64xbf16>
    %c8 = arith.constant 8 : index
    %c0_58 = arith.constant 0 : index
    %c0_59 = arith.constant 0 : index
    %71 = vector.load %arg3[%c8, %c0_58, %c0_59] : memref<9x64x64xbf16, #tpu.memory_space<vmem>>, vector<1x64x64xbf16>
    %72 = vector.shape_cast %71 : vector<1x64x64xbf16> to vector<64x64xbf16>
    %cst_60 = arith.constant dense<0.000000e+00> : vector<64x64xf32>
    %73 = tpu.matmul %70, %72, %cst_60 {dimension_numbers = #tpu.dot_dimension_numbers<[1], [0], [0], [1], [0, 0, 1, 1], [], []>} : vector<64x64xbf16>, vector<64x64xbf16>, vector<64x64xf32> -> vector<64x64xf32>
    %74 = arith.addf %66, %73 : vector<64x64xf32>
    %c0_61 = arith.constant 0 : index
    %c0_62 = arith.constant 0 : index
    %75 = vector.load %arg4[%c0_61, %c0_62] : memref<1x64xf32, #tpu.memory_space<vmem>>, vector<1x64xf32>
    %76 = vector.broadcast %75 : vector<1x64xf32> to vector<64x64xf32>
    %77 = arith.addf %74, %76 : vector<64x64xf32>
    %cst_63 = arith.constant 0.00999999977 : f32
    %78 = vector.broadcast %cst_63 : f32 to vector<64x64xf32>
    %79 = arith.mulf %78, %77 : vector<64x64xf32>
    %80 = arith.maximumf %77, %79 : vector<64x64xf32>
    %81 = arith.truncf %80 : vector<64x64xf32> to vector<64x64xbf16>
    %c0_64 = arith.constant 0 : index
    %c0_65 = arith.constant 0 : index
    %c0_66 = arith.constant 0 : index
    %82 = vector.load %arg5[%c0_64, %c0_65, %c0_66] : memref<1x64x64xbf16, #tpu.memory_space<vmem>>, vector<1x64x64xbf16>
    %83 = vector.shape_cast %82 : vector<1x64x64xbf16> to vector<64x64xbf16>
    %84 = vector.shape_cast %81 : vector<64x64xbf16> to vector<1x64x64xbf16>
    tpu.vector_store %arg5[%c0_64, %c0_65, %c0_66], %84 {strides = array<i32>} : memref<1x64x64xbf16, #tpu.memory_space<vmem>>, vector<1x64x64xbf16>,
    return
  }
  func.func @transform_0(%arg0: i32, %arg1: i32) -> (i32, i32, i32, i32) {
    %c0_i32 = arith.constant 0 : i32
    %c0_i32_0 = arith.constant 0 : i32
    %c0_i32_1 = arith.constant 0 : i32
    %c0_i32_2 = arith.constant 0 : i32
    return %arg0, %c0_i32, %c0_i32_0, %c0_i32_1 : i32, i32, i32, i32
  }
  func.func @transform_1(%arg0: i32, %arg1: i32) -> (i32, i32, i32) {
    %c0_i32 = arith.constant 0 : i32
    %c0_i32_0 = arith.constant 0 : i32
    %c0_i32_1 = arith.constant 0 : i32
    %c0_i32_2 = arith.constant 0 : i32
    return %c0_i32, %c0_i32_0, %c0_i32_1 : i32, i32, i32
  }
  func.func @transform_2(%arg0: i32, %arg1: i32) -> (i32, i32) {
    %c0_i32 = arith.constant 0 : i32
    %c0_i32_0 = arith.constant 0 : i32
    %c0_i32_1 = arith.constant 0 : i32
    return %c0_i32, %c0_i32_0 : i32, i32
  }
  func.func @transform_3(%arg0: i32, %arg1: i32) -> (i32, i32, i32) {
    %c0_i32 = arith.constant 0 : i32
    %c0_i32_0 = arith.constant 0 : i32
    return %arg0, %arg1, %c0_i32 : i32, i32, i32
  }
}

module attributes {stable_mosaic.version = 11 : i64} {
  func.func @_fc_head_kernel(%arg0: i32, %arg1: memref<2x1024xbf16, #tpu.memory_space<vmem>>, %arg2: memref<1024x128xbf16, #tpu.memory_space<vmem>>, %arg3: memref<1x128xf32, #tpu.memory_space<vmem>>, %arg4: memref<128x10xbf16, #tpu.memory_space<vmem>>, %arg5: memref<1x10xf32, #tpu.memory_space<vmem>>, %arg6: memref<2x10xf32, #tpu.memory_space<vmem>>, %arg7: memref<2x128xf32, #tpu.memory_space<vmem>>) attributes {dimension_semantics = [#tpu.dimension_semantics<arbitrary>], iteration_bounds = array<i64: 4>, scalar_prefetch = 0 : i64, scratch_operands = 1 : i64, tpu.core_type = #tpu.core_type<tc>, window_params = [{transform_indices = @transform_0, window_bounds = array<i64: 2, 1024>}, {transform_indices = @transform_1, window_bounds = array<i64: 1024, 128>}, {pipeline_mode = #tpu.pipeline_mode<synchronous>, transform_indices = @transform_2, window_bounds = array<i64: 1, 128>}, {pipeline_mode = #tpu.pipeline_mode<synchronous>, transform_indices = @transform_3, window_bounds = array<i64: 128, 10>}, {pipeline_mode = #tpu.pipeline_mode<synchronous>, transform_indices = @transform_4, window_bounds = array<i64: 1, 10>}, {pipeline_mode = #tpu.pipeline_mode<synchronous>, transform_indices = @transform_5, window_bounds = array<i64: 2, 10>}]} {
    %c0_i32 = arith.constant 0 : i32
    %0 = arith.cmpi eq, %arg0, %c0_i32 : i32
    %1 = arith.extui %0 : i1 to i32
    %c0_i32_0 = arith.constant 0 : i32
    %2 = arith.cmpi ne, %1, %c0_i32_0 : i32
    scf.if %2 {
      %cst_9 = arith.constant 0.000000e+00 : f32
      %12 = vector.broadcast %cst_9 : f32 to vector<2x128xf32>
      %c0_10 = arith.constant 0 : index
      %c0_11 = arith.constant 0 : index
      %13 = vector.load %arg7[%c0_10, %c0_11] : memref<2x128xf32, #tpu.memory_space<vmem>>, vector<2x128xf32>
      tpu.vector_store %arg7[%c0_10, %c0_11], %12 {strides = array<i32>} : memref<2x128xf32, #tpu.memory_space<vmem>>, vector<2x128xf32>,
    } else {
    }
    %c0 = arith.constant 0 : index
    %c0_1 = arith.constant 0 : index
    %3 = vector.load %arg7[%c0, %c0_1] : memref<2x128xf32, #tpu.memory_space<vmem>>, vector<2x128xf32>
    %c0_2 = arith.constant 0 : index
    %c0_3 = arith.constant 0 : index
    %4 = vector.load %arg1[%c0_2, %c0_3] : memref<2x1024xbf16, #tpu.memory_space<vmem>>, vector<2x1024xbf16>
    %c0_4 = arith.constant 0 : index
    %c0_5 = arith.constant 0 : index
    %5 = vector.load %arg2[%c0_4, %c0_5] : memref<1024x128xbf16, #tpu.memory_space<vmem>>, vector<1024x128xbf16>
    %cst = arith.constant dense<0.000000e+00> : vector<2x128xf32>
    %6 = tpu.matmul %4, %5, %cst {dimension_numbers = #tpu.dot_dimension_numbers<[1], [0], [0], [1], [0, 0, 1, 1], [], []>} : vector<2x1024xbf16>, vector<1024x128xbf16>, vector<2x128xf32> -> vector<2x128xf32>
    %7 = arith.addf %3, %6 : vector<2x128xf32>
    %c0_6 = arith.constant 0 : index
    %c0_7 = arith.constant 0 : index
    %8 = vector.load %arg7[%c0_6, %c0_7] : memref<2x128xf32, #tpu.memory_space<vmem>>, vector<2x128xf32>
    tpu.vector_store %arg7[%c0_6, %c0_7], %7 {strides = array<i32>} : memref<2x128xf32, #tpu.memory_space<vmem>>, vector<2x128xf32>,
    %c3_i32 = arith.constant 3 : i32
    %9 = arith.cmpi eq, %arg0, %c3_i32 : i32
    %10 = arith.extui %9 : i1 to i32
    %c0_i32_8 = arith.constant 0 : i32
    %11 = arith.cmpi ne, %10, %c0_i32_8 : i32
    scf.if %11 {
      %c0_9 = arith.constant 0 : index
      %c0_10 = arith.constant 0 : index
      %12 = vector.load %arg7[%c0_9, %c0_10] : memref<2x128xf32, #tpu.memory_space<vmem>>, vector<2x128xf32>
      %c0_11 = arith.constant 0 : index
      %c0_12 = arith.constant 0 : index
      %13 = vector.load %arg3[%c0_11, %c0_12] : memref<1x128xf32, #tpu.memory_space<vmem>>, vector<1x128xf32>
      %14 = vector.broadcast %13 : vector<1x128xf32> to vector<2x128xf32>
      %15 = arith.addf %12, %14 : vector<2x128xf32>
      %cst_13 = arith.constant 0.00999999977 : f32
      %16 = vector.broadcast %cst_13 : f32 to vector<2x128xf32>
      %17 = arith.mulf %16, %15 : vector<2x128xf32>
      %18 = arith.maximumf %15, %17 : vector<2x128xf32>
      %19 = arith.truncf %18 : vector<2x128xf32> to vector<2x128xbf16>
      %c0_14 = arith.constant 0 : index
      %c0_15 = arith.constant 0 : index
      %20 = vector.load %arg4[%c0_14, %c0_15] : memref<128x10xbf16, #tpu.memory_space<vmem>>, vector<128x10xbf16>
      %cst_16 = arith.constant dense<0.000000e+00> : vector<2x10xf32>
      %21 = tpu.matmul %19, %20, %cst_16 {dimension_numbers = #tpu.dot_dimension_numbers<[1], [0], [0], [1], [0, 0, 1, 1], [], []>} : vector<2x128xbf16>, vector<128x10xbf16>, vector<2x10xf32> -> vector<2x10xf32>
      %c0_17 = arith.constant 0 : index
      %c0_18 = arith.constant 0 : index
      %22 = vector.load %arg5[%c0_17, %c0_18] : memref<1x10xf32, #tpu.memory_space<vmem>>, vector<1x10xf32>
      %23 = vector.broadcast %22 : vector<1x10xf32> to vector<2x10xf32>
      %24 = arith.addf %21, %23 : vector<2x10xf32>
      %c0_19 = arith.constant 0 : index
      %c0_20 = arith.constant 0 : index
      %25 = vector.load %arg6[%c0_19, %c0_20] : memref<2x10xf32, #tpu.memory_space<vmem>>, vector<2x10xf32>
      tpu.vector_store %arg6[%c0_19, %c0_20], %24 {strides = array<i32>} : memref<2x10xf32, #tpu.memory_space<vmem>>, vector<2x10xf32>,
    } else {
    }
    return
  }
  func.func @transform_0(%arg0: i32) -> (i32, i32) {
    %c0_i32 = arith.constant 0 : i32
    %c0_i32_0 = arith.constant 0 : i32
    return %c0_i32, %arg0 : i32, i32
  }
  func.func @transform_1(%arg0: i32) -> (i32, i32) {
    %c0_i32 = arith.constant 0 : i32
    %c0_i32_0 = arith.constant 0 : i32
    return %arg0, %c0_i32 : i32, i32
  }
  func.func @transform_2(%arg0: i32) -> (i32, i32) {
    %c0_i32 = arith.constant 0 : i32
    %c0_i32_0 = arith.constant 0 : i32
    %c0_i32_1 = arith.constant 0 : i32
    return %c0_i32, %c0_i32_0 : i32, i32
  }
  func.func @transform_3(%arg0: i32) -> (i32, i32) {
    %c0_i32 = arith.constant 0 : i32
    %c0_i32_0 = arith.constant 0 : i32
    %c0_i32_1 = arith.constant 0 : i32
    return %c0_i32, %c0_i32_0 : i32, i32
  }
  func.func @transform_4(%arg0: i32) -> (i32, i32) {
    %c0_i32 = arith.constant 0 : i32
    %c0_i32_0 = arith.constant 0 : i32
    %c0_i32_1 = arith.constant 0 : i32
    return %c0_i32, %c0_i32_0 : i32, i32
  }
  func.func @transform_5(%arg0: i32) -> (i32, i32) {
    %c0_i32 = arith.constant 0 : i32
    %c0_i32_0 = arith.constant 0 : i32
    %c0_i32_1 = arith.constant 0 : i32
    return %c0_i32, %c0_i32_0 : i32, i32
  }
}

</mosaic_0001>

<bundles_post_ra>
// kernel: forward.5
= control target key start
LH: loop header
LB: loop body
LE: loop exit
PB: predicated region body
PF: predicated region fallthrough
CT: control target
= control target key end

     0   :  { %s5305_s12 = smov 0   ;;  %s5307_s13 = smov 0   ;;  %s5866_s0 = inlined_call_operand.vmem [shape: bf16[2,3,1088,8], index: 0, kind: input, shape index: {}]   ;;  %s5867_s1 = inlined_call_operand.vmem [shape: bf16[9,8,32], index: 1, kind: input, shape index: {}]   ;;  %s5868_s2 = inlined_call_operand.vmem [shape: f32[1,32], index: 2, kind: input, shape index: {}]   ;;  %s5869_s3 = inlined_call_operand.vmem [shape: bf16[2,1024,32], index: 3, kind: output, shape index: {}]  }
   0x1   :  { %s5309_s14 = smov 0   ;;  %s5311_s15 = smov 0  }
   0x2   :  { %s5313_s16 = smov 0  }
   0x3 LB: > { %s22_s17 = sadd.s32 1, %s5275_s14  ;;  %s25_s18 = sadd.s32 1, %s5279_s15  ;;  %s5283_s16 = sphi %s5313_s16, %s13_s16   ;;  %s5279_s15 = sphi %s5311_s15, %s5873_s15   ;;  %s5275_s14 = sphi %s5309_s14, %s5872_s14   ;;  %s5271_s13 = sphi %s5307_s13, %s5871_s13   ;;  %s5267_s12 = sphi %s5305_s12, %s5870_s12  }
   0x4   : > { %p23_p0 = scmp.ge.s32.totalorder %s22_s17, 4  ;;  %p3763_p1 = scmp.ge.s32.totalorder %s5283_s16, 1 }
   0x5   : > { %p151_p2 = scmp.lt.s32.totalorder %s5283_s16, 9 }
   0x6   : > { %s5875_s17 = smov (%p23_p0, %s22_s17), 0  ;;  %s5877_s18 = smov (!%p23_p0, %s25_s18), %s5279_s15 }
   0x7   : > { %p152_p3 = pnand %p3763_p1, %p151_p2  ;;  %p27_p4 = scmp.ge.s32.totalorder %s5877_s18, 2 }
   0x8   : > { %v3803_v0 = vld [vmem:[%s5867_s1 + $0x4] sm:$0xf] (!%p152_p3)  ;;  %vm399_vm0 = vcmask (!%p152_p3), 1043456   ;;  %v5343_v1 = vld [vmem:[%s5867_s1 + $0x10] sm:$0xf] (!%p152_p3)  ;;  %p179_p5 = scmp.lt.s32.totalorder (!%p152_p3), %s5271_s13, 1 }
   0x9   : > { %s5879_s18 = smov (%p27_p4, %s5877_s18), 0  ;;  %155 = sbr.rel (%p152_p3) target bundleno = 531 (0x213), region = 32 }
   0xa   : > { %5050 = vmatprep.subr.msk.bf16.mxu1 (!%p152_p3), %vm399_vm0, %v3803_v0  ;;  %5054 = vmatprep.subr.msk.bf16.mxu0 (!%p152_p3), %vm399_vm0, %v5343_v1  ;;  %v401_v2 = vsel (!%p152_p3), %vm399_vm0, %v3803_v0, 0  ;;  %v5351_v3 = vsel (!%p152_p3), %vm399_vm0, %v5343_v1, 0  ;;  %s5354_s23 = sshll.u32 (!%p152_p3), %s5267_s12, 8  ;;  %v232_v4 = vld [vmem:[%s5867_s1] sm:$0xf] (!%p152_p3)  ;;  %vm350_vm1 = vcmask (!%p152_p3), 64512  }
   0xb   : > { %4487 = vmatpush3.bf16.msra.mxu1 (!%p152_p3), %v401_v2  ;;  %4623 = vmatpush3.bf16.msra.mxu0 (!%p152_p3), %v5351_v3  ;;  %v4067_v5 = vld [vmem:[%s5867_s1 + $0x14] sm:$0xf] (!%p152_p3)  ;;  %s196_s28 = sshra.s32 (!%p152_p3), %s5354_s23, 3  ;;  %s1217_s4 = sadd.s32 (!%p152_p3), 32, %s5354_s23  ;;  %v693_v6 = vsel (!%p152_p3), %vm399_vm0, %v232_v4, 0  ;;  %vm3618_vm2 = vcmask (!%p152_p3), 257024  }
   0xc   : > { %5051 = vmatprep.subr.msk.bf16.mxu1 (!%p152_p3), %vm399_vm0, %v232_v4  ;;  %5056 = vmatprep.subr.msk.bf16.mxu0 (!%p152_p3), %vm399_vm0, %v4067_v5  ;;  %s3769_s30 = sshll.u32 (!%p152_p3), %s196_s28, 2  ;;  %s1218_s9 = sshra.s32 (!%p152_p3), %s1217_s4, 3  ;;  %v5383_v8 = vld [vmem:[%s5867_s1 + $0x8] sm:$0xf] (!%p152_p3)  ;;  %v4101_v12 = vld [vmem:[%s5867_s1 + $0x18] sm:$0xf] (!%p152_p3) }
   0xd   : > { %s3934_s19 = sshll.u32 (!%p152_p3), %s1218_s9, 2  ;;  %v2107_v14 = vsel (!%p152_p3), %vm399_vm0, %v4067_v5, 0  ;;  %v2470_v32 = vsel (!%p152_p3), %vm399_vm0, %v4101_v12, 0  ;;  %v5440_v33 = vld [vmem:[%s5867_s1 + $0x1c] sm:$0xf] (!%p152_p3)  ;;  %s2302_s26 = sadd.s32 (!%p152_p3), 64, %s5354_s23 }
   0xe   : > { %s2303_s27 = sshra.s32 (!%p152_p3), %s2302_s26, 3  ;;  %v1022_v47 = vsel (!%p152_p3), %vm399_vm0, %v5383_v8, 0  ;;  %v5481_v49 = vld [vmem:[%s5867_s1 + $0xc] sm:$0xf] (!%p152_p3)  ;;  %s3765_s6 = sshll.u32 (!%p152_p3), %s5267_s12, 5 }
   0xf   : > { %s4100_s23 = sshll.u32 (!%p152_p3), %s2303_s27, 2  ;;  %p187_p6 = scmp.lt.s32.totalorder (!%p152_p3), %s3765_s6, 127 }
  0x10   : > { %s5881_s13 = smov (!%p179_p5, %s5271_s13), 1 }
  0x11   : > { %s5060_s29 = smul.u32 1632, %s5881_s13  ;;  %s5883_s6 = smov (!%p187_p6, %s3765_s6), 127 }
  0x13   : > { %s5373_s7 = scalar_lea.vmem %s5866_s0, %s5060_s29 }
  0x14   : > { %s5376_s8 = scalar_lea.vmem %s5373_s7, %s3769_s30  ;;  %s5388_s20 = scalar_lea.vmem %s5373_s7, %s3934_s19 }
  0x15   : > { %v5101_v7 = vld [vmem:[%s5376_s8 + $0x220] sm:$0xff]   ;;  %v5103_v9 = vld [vmem:[%s5376_s8 + $0x228] sm:$0xff]   ;;  %v5105_v10 = vld [vmem:[%s5376_s8 + $0x230] sm:$0xff]   ;;  %s5457_s28 = scalar_lea.vmem %s5373_s7, %s4100_s23  ;;  %s3766_s7 = sshll.u32 %s5881_s13, 7 }
  0x16   : > { %4488 = vmatprep.mubr.msk.bf16.mxu1 %vm350_vm1, %v5101_v7  ;;  %v5102_v11 = vld [vmem:[%s5388_s20 + $0x220] sm:$0xff]   ;;  %v5104_v13 = vld [vmem:[%s5388_s20 + $0x228] sm:$0xff]   ;;  %v5106_v15 = vld [vmem:[%s5388_s20 + $0x230] sm:$0xff]   ;;  %s190_s10 = sadd.s32 %s3766_s7, %s5883_s6 }
  0x17   : > { %4489 = vmatmul.mubr.msk.bf16.vlgmr.msra.gmra.mrb[0].mxu1 %vm350_vm1, %v5103_v9  ;;  %4624 = vmatprep.mubr.msk.bf16.mxu0 %vm350_vm1, %v5102_v11  ;;  %v5107_v16 = vld [vmem:[%s5376_s8 + $0x238] sm:$0xff]   ;;  %v5109_v17 = vld [vmem:[%s5376_s8 + $0x240] sm:$0xff]   ;;  %v5111_v20 = vld [vmem:[%s5376_s8 + $0x248] sm:$0xff]   ;;  %s3767_s12 = sshll.u32 %s190_s10, 2 }
  0x18   : > { %4521 = vmatpush3.bf16.msra.mxu1 %v693_v6  ;;  %4492 = vmatprep.mubr.msk.bf16.mxu1 %vm350_vm1, %v5105_v10  ;;  %v5108_v18 = vld [vmem:[%s5388_s20 + $0x238] sm:$0xff]   ;;  %v5110_v19 = vld [vmem:[%s5388_s20 + $0x240] sm:$0xff]   ;;  %v5113_v21 = vld [vmem:[%s5376_s8 + $0x250] sm:$0xff]   ;;  %v2831_v6 = vsel %vm399_vm0, %v5440_v33, 0  ;;  %s5749_s19 = scalar_lea.vmem %s5869_s3, %s3767_s12 }
  0x19   : > { %5052 = vmatprep.subr.msk.bf16.mxu1 %vm399_vm0, %v5383_v8  ;;  %4625 = vmatmul.mubr.msk.bf16.vlgmr.msra.gmra.mrb[0].mxu0 %vm350_vm1, %v5104_v13  ;;  %v5112_v22 = vld [vmem:[%s5388_s20 + $0x248] sm:$0xff]   ;;  %v5114_v23 = vld [vmem:[%s5388_s20 + $0x250] sm:$0xff]   ;;  %v5115_v24 = vld [vmem:[%s5376_s8 + $0x258] sm:$0xff]  }
  0x1a   : > { %4657 = vmatpush3.bf16.msra.mxu0 %v2107_v14  ;;  %4628 = vmatprep.mubr.msk.bf16.mxu0 %vm350_vm1, %v5106_v15  ;;  %v5117_v25 = vld [vmem:[%s5376_s8 + $0x260] sm:$0xff]   ;;  %v5116_v26 = vld [vmem:[%s5388_s20 + $0x258] sm:$0xff]   ;;  %v5119_v28 = vld [vmem:[%s5376_s8 + $0x268] sm:$0xff]  }
  0x1b   : > { %5057 = vmatprep.subr.msk.bf16.mxu0 %vm399_vm0, %v4101_v12  ;;  %v5118_v27 = vld [vmem:[%s5388_s20 + $0x440] sm:$0xff]   ;;  %v5121_v29 = vld [vmem:[%s5376_s8 + $0x270] sm:$0xff]   ;;  %v5120_v30 = vld [vmem:[%s5388_s20 + $0x448] sm:$0xff]  }
  0x1c   : > { %v5122_v31 = vld [vmem:[%s5388_s20 + $0x450] sm:$0xff]   ;;  %v5123_v34 = vld [vmem:[%s5376_s8 + $0x278] sm:$0xff]   ;;  %v5125_v35 = vld [vmem:[%s5376_s8 + $0x280] sm:$0xff]  }
  0x1d   : > { %v5124_v36 = vld [vmem:[%s5388_s20 + $0x458] sm:$0xff]   ;;  %v5126_v37 = vld [vmem:[%s5388_s20 + $0x460] sm:$0xff]   ;;  %v5127_v38 = vld [vmem:[%s5376_s8 + $0x288] sm:$0xff]  }
  0x1e   : > { %v5129_v39 = vld [vmem:[%s5376_s8 + $0x290] sm:$0xff]   ;;  %v5128_v40 = vld [vmem:[%s5388_s20 + $0x468] sm:$0xff]   ;;  %v5131_v42 = vld [vmem:[%s5376_s8 + $0x298] sm:$0xff]  }
  0x1f   : > { %4493 = vmatmul.mubr.msk.bf16.gmra.mrb[4].mxu1 %vm350_vm1, %v5107_v16  ;;  %v5130_v41 = vld [vmem:[%s5388_s20 + $0x470] sm:$0xff]   ;;  %v5133_v43 = vld [vmem:[%s5376_s8] sm:$0xff]   ;;  %v5132_v44 = vld [vmem:[%s5388_s20 + $0x478] sm:$0xff]  }
  0x20   : > { %4496 = vmatprep.mubr.msk.bf16.mxu1 %vm350_vm1, %v5109_v17  ;;  %v5134_v45 = vld [vmem:[%s5388_s20 + $0x480] sm:$0xff]   ;;  %v5135_v46 = vld [vmem:[%s5376_s8 + $0x8] sm:$0xff]   ;;  %v5137_v48 = vld [vmem:[%s5376_s8 + $0x10] sm:$0xff]  }
  0x21   : > { %4629 = vmatmul.mubr.msk.bf16.gmra.mrb[4].mxu0 %vm350_vm1, %v5108_v18  ;;  %v5136_v50 = vld [vmem:[%s5388_s20 + $0x488] sm:$0xff]   ;;  %v5138_v51 = vld [vmem:[%s5388_s20 + $0x490] sm:$0xff]   ;;  %v5139_v52 = vld [vmem:[%s5376_s8 + $0x18] sm:$0xff]  }
  0x22   : > { %4632 = vmatprep.mubr.msk.bf16.mxu0 %vm350_vm1, %v5110_v19  ;;  %v5141_v53 = vld [vmem:[%s5376_s8 + $0x20] sm:$0xff]   ;;  %v5140_v54 = vld [vmem:[%s5388_s20 + $0x498] sm:$0xff]   ;;  %v5143_v56 = vld [vmem:[%s5376_s8 + $0x28] sm:$0xff]  }
  0x23   : > { %v5142_v55 = vld [vmem:[%s5388_s20 + $0x4a0] sm:$0xff]   ;;  %v5145_v57 = vld [vmem:[%s5376_s8 + $0x30] sm:$0xff]   ;;  %v5144_v58 = vld [vmem:[%s5388_s20 + $0x4a8] sm:$0xff]  }
  0x24   : > { %v5146_v59 = vld [vmem:[%s5388_s20 + $0x4b0] sm:$0xff]   ;;  %v5147_v60 = vld [vmem:[%s5376_s8 + $0x38] sm:$0xff]   ;;  %v5149_v61 = vld [vmem:[%s5376_s8 + $0x40] sm:$0xff]  }
  0x25   : > { %v5148_v62 = vld [vmem:[%s5388_s20 + $0x4b8] sm:$0xff]   ;;  %v5150_v63 = vld [vmem:[%s5457_s28] sm:$0xff]   ;;  %v5151_v0 = vld [vmem:[%s5376_s8 + $0x48] sm:$0xff]  }
  0x26   : > { %v5153_v2 = vld [vmem:[%s5376_s8 + $0x50] sm:$0xff]   ;;  %v5152_v4 = vld [vmem:[%s5457_s28 + $0x8] sm:$0xff]   ;;  %v5526_v7 = vld [vmem:[%s5867_s1 + $0x20] sm:$0xf] }
  0x27   : > { %4497 = vmatmul.mubr.msk.bf16.gmra.mrb[8].mxu1 %vm350_vm1, %v5111_v20  ;;  %v5154_v5 = vld [vmem:[%s5457_s28 + $0x10] sm:$0xff]   ;;  %v5155_v8 = vld [vmem:[%s5376_s8 + $0x58] sm:$0xff]   ;;  %v5157_v9 = vld [vmem:[%s5376_s8 + $0x60] sm:$0xff]  }
  0x28   : > { %4500 = vmatprep.mubr.msk.bf16.mxu1 %vm350_vm1, %v5113_v21  ;;  %v5156_v10 = vld [vmem:[%s5457_s28 + $0x18] sm:$0xff]   ;;  %v5158_v11 = vld [vmem:[%s5457_s28 + $0x20] sm:$0xff]   ;;  %v5159_v12 = vld [vmem:[%s5376_s8 + $0x68] sm:$0xff]  }
  0x29   : > { %4633 = vmatmul.mubr.msk.bf16.gmra.mrb[8].mxu0 %vm350_vm1, %v5112_v22  ;;  %v5161_v13 = vld [vmem:[%s5376_s8 + $0x70] sm:$0xff]   ;;  %v5160_v14 = vld [vmem:[%s5457_s28 + $0x28] sm:$0xff]   ;;  %v5163_v16 = vld [vmem:[%s5376_s8 + $0x78] sm:$0xff]   ;;  %v1385_v22 = vsel %vm399_vm0, %v5481_v49, 0 }
  0x2a   : > { %4636 = vmatprep.mubr.msk.bf16.mxu0 %vm350_vm1, %v5114_v23  ;;  %v5162_v15 = vld [vmem:[%s5457_s28 + $0x30] sm:$0xff]   ;;  %v5165_v17 = vld [vmem:[%s5376_s8 + $0x440] sm:$0xff]   ;;  %v5164_v18 = vld [vmem:[%s5457_s28 + $0x38] sm:$0xff]  }
  0x2b   : > { %v5166_v19 = vld [vmem:[%s5457_s28 + $0x40] sm:$0xff]   ;;  %v5167_v20 = vld [vmem:[%s5376_s8 + $0x448] sm:$0xff]   ;;  %v5169_v21 = vld [vmem:[%s5376_s8 + $0x450] sm:$0xff]  }
  0x2c   : > { %v5168_v23 = vld [vmem:[%s5457_s28 + $0x48] sm:$0xff]  }
  0x2f   : > { %4501 = vmatmul.mubr.msk.bf16.gmra.mrb[12].mxu1 %vm350_vm1, %v5115_v24  ;;  %v5170_v24 = vld [vmem:[%s5457_s28 + $0x50] sm:$0xff]  }
  0x30   : > { %4504 = vmatprep.mubr.msk.bf16.mxu1 %vm350_vm1, %v5117_v25  ;;  %v5171_v25 = vld [vmem:[%s5376_s8 + $0x458] sm:$0xff]  }
  0x31   : > { %4637 = vmatmul.mubr.msk.bf16.gmra.mrb[12].mxu0 %vm350_vm1, %v5116_v26  ;;  %v5173_v26 = vld [vmem:[%s5376_s8 + $0x460] sm:$0xff]  }
  0x32   : > { %4658 = vmatprep.mubr.msk.bf16.mxu0 %vm350_vm1, %v5118_v27  ;;  %v5172_v27 = vld [vmem:[%s5457_s28 + $0x58] sm:$0xff]  }
  0x37   : > { %4505 = vmatmul.mubr.msk.bf16.gmra.mrb[16].mxu1 %vm350_vm1, %v5119_v28  ;;  %v5174_v28 = vld [vmem:[%s5457_s28 + $0x60] sm:$0xff]  }
  0x38   : > { %4508 = vmatprep.mubr.msk.bf16.mxu1 %vm350_vm1, %v5121_v29  ;;  %v5177_v29 = vld [vmem:[%s5376_s8 + $0x470] sm:$0xff]  }
  0x39   : > { %4659 = vmatmul.mubr.msk.bf16.vlgmr.msra.gmra.mrb[0].mxu0 %vm350_vm1, %v5120_v30  ;;  %v5176_v30 = vld [vmem:[%s5457_s28 + $0x68] sm:$0xff]  }
  0x3a   : > { %4691 = vmatpush3.bf16.msra.mxu0 %v2470_v32  ;;  %4662 = vmatprep.mubr.msk.bf16.mxu0 %vm350_vm1, %v5122_v31  ;;  %v5178_v31 = vld [vmem:[%s5457_s28 + $0x70] sm:$0xff]   ;;  %v5179_v32 = vld [vmem:[%s5376_s8 + $0x478] sm:$0xff]  }
  0x3b   : > { %5058 = vmatprep.subr.msk.bf16.mxu0 %vm399_vm0, %v5440_v33  ;;  %v5181_v33 = vld [vmem:[%s5376_s8 + $0x480] sm:$0xff]  }
  0x3f   : > { %4509 = vmatmul.mubr.msk.bf16.gmra.mrb[20].mxu1 %vm350_vm1, %v5123_v34  ;;  %v5180_v34 = vld [vmem:[%s5457_s28 + $0x78] sm:$0xff]  }
  0x40   : > { %4512 = vmatprep.mubr.msk.bf16.mxu1 %vm350_vm1, %v5125_v35  ;;  %v5182_v35 = vld [vmem:[%s5457_s28 + $0x220] sm:$0xff]  }
  0x41   : > { %4663 = vmatmul.mubr.msk.bf16.gmra.mrb[4].mxu0 %vm350_vm1, %v5124_v36  ;;  %v5183_v36 = vld [vmem:[%s5376_s8 + $0x488] sm:$0xff]  }
  0x42   : > { %4666 = vmatprep.mubr.msk.bf16.mxu0 %vm350_vm1, %v5126_v37  ;;  %v5185_v37 = vld [vmem:[%s5376_s8 + $0x490] sm:$0xff]  }
  0x47   : > { %4513 = vmatmul.mubr.msk.bf16.gmra.mrb[24].mxu1 %vm350_vm1, %v5127_v38  ;;  %v5184_v38 = vld [vmem:[%s5457_s28 + $0x228] sm:$0xff]  }
  0x48   : > { %4516 = vmatprep.mubr.msk.bf16.mxu1 %vm350_vm1, %v5129_v39  ;;  %v5186_v39 = vld [vmem:[%s5457_s28 + $0x230] sm:$0xff]  }
  0x49   : > { %4667 = vmatmul.mubr.msk.bf16.gmra.mrb[8].mxu0 %vm350_vm1, %v5128_v40  ;;  %v3192_v40 = vsel %vm399_vm0, %v5526_v7, 0 }
  0x4a   : > { %4670 = vmatprep.mubr.msk.bf16.mxu0 %vm350_vm1, %v5130_v41  ;;  %v5187_v41 = vld [vmem:[%s5376_s8 + $0x498] sm:$0xff]  }
  0x4f   : > { %4517 = vmatmul.mubr.msk.bf16.gmra.mrb[28].mxu1 %vm350_vm1, %v5131_v42  ;;  %v5189_v42 = vld [vmem:[%s5376_s8 + $0x4a0] sm:$0xff]  }
  0x50   : > { %4522 = vmatprep.mubr.msk.bf16.mxu1 %vm350_vm1, %v5133_v43  ;;  %v5188_v43 = vld [vmem:[%s5457_s28 + $0x238] sm:$0xff]  }
  0x51   : > { %4671 = vmatmul.mubr.msk.bf16.gmra.mrb[12].mxu0 %vm350_vm1, %v5132_v44  ;;  %v5190_v44 = vld [vmem:[%s5457_s28 + $0x240] sm:$0xff]  }
  0x52   : > { %4674 = vmatprep.mubr.msk.bf16.mxu0 %vm350_vm1, %v5134_v45  ;;  %v5191_v45 = vld [vmem:[%s5376_s8 + $0x4a8] sm:$0xff]  }
  0x57   : > { %4523 = vmatmul.mubr.msk.bf16.vlgmr.msra.gmra.mrb[0].mxu1 %vm350_vm1, %v5135_v46  ;;  %v5193_v46 = vld [vmem:[%s5376_s8 + $0x4b0] sm:$0xff]  }
  0x58   : > { %4555 = vmatpush3.bf16.msra.mxu1 %v1022_v47  ;;  %4526 = vmatprep.mubr.msk.bf16.mxu1 %vm350_vm1, %v5137_v48  ;;  %v5192_v47 = vld [vmem:[%s5457_s28 + $0x248] sm:$0xff]   ;;  %v5194_v48 = vld [vmem:[%s5457_s28 + $0x250] sm:$0xff]  }
  0x59   : > { %5053 = vmatprep.subr.msk.bf16.mxu1 %vm399_vm0, %v5481_v49  ;;  %4675 = vmatmul.mubr.msk.bf16.gmra.mrb[16].mxu0 %vm350_vm1, %v5136_v50  ;;  %v5195_v49 = vld [vmem:[%s5376_s8 + $0x4b8] sm:$0xff]   ;;  %v5197_v50 = vld [vmem:[%s5388_s20] sm:$0xff]  }
  0x5a   : > { %4678 = vmatprep.mubr.msk.bf16.mxu0 %vm350_vm1, %v5138_v51  ;;  %v5196_v51 = vld [vmem:[%s5457_s28 + $0x258] sm:$0xff]  }
  0x5f   : > { %4527 = vmatmul.mubr.msk.bf16.gmra.mrb[4].mxu1 %vm350_vm1, %v5139_v52  ;;  %v5198_v52 = vld [vmem:[%s5457_s28 + $0x260] sm:$0xff]  }
  0x60   : > { %4530 = vmatprep.mubr.msk.bf16.mxu1 %vm350_vm1, %v5141_v53  ;;  %v5199_v53 = vld [vmem:[%s5388_s20 + $0x8] sm:$0xff]  }
  0x61   : > { %4679 = vmatmul.mubr.msk.bf16.gmra.mrb[20].mxu0 %vm350_vm1, %v5140_v54  ;;  %v5201_v54 = vld [vmem:[%s5388_s20 + $0x10] sm:$0xff]  }
  0x62   : > { %4682 = vmatprep.mubr.msk.bf16.mxu0 %vm350_vm1, %v5142_v55  ;;  %v5200_v55 = vld [vmem:[%s5457_s28 + $0x268] sm:$0xff]  }
  0x67   : > { %4531 = vmatmul.mubr.msk.bf16.gmra.mrb[8].mxu1 %vm350_vm1, %v5143_v56  ;;  %v5202_v56 = vld [vmem:[%s5457_s28 + $0x270] sm:$0xff]  }
  0x68   : > { %4534 = vmatprep.mubr.msk.bf16.mxu1 %vm350_vm1, %v5145_v57  ;;  %v5203_v57 = vld [vmem:[%s5388_s20 + $0x18] sm:$0xff]  }
  0x69   : > { %4683 = vmatmul.mubr.msk.bf16.gmra.mrb[24].mxu0 %vm350_vm1, %v5144_v58  ;;  %v5205_v58 = vld [vmem:[%s5388_s20 + $0x20] sm:$0xff]  }
  0x6a   : > { %4686 = vmatprep.mubr.msk.bf16.mxu0 %vm350_vm1, %v5146_v59  ;;  %v5204_v59 = vld [vmem:[%s5457_s28 + $0x278] sm:$0xff]  }
  0x6f   : > { %4535 = vmatmul.mubr.msk.bf16.gmra.mrb[12].mxu1 %vm350_vm1, %v5147_v60  ;;  %v5206_v60 = vld [vmem:[%s5457_s28 + $0x280] sm:$0xff]  }
  0x70   : > { %4538 = vmatprep.mubr.msk.bf16.mxu1 %vm350_vm1, %v5149_v61  ;;  %v5209_v61 = vld [vmem:[%s5388_s20 + $0x30] sm:$0xff]  }
  0x71   : > { %4687 = vmatmul.mubr.msk.bf16.gmra.mrb[28].mxu0 %vm350_vm1, %v5148_v62  ;;  %v5208_v62 = vld [vmem:[%s5457_s28 + $0x288] sm:$0xff]  }
  0x72   : > { %4692 = vmatprep.mubr.msk.bf16.mxu0 %vm350_vm1, %v5150_v63  ;;  %v5210_v63 = vld [vmem:[%s5457_s28 + $0x290] sm:$0xff]  }
  0x77   : > { %4539 = vmatmul.mubr.msk.bf16.gmra.mrb[16].mxu1 %vm350_vm1, %v5151_v0  ;;  %v5211_v0 = vld [vmem:[%s5388_s20 + $0x38] sm:$0xff]  }
  0x78   : > { %4542 = vmatprep.mubr.msk.bf16.mxu1 %vm350_vm1, %v5153_v2  ;;  %v5213_v2 = vld [vmem:[%s5388_s20 + $0x40] sm:$0xff]  }
  0x79   : > { %4693 = vmatmul.mubr.msk.bf16.vlgmr.msra.gmra.mrb[0].mxu0 %vm350_vm1, %v5152_v4  ;;  %v5212_v4 = vld [vmem:[%s5457_s28 + $0x298] sm:$0xff]  }
  0x7a   : > { %4725 = vmatpush3.bf16.msra.mxu0 %v2831_v6  ;;  %4696 = vmatprep.mubr.msk.bf16.mxu0 %vm350_vm1, %v5154_v5  ;;  %v5214_v5 = vld [vmem:[%s5457_s28 + $0x440] sm:$0xff]   ;;  %v5215_v6 = vld [vmem:[%s5388_s20 + $0x48] sm:$0xff]  }
  0x7b   : > { %5059 = vmatprep.subr.msk.bf16.mxu0 %vm399_vm0, %v5526_v7  ;;  %v5217_v7 = vld [vmem:[%s5388_s20 + $0x50] sm:$0xff]  }
  0x7f   : > { %4543 = vmatmul.mubr.msk.bf16.gmra.mrb[20].mxu1 %vm350_vm1, %v5155_v8  ;;  %v5216_v8 = vld [vmem:[%s5457_s28 + $0x448] sm:$0xff]  }
  0x80   : > { %4546 = vmatprep.mubr.msk.bf16.mxu1 %vm350_vm1, %v5157_v9  ;;  %v5218_v9 = vld [vmem:[%s5457_s28 + $0x450] sm:$0xff]  }
  0x81   : > { %4697 = vmatmul.mubr.msk.bf16.gmra.mrb[4].mxu0 %vm350_vm1, %v5156_v10  ;;  %v5219_v10 = vld [vmem:[%s5388_s20 + $0x58] sm:$0xff]  }
  0x82   : > { %4700 = vmatprep.mubr.msk.bf16.mxu0 %vm350_vm1, %v5158_v11  ;;  %v5221_v11 = vld [vmem:[%s5388_s20 + $0x60] sm:$0xff]  }
  0x87   : > { %4547 = vmatmul.mubr.msk.bf16.gmra.mrb[24].mxu1 %vm350_vm1, %v5159_v12  ;;  %v5220_v12 = vld [vmem:[%s5457_s28 + $0x458] sm:$0xff]  }
  0x88   : > { %4550 = vmatprep.mubr.msk.bf16.mxu1 %vm350_vm1, %v5161_v13  ;;  %v5222_v13 = vld [vmem:[%s5457_s28 + $0x460] sm:$0xff]  }
  0x89   : > { %4701 = vmatmul.mubr.msk.bf16.gmra.mrb[8].mxu0 %vm350_vm1, %v5160_v14  ;;  %v5223_v14 = vld [vmem:[%s5388_s20 + $0x68] sm:$0xff]  }
  0x8a   : > { %4704 = vmatprep.mubr.msk.bf16.mxu0 %vm350_vm1, %v5162_v15  ;;  %v5225_v15 = vld [vmem:[%s5388_s20 + $0x70] sm:$0xff]  }
  0x8f   : > { %4551 = vmatmul.mubr.msk.bf16.gmra.mrb[28].mxu1 %vm350_vm1, %v5163_v16  ;;  %v5224_v16 = vld [vmem:[%s5457_s28 + $0x468] sm:$0xff]  }
  0x90   : > { %4556 = vmatprep.mubr.msk.bf16.mxu1 %vm350_vm1, %v5165_v17  ;;  %v5226_v17 = vld [vmem:[%s5457_s28 + $0x470] sm:$0xff]  }
  0x91   : > { %4705 = vmatmul.mubr.msk.bf16.gmra.mrb[12].mxu0 %vm350_vm1, %v5164_v18  ;;  %v5227_v18 = vld [vmem:[%s5388_s20 + $0x78] sm:$0xff]  }
  0x92   : > { %4708 = vmatprep.mubr.msk.bf16.mxu0 %vm350_vm1, %v5166_v19  ;;  %v5229_v19 = vld [vmem:[%s5388_s20 + $0x260] sm:$0xff]  }
  0x97   : > { %4557 = vmatmul.mubr.msk.bf16.vlgmr.msra.gmra.mrb[0].mxu1 %vm350_vm1, %v5167_v20  ;;  %v5228_v20 = vld [vmem:[%s5457_s28 + $0x478] sm:$0xff]  }
  0x98   : > { %4589 = vmatpush3.bf16.msra.mxu1 %v1385_v22  ;;  %4560 = vmatprep.mubr.msk.bf16.mxu1 %vm350_vm1, %v5169_v21  ;;  %v5230_v21 = vld [vmem:[%s5457_s28 + $0x480] sm:$0xff]   ;;  %v5231_v22 = vld [vmem:[%s5388_s20 + $0x268] sm:$0xff]  }
  0x99   : > { %5055 = vmatprep.subr.msk.bf16.mxu1 %vm399_vm0, %v5343_v1  ;;  %4709 = vmatmul.mubr.msk.bf16.gmra.mrb[16].mxu0 %vm350_vm1, %v5168_v23  ;;  %v5175_v1 = vld [vmem:[%s5376_s8 + $0x468] sm:$0xff]   ;;  %v5233_v23 = vld [vmem:[%s5388_s20 + $0x270] sm:$0xff]  }
  0x9a   : > { %4712 = vmatprep.mubr.msk.bf16.mxu0 %vm350_vm1, %v5170_v24  ;;  %v5232_v24 = vld [vmem:[%s5457_s28 + $0x488] sm:$0xff]  }
  0x9f   : > { %4561 = vmatmul.mubr.msk.bf16.gmra.mrb[4].mxu1 %vm350_vm1, %v5171_v25  ;;  %v5234_v25 = vld [vmem:[%s5457_s28 + $0x490] sm:$0xff]  }
  0xa0   : > { %4564 = vmatprep.mubr.msk.bf16.mxu1 %vm350_vm1, %v5173_v26  ;;  %v5235_v26 = vld [vmem:[%s5388_s20 + $0x278] sm:$0xff]  }
  0xa1   : > { %4713 = vmatmul.mubr.msk.bf16.gmra.mrb[20].mxu0 %vm350_vm1, %v5172_v27  ;;  %v5237_v27 = vld [vmem:[%s5388_s20 + $0x280] sm:$0xff]  }
  0xa2   : > { %4716 = vmatprep.mubr.msk.bf16.mxu0 %vm350_vm1, %v5174_v28  ;;  %v5236_v28 = vld [vmem:[%s5457_s28 + $0x498] sm:$0xff]  }
  0xa7   : > { %4565 = vmatmul.mubr.msk.bf16.gmra.mrb[8].mxu1 %vm350_vm1, %v5175_v1  ;;  %v5238_v1 = vld [vmem:[%s5457_s28 + $0x4a0] sm:$0xff]  }
  0xa8   : > { %4568 = vmatprep.mubr.msk.bf16.mxu1 %vm350_vm1, %v5177_v29  ;;  %v5239_v29 = vld [vmem:[%s5388_s20 + $0x288] sm:$0xff]  }
  0xa9   : > { %4717 = vmatmul.mubr.msk.bf16.gmra.mrb[24].mxu0 %vm350_vm1, %v5176_v30  ;;  %v5241_v30 = vld [vmem:[%s5388_s20 + $0x290] sm:$0xff]  }
  0xaa   : > { %4720 = vmatprep.mubr.msk.bf16.mxu0 %vm350_vm1, %v5178_v31  ;;  %v5240_v31 = vld [vmem:[%s5457_s28 + $0x4a8] sm:$0xff]  }
  0xaf   : > { %4569 = vmatmul.mubr.msk.bf16.gmra.mrb[12].mxu1 %vm350_vm1, %v5179_v32  ;;  %v5242_v32 = vld [vmem:[%s5457_s28 + $0x4b0] sm:$0xff]  }
  0xb0   : > { %4572 = vmatprep.mubr.msk.bf16.mxu1 %vm350_vm1, %v5181_v33  ;;  %v5243_v33 = vld [vmem:[%s5388_s20 + $0x298] sm:$0xff]  }
  0xb1   : > { %4721 = vmatmul.mubr.msk.bf16.gmra.mrb[28].mxu0 %vm350_vm1, %v5180_v34  ;;  %v5244_v34 = vld [vmem:[%s5457_s28 + $0x4b8] sm:$0xff]  }
  0xb2   : > { %4726 = vmatprep.mubr.msk.bf16.mxu0 %vm350_vm1, %v5182_v35 }
  0xb7   : > { %4573 = vmatmul.mubr.msk.bf16.gmra.mrb[16].mxu1 %vm350_vm1, %v5183_v36 }
  0xb8   : > { %4576 = vmatprep.mubr.msk.bf16.mxu1 %vm350_vm1, %v5185_v37 }
  0xb9   : > { %4727 = vmatmul.mubr.msk.bf16.vlgmr.msra.gmra.mrb[0].mxu0 %vm350_vm1, %v5184_v38 }
  0xba   : > { %4759 = vmatpush3.bf16.msra.mxu0 %v3192_v40  ;;  %4730 = vmatprep.mubr.msk.bf16.mxu0 %vm350_vm1, %v5186_v39 }
  0xbf   : > { %4577 = vmatmul.mubr.msk.bf16.gmra.mrb[20].mxu1 %vm350_vm1, %v5187_v41 }
  0xc0   : > { %4580 = vmatprep.mubr.msk.bf16.mxu1 %vm350_vm1, %v5189_v42 }
  0xc1   : > { %4731 = vmatmul.mubr.msk.bf16.gmra.mrb[4].mxu0 %vm350_vm1, %v5188_v43 }
  0xc2   : > { %4734 = vmatprep.mubr.msk.bf16.mxu0 %vm350_vm1, %v5190_v44 }
  0xc7   : > { %4581 = vmatmul.mubr.msk.bf16.gmra.mrb[24].mxu1 %vm350_vm1, %v5191_v45 }
  0xc8   : > { %4584 = vmatprep.mubr.msk.bf16.mxu1 %vm350_vm1, %v5193_v46 }
  0xc9   : > { %4735 = vmatmul.mubr.msk.bf16.gmra.mrb[8].mxu0 %vm350_vm1, %v5192_v47 }
  0xca   : > { %4738 = vmatprep.mubr.msk.bf16.mxu0 %vm350_vm1, %v5194_v48 }
  0xcf   : > { %4585 = vmatmul.mubr.msk.bf16.gmra.mrb[28].mxu1 %vm350_vm1, %v5195_v49 }
  0xd0   : > { %4590 = vmatprep.mubr.msk.bf16.mxu1 %vm350_vm1, %v5197_v50 }
  0xd1   : > { %4739 = vmatmul.mubr.msk.bf16.gmra.mrb[12].mxu0 %vm350_vm1, %v5196_v51 }
  0xd2   : > { %4742 = vmatprep.mubr.msk.bf16.mxu0 %vm350_vm1, %v5198_v52  ;;  %v5740_v52 = vld [vmem:[%s5868_s2] ss:$0 sm:$0xff] }
  0xd7   : > { %4591 = vmatmul.mubr.msk.bf16.vlgmr.msra.gmra.mrb[0].mxu1 %vm350_vm1, %v5199_v53 }
  0xd8   : > { %4793 = vmatpush3.bf16.msra.mxu1 %v5351_v3  ;;  %4594 = vmatprep.mubr.msk.bf16.mxu1 %vm350_vm1, %v5201_v54  ;;  %v5207_v3 = vld [vmem:[%s5388_s20 + $0x28] sm:$0xff]  }
  0xd9   : > { %4743 = vmatmul.mubr.msk.bf16.gmra.mrb[16].mxu0 %vm350_vm1, %v5200_v55 }
  0xda   : > { %4746 = vmatprep.mubr.msk.bf16.mxu0 %vm350_vm1, %v5202_v56 }
  0xdf   : > { %4595 = vmatmul.mubr.msk.bf16.gmra.mrb[4].mxu1 %vm350_vm1, %v5203_v57 }
  0xe0   : > { %4598 = vmatprep.mubr.msk.bf16.mxu1 %vm350_vm1, %v5205_v58 }
  0xe1   : > { %4747 = vmatmul.mubr.msk.bf16.gmra.mrb[20].mxu0 %vm350_vm1, %v5204_v59 }
  0xe2   : > { %4750 = vmatprep.mubr.msk.bf16.mxu0 %vm350_vm1, %v5206_v60 }
  0xe7   : > { %4599 = vmatmul.mubr.msk.bf16.gmra.mrb[8].mxu1 %vm350_vm1, %v5207_v3 }
  0xe8   : > { %4602 = vmatprep.mubr.msk.bf16.mxu1 %vm350_vm1, %v5209_v61 }
  0xe9   : > { %4751 = vmatmul.mubr.msk.bf16.gmra.mrb[24].mxu0 %vm350_vm1, %v5208_v62 }
  0xea   : > { %4754 = vmatprep.mubr.msk.bf16.mxu0 %vm350_vm1, %v5210_v63 }
  0xef   : > { %4603 = vmatmul.mubr.msk.bf16.gmra.mrb[12].mxu1 %vm350_vm1, %v5211_v0 }
  0xf0   : > { %4606 = vmatprep.mubr.msk.bf16.mxu1 %vm350_vm1, %v5213_v2 }
  0xf1   : > { %4755 = vmatmul.mubr.msk.bf16.gmra.mrb[28].mxu0 %vm350_vm1, %v5212_v4 }
  0xf2   : > { %4760 = vmatprep.mubr.msk.bf16.mxu0 %vm350_vm1, %v5214_v5 }
  0xf7   : > { %4607 = vmatmul.mubr.msk.bf16.gmra.mrb[16].mxu1 %vm350_vm1, %v5215_v6 }
  0xf8   : > { %4610 = vmatprep.mubr.msk.bf16.mxu1 %vm350_vm1, %v5217_v7 }
  0xf9   : > { %4761 = vmatmul.mubr.msk.bf16.vlgmr.msra.gmra.mrb[0].mxu0 %vm350_vm1, %v5216_v8 }
  0xfa   : > { %4764 = vmatprep.mubr.msk.bf16.mxu0 %vm350_vm1, %v5218_v9 }
  0xff   : > { %4611 = vmatmul.mubr.msk.bf16.gmra.mrb[20].mxu1 %vm350_vm1, %v5219_v10 }
 0x100   : > { %4614 = vmatprep.mubr.msk.bf16.mxu1 %vm350_vm1, %v5221_v11 }
 0x101   : > { %4765 = vmatmul.mubr.msk.bf16.gmra.mrb[4].mxu0 %vm350_vm1, %v5220_v12 }
 0x102   : > { %4768 = vmatprep.mubr.msk.bf16.mxu0 %vm350_vm1, %v5222_v13 }
 0x107   : > { %4615 = vmatmul.mubr.msk.bf16.gmra.mrb[24].mxu1 %vm350_vm1, %v5223_v14 }
 0x108   : > { %4618 = vmatprep.mubr.msk.bf16.mxu1 %vm350_vm1, %v5225_v15 }
 0x109   : > { %4769 = vmatmul.mubr.msk.bf16.gmra.mrb[8].mxu0 %vm350_vm1, %v5224_v16 }
 0x10a   : > { %4772 = vmatprep.mubr.msk.bf16.mxu0 %vm350_vm1, %v5226_v17 }
 0x10f   : > { %4619 = vmatmul.mubr.msk.bf16.gmra.mrb[28].mxu1 %vm350_vm1, %v5227_v18 }
 0x110   : > { %4640 = vmatprep.mubr.msk.bf16.mxu1 %vm350_vm1, %v5229_v19 }
 0x111   : > { %4773 = vmatmul.mubr.msk.bf16.gmra.mrb[12].mxu0 %vm350_vm1, %v5228_v20 }
 0x112   : > { %4776 = vmatprep.mubr.msk.bf16.mxu0 %vm350_vm1, %v5230_v21 }
 0x117   : > { %4641 = vmatmul.mubr.msk.bf16.vlgmr.msra.gmra.mrb[16].mxu1 %vm350_vm1, %v5231_v22 }
 0x118   : > { %4644 = vmatprep.mubr.msk.bf16.mxu1 %vm350_vm1, %v5233_v23 }
 0x119   : > { %4777 = vmatmul.mubr.msk.bf16.gmra.mrb[16].mxu0 %vm350_vm1, %v5232_v24 }
 0x11a   : > { %4780 = vmatprep.mubr.msk.bf16.mxu0 %vm350_vm1, %v5234_v25 }
 0x11f   : > { %4645 = vmatmul.mubr.msk.bf16.gmra.mrb[20].mxu1 %vm350_vm1, %v5235_v26 }
 0x120   : > { %4648 = vmatprep.mubr.msk.bf16.mxu1 %vm350_vm1, %v5237_v27 }
 0x121   : > { %4781 = vmatmul.mubr.msk.bf16.gmra.mrb[20].mxu0 %vm350_vm1, %v5236_v28 }
 0x122   : > { %4784 = vmatprep.mubr.msk.bf16.mxu0 %vm350_vm1, %v5238_v1 }
 0x127   : > { %4649 = vmatmul.mubr.msk.bf16.gmra.mrb[24].mxu1 %vm350_vm1, %v5239_v29 }
 0x128   : > { %4652 = vmatprep.mubr.msk.bf16.mxu1 %vm350_vm1, %v5241_v30 }
 0x129   : > { %4785 = vmatmul.mubr.msk.bf16.gmra.mrb[24].mxu0 %vm350_vm1, %v5240_v31 }
 0x12a   : > { %4788 = vmatprep.mubr.msk.bf16.mxu0 %vm350_vm1, %v5242_v32 }
 0x12f   : > { %4653 = vmatmul.mubr.msk.bf16.gmra.mrb[28].mxu1 %vm350_vm1, %v5243_v33 }
 0x131   : > { %4789 = vmatmul.mubr.msk.bf16.gmra.mrb[28].mxu0 %vm350_vm1, %v5244_v34 }
 0x1aa   : > { %v4592_v35 = vpop.f32.mrb[0].mxu1 }
 0x1ab   : > { %v1421_v36 = vpop.f32.mrb[1].mxu1 }
 0x1ac   : > { %v4593_v37 = vpop.f32.mrb[2].mxu1 }
 0x1ad   : > { %v1424_v38 = vpop.f32.mrb[3].mxu1 }
 0x1b2   : > { %v4596_v39 = vpop.f32.mrb[4].mxu1 }
 0x1b3   : > { %v1437_v40 = vpop.f32.mrb[5].mxu1 }
 0x1b4   : > { %v4597_v41 = vpop.f32.mrb[6].mxu1 }
 0x1b5   : > { %v1440_v42 = vpop.f32.mrb[7].mxu1 }
 0x1ba   : > { %v5719_v43 = vpop.f32.mrb[8].mxu1 }
 0x1bb   : > { %v5721_v44 = vpop.f32.mrb[9].mxu1 }
 0x1bc   : > { %v5723_v45 = vpop.f32.mrb[10].mxu1 }
 0x1bd   : > { %v5725_v46 = vpop.f32.mrb[11].mxu1 }
 0x1c2   : > { %v5727_v47 = vpop.f32.mrb[12].mxu1 }
 0x1c3   : > { %v5729_v48 = vpop.f32.mrb[13].mxu1 }
 0x1c4   : > { %v5731_v49 = vpop.f32.mrb[14].mxu1 }
 0x1c5   : > { %v5734_v50 = vpop.f32.mrb[15].mxu1 }
 0x1cc   : > { %v4762_v51 = vpop.f32.mrb[0].mxu0 }
 0x1cd   : > { %v4794_v53 = vadd.f32 %v4762_v51, %v4592_v35  ;;  %v3228_v54 = vpop.f32.mrb[1].mxu0 }
 0x1ce   : > { %v4795_v55 = vadd.f32 %v3228_v54, %v1421_v36  ;;  %v4763_v56 = vpop.f32.mrb[2].mxu0 }
 0x1cf   : > { %v3396_v57 = vadd.f32 %v4794_v53, %v5740_v52  ;;  %v4796_v58 = vadd.f32 %v4763_v56, %v4593_v37  ;;  %v3231_v59 = vpop.f32.mrb[3].mxu0 }
 0x1d0   : > { %v3394_v60 = vadd.f32 %v4795_v55, %v5740_v52  ;;  %v4797_v3 = vadd.f32 %v3231_v59, %v1424_v38 }
 0x1d1   : > { %v3428_v61 = vmul.f32 0.01, %v3396_v57  ;;  %v3397_v62 = vadd.f32 %v4796_v58, %v5740_v52 }
 0x1d2   : > { %v3426_v63 = vmul.f32 0.01, %v3394_v60  ;;  %v3395_v0 = vadd.f32 %v4797_v3, %v5740_v52 }
 0x1d3   : > { %v3460_v2 = vmax.f32 %v3396_v57, %v3428_v61  ;;  %v3429_v4 = vmul.f32 0.01, %v3397_v62 }
 0x1d4   : > { %v3458_v5 = vmax.f32 %v3394_v60, %v3426_v63  ;;  %v3427_v6 = vmul.f32 0.01, %v3395_v0  ;;  %v4766_v7 = vpop.f32.mrb[4].mxu0 }
 0x1d5   : > { %v4303_v8 = vpack.c.bf16 %v3460_v2, %v3460_v2  ;;  %v3461_v9 = vmax.f32 %v3397_v62, %v3429_v4  ;;  %v4798_v10 = vadd.f32 %v4766_v7, %v4596_v39  ;;  %v3244_v11 = vpop.f32.mrb[5].mxu0 }
 0x1d6   : > { %v4301_v12 = vpack.c.bf16 %v3458_v5, %v3458_v5  ;;  %v3459_v13 = vmax.f32 %v3395_v0, %v3427_v6  ;;  %v4799_v14 = vadd.f32 %v3244_v11, %v1437_v40  ;;  %v4767_v15 = vpop.f32.mrb[6].mxu0 }
 0x1d7   : > { %3621 = vst.msk [vmem:[%s5749_s19 + $0x8] sm:$0xf] %vm3618_vm2, %v4303_v8  ;;  %v4304_v16 = vpack.c.bf16 %v3461_v9, %v3461_v9  ;;  %v3400_v17 = vadd.f32 %v4798_v10, %v5740_v52  ;;  %v4800_v18 = vadd.f32 %v4767_v15, %v4597_v41  ;;  %v3247_v19 = vpop.f32.mrb[7].mxu0 }
 0x1d8   : > { %3619 = vst.msk [vmem:[%s5749_s19] sm:$0xf] %vm3618_vm2, %v4301_v12  ;;  %v4302_v20 = vpack.c.bf16 %v3459_v13, %v3459_v13  ;;  %v3398_v21 = vadd.f32 %v4799_v14, %v5740_v52  ;;  %v4801_v22 = vadd.f32 %v3247_v19, %v1440_v42 }
 0x1d9   : > { %3622 = vst.msk [vmem:[%s5749_s19 + $0xc] sm:$0xf] %vm3618_vm2, %v4304_v16  ;;  %v3432_v23 = vmul.f32 0.01, %v3400_v17  ;;  %v3401_v24 = vadd.f32 %v4800_v18, %v5740_v52 }
 0x1da   : > { %3620 = vst.msk [vmem:[%s5749_s19 + $0x4] sm:$0xf] %vm3618_vm2, %v4302_v20  ;;  %v3430_v25 = vmul.f32 0.01, %v3398_v21  ;;  %v3399_v26 = vadd.f32 %v4801_v22, %v5740_v52 }
 0x1db   : > { %v3464_v27 = vmax.f32 %v3400_v17, %v3432_v23  ;;  %v3433_v28 = vmul.f32 0.01, %v3401_v24 }
 0x1dc   : > { %v3462_v1 = vmax.f32 %v3398_v21, %v3430_v25  ;;  %v3431_v29 = vmul.f32 0.01, %v3399_v26  ;;  %v4770_v30 = vpop.f32.mrb[8].mxu0 }
 0x1dd   : > { %v4307_v31 = vpack.c.bf16 %v3464_v27, %v3464_v27  ;;  %v3465_v32 = vmax.f32 %v3401_v24, %v3433_v28  ;;  %v4802_v33 = vadd.f32 %v4770_v30, %v5719_v43  ;;  %v3260_v34 = vpop.f32.mrb[9].mxu0 }
 0x1de   : > { %v4305_v35 = vpack.c.bf16 %v3462_v1, %v3462_v1  ;;  %v3463_v36 = vmax.f32 %v3399_v26, %v3431_v29  ;;  %v4803_v37 = vadd.f32 %v3260_v34, %v5721_v44  ;;  %v4771_v38 = vpop.f32.mrb[10].mxu0 }
 0x1df   : > { %3625 = vst.msk [vmem:[%s5749_s19 + $0x18] sm:$0xf] %vm3618_vm2, %v4307_v31  ;;  %v4308_v39 = vpack.c.bf16 %v3465_v32, %v3465_v32  ;;  %v3404_v40 = vadd.f32 %v4802_v33, %v5740_v52  ;;  %v4804_v41 = vadd.f32 %v4771_v38, %v5723_v45  ;;  %v3263_v42 = vpop.f32.mrb[11].mxu0 }
 0x1e0   : > { %3623 = vst.msk [vmem:[%s5749_s19 + $0x10] sm:$0xf] %vm3618_vm2, %v4305_v35  ;;  %v4306_v51 = vpack.c.bf16 %v3463_v36, %v3463_v36  ;;  %v3402_v43 = vadd.f32 %v4803_v37, %v5740_v52  ;;  %v4805_v53 = vadd.f32 %v3263_v42, %v5725_v46 }
 0x1e1   : > { %3626 = vst.msk [vmem:[%s5749_s19 + $0x1c] sm:$0xf] %vm3618_vm2, %v4308_v39  ;;  %v3436_v54 = vmul.f32 0.01, %v3404_v40  ;;  %v3405_v44 = vadd.f32 %v4804_v41, %v5740_v52 }
 0x1e2   : > { %3624 = vst.msk [vmem:[%s5749_s19 + $0x14] sm:$0xf] %vm3618_vm2, %v4306_v51  ;;  %v3434_v55 = vmul.f32 0.01, %v3402_v43  ;;  %v3403_v56 = vadd.f32 %v4805_v53, %v5740_v52 }
 0x1e3   : > { %v3468_v45 = vmax.f32 %v3404_v40, %v3436_v54  ;;  %v3437_v57 = vmul.f32 0.01, %v3405_v44 }
 0x1e4   : > { %v3466_v58 = vmax.f32 %v3402_v43, %v3434_v55  ;;  %v3435_v59 = vmul.f32 0.01, %v3403_v56  ;;  %v4774_v60 = vpop.f32.mrb[12].mxu0 }
 0x1e5   : > { %v4311_v3 = vpack.c.bf16 %v3468_v45, %v3468_v45  ;;  %v3469_v61 = vmax.f32 %v3405_v44, %v3437_v57  ;;  %v4806_v46 = vadd.f32 %v4774_v60, %v5727_v47  ;;  %v3276_v62 = vpop.f32.mrb[13].mxu0 }
 0x1e6   : > { %v4309_v63 = vpack.c.bf16 %v3466_v58, %v3466_v58  ;;  %v3467_v0 = vmax.f32 %v3403_v56, %v3435_v59  ;;  %v4807_v2 = vadd.f32 %v3276_v62, %v5729_v48  ;;  %v4775_v4 = vpop.f32.mrb[14].mxu0 }
 0x1e7   : > { %3629 = vst.msk [vmem:[%s5749_s19 + $0x28] sm:$0xf] %vm3618_vm2, %v4311_v3  ;;  %v4312_v5 = vpack.c.bf16 %v3469_v61, %v3469_v61  ;;  %v3408_v6 = vadd.f32 %v4806_v46, %v5740_v52  ;;  %v4808_v7 = vadd.f32 %v4775_v4, %v5731_v49  ;;  %v3279_v8 = vpop.f32.mrb[15].mxu0 }
 0x1e8   : > { %3627 = vst.msk [vmem:[%s5749_s19 + $0x20] sm:$0xf] %vm3618_vm2, %v4309_v63  ;;  %v4310_v9 = vpack.c.bf16 %v3467_v0, %v3467_v0  ;;  %v3406_v47 = vadd.f32 %v4807_v2, %v5740_v52  ;;  %v4809_v10 = vadd.f32 %v3279_v8, %v5734_v50 }
 0x1e9   : > { %3630 = vst.msk [vmem:[%s5749_s19 + $0x2c] sm:$0xf] %vm3618_vm2, %v4312_v5  ;;  %v3440_v11 = vmul.f32 0.01, %v3408_v6  ;;  %v3409_v48 = vadd.f32 %v4808_v7, %v5740_v52 }
 0x1ea   : > { %v4642_v12 = vpop.f32.mrb[16].mxu1  ;;  %3628 = vst.msk [vmem:[%s5749_s19 + $0x24] sm:$0xf] %vm3618_vm2, %v4310_v9  ;;  %v3438_v13 = vmul.f32 0.01, %v3406_v47  ;;  %v3407_v14 = vadd.f32 %v4809_v10, %v5740_v52 }
 0x1eb   : > { %v1846_v49 = vpop.f32.mrb[17].mxu1  ;;  %v3472_v15 = vmax.f32 %v3408_v6, %v3440_v11  ;;  %v3441_v16 = vmul.f32 0.01, %v3409_v48 }
 0x1ec   : > { %v4643_v17 = vpop.f32.mrb[18].mxu1  ;;  %v3470_v18 = vmax.f32 %v3406_v47, %v3438_v13  ;;  %v3439_v19 = vmul.f32 0.01, %v3407_v14  ;;  %v4778_v50 = vpop.f32.mrb[16].mxu0 }
 0x1ed   : > { %v1849_v20 = vpop.f32.mrb[19].mxu1  ;;  %v4315_v21 = vpack.c.bf16 %v3472_v15, %v3472_v15  ;;  %v3473_v22 = vmax.f32 %v3409_v48, %v3441_v16  ;;  %v4810_v23 = vadd.f32 %v4778_v50, %v4642_v12  ;;  %v3292_v24 = vpop.f32.mrb[17].mxu0 }
 0x1ee   : > { %v4313_v25 = vpack.c.bf16 %v3470_v18, %v3470_v18  ;;  %v3471_v26 = vmax.f32 %v3407_v14, %v3439_v19  ;;  %v4811_v27 = vadd.f32 %v3292_v24, %v1846_v49  ;;  %v4779_v28 = vpop.f32.mrb[18].mxu0 }
 0x1ef   : > { %3633 = vst.msk [vmem:[%s5749_s19 + $0x38] sm:$0xf] %vm3618_vm2, %v4315_v21  ;;  %v4316_v1 = vpack.c.bf16 %v3473_v22, %v3473_v22  ;;  %v3412_v29 = vadd.f32 %v4810_v23, %v5740_v52  ;;  %v4812_v30 = vadd.f32 %v4779_v28, %v4643_v17  ;;  %v3295_v31 = vpop.f32.mrb[19].mxu0 }
 0x1f0   : > { %3631 = vst.msk [vmem:[%s5749_s19 + $0x30] sm:$0xf] %vm3618_vm2, %v4313_v25  ;;  %v4314_v32 = vpack.c.bf16 %v3471_v26, %v3471_v26  ;;  %v3410_v33 = vadd.f32 %v4811_v27, %v5740_v52  ;;  %v4813_v34 = vadd.f32 %v3295_v31, %v1849_v20 }
 0x1f1   : > { %3634 = vst.msk [vmem:[%s5749_s19 + $0x3c] sm:$0xf] %vm3618_vm2, %v4316_v1  ;;  %v3444_v35 = vmul.f32 0.01, %v3412_v29  ;;  %v3413_v36 = vadd.f32 %v4812_v30, %v5740_v52 }
 0x1f2   : > { %v4646_v37 = vpop.f32.mrb[20].mxu1  ;;  %3632 = vst.msk [vmem:[%s5749_s19 + $0x34] sm:$0xf] %vm3618_vm2, %v4314_v32  ;;  %v3442_v38 = vmul.f32 0.01, %v3410_v33  ;;  %v3411_v39 = vadd.f32 %v4813_v34, %v5740_v52 }
 0x1f3   : > { %v1862_v40 = vpop.f32.mrb[21].mxu1  ;;  %v3476_v41 = vmax.f32 %v3412_v29, %v3444_v35  ;;  %v3445_v42 = vmul.f32 0.01, %v3413_v36 }
 0x1f4   : > { %v4647_v51 = vpop.f32.mrb[22].mxu1  ;;  %v3474_v43 = vmax.f32 %v3410_v33, %v3442_v38  ;;  %v3443_v53 = vmul.f32 0.01, %v3411_v39  ;;  %v4782_v54 = vpop.f32.mrb[20].mxu0 }
 0x1f5   : > { %v1865_v44 = vpop.f32.mrb[23].mxu1  ;;  %v4319_v55 = vpack.c.bf16 %v3476_v41, %v3476_v41  ;;  %v3477_v56 = vmax.f32 %v3413_v36, %v3445_v42  ;;  %v4814_v45 = vadd.f32 %v4782_v54, %v4646_v37  ;;  %v3308_v57 = vpop.f32.mrb[21].mxu0 }
 0x1f6   : > { %v4317_v58 = vpack.c.bf16 %v3474_v43, %v3474_v43  ;;  %v3475_v59 = vmax.f32 %v3411_v39, %v3443_v53  ;;  %v4815_v60 = vadd.f32 %v3308_v57, %v1862_v40  ;;  %v4783_v3 = vpop.f32.mrb[22].mxu0 }
 0x1f7   : > { %3637 = vst.msk [vmem:[%s5749_s19 + $0x48] sm:$0xf] %vm3618_vm2, %v4319_v55  ;;  %v4320_v61 = vpack.c.bf16 %v3477_v56, %v3477_v56  ;;  %v3416_v46 = vadd.f32 %v4814_v45, %v5740_v52  ;;  %v4816_v62 = vadd.f32 %v4783_v3, %v4647_v51  ;;  %v3311_v63 = vpop.f32.mrb[23].mxu0 }
 0x1f8   : > { %3635 = vst.msk [vmem:[%s5749_s19 + $0x40] sm:$0xf] %vm3618_vm2, %v4317_v58  ;;  %v4318_v0 = vpack.c.bf16 %v3475_v59, %v3475_v59  ;;  %v3414_v2 = vadd.f32 %v4815_v60, %v5740_v52  ;;  %v4817_v4 = vadd.f32 %v3311_v63, %v1865_v44 }
 0x1f9   : > { %3638 = vst.msk [vmem:[%s5749_s19 + $0x4c] sm:$0xf] %vm3618_vm2, %v4320_v61  ;;  %v3448_v5 = vmul.f32 0.01, %v3416_v46  ;;  %v3417_v6 = vadd.f32 %v4816_v62, %v5740_v52 }
 0x1fa   : > { %v4650_v7 = vpop.f32.mrb[24].mxu1  ;;  %3636 = vst.msk [vmem:[%s5749_s19 + $0x44] sm:$0xf] %vm3618_vm2, %v4318_v0  ;;  %v3446_v8 = vmul.f32 0.01, %v3414_v2  ;;  %v3415_v9 = vadd.f32 %v4817_v4, %v5740_v52 }
 0x1fb   : > { %v1878_v47 = vpop.f32.mrb[25].mxu1  ;;  %v3480_v10 = vmax.f32 %v3416_v46, %v3448_v5  ;;  %v3449_v11 = vmul.f32 0.01, %v3417_v6 }
 0x1fc   : > { %v4651_v48 = vpop.f32.mrb[26].mxu1  ;;  %v3478_v12 = vmax.f32 %v3414_v2, %v3446_v8  ;;  %v3447_v13 = vmul.f32 0.01, %v3415_v9  ;;  %v4786_v14 = vpop.f32.mrb[24].mxu0 }
 0x1fd   : > { %v1881_v49 = vpop.f32.mrb[27].mxu1  ;;  %v4323_v15 = vpack.c.bf16 %v3480_v10, %v3480_v10  ;;  %v3481_v16 = vmax.f32 %v3417_v6, %v3449_v11  ;;  %v4818_v17 = vadd.f32 %v4786_v14, %v4650_v7  ;;  %v3324_v18 = vpop.f32.mrb[25].mxu0 }
 0x1fe   : > { %v4321_v19 = vpack.c.bf16 %v3478_v12, %v3478_v12  ;;  %v3479_v50 = vmax.f32 %v3415_v9, %v3447_v13  ;;  %v4819_v20 = vadd.f32 %v3324_v18, %v1878_v47  ;;  %v4787_v21 = vpop.f32.mrb[26].mxu0 }
 0x1ff   : > { %3641 = vst.msk [vmem:[%s5749_s19 + $0x58] sm:$0xf] %vm3618_vm2, %v4323_v15  ;;  %v4324_v22 = vpack.c.bf16 %v3481_v16, %v3481_v16  ;;  %v3420_v23 = vadd.f32 %v4818_v17, %v5740_v52  ;;  %v4820_v24 = vadd.f32 %v4787_v21, %v4651_v48  ;;  %v3327_v25 = vpop.f32.mrb[27].mxu0 }
 0x200   : > { %3639 = vst.msk [vmem:[%s5749_s19 + $0x50] sm:$0xf] %vm3618_vm2, %v4321_v19  ;;  %v4322_v26 = vpack.c.bf16 %v3479_v50, %v3479_v50  ;;  %v3418_v27 = vadd.f32 %v4819_v20, %v5740_v52  ;;  %v4821_v28 = vadd.f32 %v3327_v25, %v1881_v49 }
 0x201   : > { %3642 = vst.msk [vmem:[%s5749_s19 + $0x5c] sm:$0xf] %vm3618_vm2, %v4324_v22  ;;  %v3452_v1 = vmul.f32 0.01, %v3420_v23  ;;  %v3421_v29 = vadd.f32 %v4820_v24, %v5740_v52 }
 0x202   : > { %v4654_v30 = vpop.f32.mrb[28].mxu1  ;;  %3640 = vst.msk [vmem:[%s5749_s19 + $0x54] sm:$0xf] %vm3618_vm2, %v4322_v26  ;;  %v3450_v31 = vmul.f32 0.01, %v3418_v27  ;;  %v3419_v32 = vadd.f32 %v4821_v28, %v5740_v52 }
 0x203   : > { %v1894_v33 = vpop.f32.mrb[29].mxu1  ;;  %v3484_v34 = vmax.f32 %v3420_v23, %v3452_v1  ;;  %v3453_v35 = vmul.f32 0.01, %v3421_v29 }
 0x204   : > { %v4655_v36 = vpop.f32.mrb[30].mxu1  ;;  %v3482_v37 = vmax.f32 %v3418_v27, %v3450_v31  ;;  %v3451_v38 = vmul.f32 0.01, %v3419_v32  ;;  %v4790_v39 = vpop.f32.mrb[28].mxu0 }
 0x205   : > { %v1897_v40 = vpop.f32.mrb[31].mxu1  ;;  %v4327_v41 = vpack.c.bf16 %v3484_v34, %v3484_v34  ;;  %v3485_v42 = vmax.f32 %v3421_v29, %v3453_v35  ;;  %v4822_v51 = vadd.f32 %v4790_v39, %v4654_v30  ;;  %v3340_v43 = vpop.f32.mrb[29].mxu0 }
 0x206   : > { %v4325_v53 = vpack.c.bf16 %v3482_v37, %v3482_v37  ;;  %v3483_v54 = vmax.f32 %v3419_v32, %v3451_v38  ;;  %v4823_v44 = vadd.f32 %v3340_v43, %v1894_v33  ;;  %v4791_v55 = vpop.f32.mrb[30].mxu0 }
 0x207   : > { %3645 = vst.msk [vmem:[%s5749_s19 + $0x68] sm:$0xf] %vm3618_vm2, %v4327_v41  ;;  %v4328_v56 = vpack.c.bf16 %v3485_v42, %v3485_v42  ;;  %v3424_v45 = vadd.f32 %v4822_v51, %v5740_v52  ;;  %v4824_v57 = vadd.f32 %v4791_v55, %v4655_v36  ;;  %v3343_v58 = vpop.f32.mrb[31].mxu0 }
 0x208   : > { %3643 = vst.msk [vmem:[%s5749_s19 + $0x60] sm:$0xf] %vm3618_vm2, %v4325_v53  ;;  %v4326_v59 = vpack.c.bf16 %v3483_v54, %v3483_v54  ;;  %v3422_v60 = vadd.f32 %v4823_v44, %v5740_v52  ;;  %v4825_v3 = vadd.f32 %v3343_v58, %v1897_v40 }
 0x209   : > { %3646 = vst.msk [vmem:[%s5749_s19 + $0x6c] sm:$0xf] %vm3618_vm2, %v4328_v56  ;;  %v3456_v61 = vmul.f32 0.01, %v3424_v45  ;;  %v3425_v46 = vadd.f32 %v4824_v57, %v5740_v52 }
 0x20a   : > { %3644 = vst.msk [vmem:[%s5749_s19 + $0x64] sm:$0xf] %vm3618_vm2, %v4326_v59  ;;  %v3454_v62 = vmul.f32 0.01, %v3422_v60  ;;  %v3423_v63 = vadd.f32 %v4825_v3, %v5740_v52 }
 0x20b   : > { %v3488_v0 = vmax.f32 %v3424_v45, %v3456_v61  ;;  %v3457_v2 = vmul.f32 0.01, %v3425_v46 }
 0x20c   : > { %v3486_v4 = vmax.f32 %v3422_v60, %v3454_v62  ;;  %v3455_v5 = vmul.f32 0.01, %v3423_v63 }
 0x20d   : > { %v4331_v6 = vpack.c.bf16 %v3488_v0, %v3488_v0  ;;  %v3489_v7 = vmax.f32 %v3425_v46, %v3457_v2 }
 0x20e   : > { %v4329_v8 = vpack.c.bf16 %v3486_v4, %v3486_v4  ;;  %v3487_v9 = vmax.f32 %v3423_v63, %v3455_v5 }
 0x20f   : > { %3649 = vst.msk [vmem:[%s5749_s19 + $0x78] sm:$0xf] %vm3618_vm2, %v4331_v6  ;;  %v4332_v47 = vpack.c.bf16 %v3489_v7, %v3489_v7 }
 0x210   : > { %3647 = vst.msk [vmem:[%s5749_s19 + $0x70] sm:$0xf] %vm3618_vm2, %v4329_v8  ;;  %v4330_v10 = vpack.c.bf16 %v3487_v9, %v3487_v9 }
 0x211   : > { %3650 = vst.msk [vmem:[%s5749_s19 + $0x7c] sm:$0xf] %vm3618_vm2, %v4332_v47 }
 0x212   : > { %3648 = vst.msk [vmem:[%s5749_s19 + $0x74] sm:$0xf] %vm3618_vm2, %v4330_v10 }
 0x213 PF: > { %s13_s16 = sadd.s32 1, %s5283_s16   ;;  %s5870_s12 = smov %s5275_s14 }
 0x214   : > { %p10_p7 = scmp.ge.s32.totalorder %s13_s16, 10   ;;  %s5871_s13 = smov %s5279_s15 }
 0x215   : > { %s5872_s14 = smov %s5875_s17  ;;  %s5873_s15 = smov %s5879_s18 }
 0x216   :  { %12 = sbr.rel (!%p10_p7) target bundleno = 3 (0x3), region = 79 }

// kernel: forward.6
= control target key start
LH: loop header
LB: loop body
LE: loop exit
PB: predicated region body
PF: predicated region fallthrough
CT: control target
= control target key end

     0   :  { %s5513_s12 = smov 0   ;;  %s5515_s13 = smov 0   ;;  %s6037_s0 = inlined_call_operand.vmem [shape: bf16[2,6,272,32], index: 0, kind: input, shape index: {}]   ;;  %s6038_s1 = inlined_call_operand.vmem [shape: bf16[9,32,32], index: 1, kind: input, shape index: {}]   ;;  %s6039_s2 = inlined_call_operand.vmem [shape: f32[1,32], index: 2, kind: input, shape index: {}]   ;;  %s6040_s3 = inlined_call_operand.vmem [shape: bf16[2,256,32], index: 3, kind: output, shape index: {}]  }
   0x1   :  { %s5517_s14 = smov 0  }
   0x2 LB: > { %s25_s15 = sadd.s32 1, %s5487_s13  ;;  %p3866_p0 = scmp.ge.s32.totalorder %s5491_s14, 1  ;;  %s5491_s14 = sphi %s5517_s14, %s13_s14   ;;  %s5487_s13 = sphi %s5515_s13, %s6042_s13   ;;  %s5483_s12 = sphi %s5513_s12, %s6041_s12  }
   0x3   : > { %p27_p1 = scmp.ge.s32.totalorder %s25_s15, 2  ;;  %p151_p2 = scmp.lt.s32.totalorder %s5491_s14, 3 }
   0x5   : > { %s6044_s15 = smov (%p27_p1, %s25_s15), 0  ;;  %p152_p3 = pnand %p3866_p0, %p151_p2 }
   0x6   : > { %v5305_v0 = vld [vmem:[%s6038_s1 + $0x10] sm:$0xff] (!%p152_p3)   ;;  %p179_p4 = scmp.lt.s32.totalorder (!%p152_p3), %s5483_s12, 1  ;;  %v5537_v1 = vld [vmem:[%s6038_s1 + $0x40] sm:$0xff] (!%p152_p3)   ;;  %v5307_v2 = vld [vmem:[%s6038_s1 + $0x18] sm:$0xff] (!%p152_p3)   ;;  %vm368_vm0 = vcmask (!%p152_p3), 261120   ;;  %vm3723_vm1 = vcmask (!%p152_p3), 257024  }
   0x7   : > { %155 = sbr.rel (%p152_p3) target bundleno = 526 (0x20e), region = 32  ;;  %4696 = vmatprep.subr.bf16.mxu1 (!%p152_p3), %v5305_v0  ;;  %4840 = vmatprep.subr.bf16.mxu0 (!%p152_p3), %v5537_v1  ;;  %v5308_v3 = vld [vmem:[%s6038_s1 + $0x48] sm:$0xff] (!%p152_p3)   ;;  %v5312_v4 = vld [vmem:[%s6038_s1] sm:$0xff] (!%p152_p3)   ;;  %v5314_v5 = vld [vmem:[%s6038_s1 + $0x50] sm:$0xff] (!%p152_p3)  }
   0x8   : > { %4697 = vmatpush3.bf16.msra.mxu1 (!%p152_p3), %v5305_v0  ;;  %4841 = vmatpush3.bf16.msra.mxu0 (!%p152_p3), %v5537_v1  ;;  %v5323_v8 = vld [vmem:[%s6038_s1 + $0x58] sm:$0xff] (!%p152_p3)   ;;  %v5331_v21 = vld [vmem:[%s6038_s1 + $0x8] sm:$0xff] (!%p152_p3)   ;;  %v5333_v22 = vld [vmem:[%s6038_s1 + $0x60] sm:$0xff] (!%p152_p3)  }
   0x9   : > { %4698 = vmatprep.subr.bf16.mxu1 (!%p152_p3), %v5307_v2  ;;  %4842 = vmatprep.subr.bf16.mxu0 (!%p152_p3), %v5308_v3  ;;  %v5349_v31 = vld [vmem:[%s6038_s1 + $0x20] sm:$0xff] (!%p152_p3)   ;;  %v5351_v33 = vld [vmem:[%s6038_s1 + $0x68] sm:$0xff] (!%p152_p3)   ;;  %v5369_v44 = vld [vmem:[%s6038_s1 + $0x70] sm:$0xff] (!%p152_p3)  }
   0xa   : > { %v5367_v50 = vld [vmem:[%s6038_s1 + $0x28] sm:$0xff] (!%p152_p3)   ;;  %v5664_v54 = vld [vmem:[%s6038_s1 + $0x30] sm:$0xff] (!%p152_p3)  }
   0xc   : > { %4699 = vmatpush3.bf16.msra.mxu1 (!%p152_p3), %v5307_v2  ;;  %4843 = vmatpush3.bf16.msra.mxu0 (!%p152_p3), %v5308_v3 }
   0xd   : > { %4732 = vmatprep.subr.bf16.mxu1 (!%p152_p3), %v5312_v4  ;;  %4876 = vmatprep.subr.bf16.mxu0 (!%p152_p3), %v5314_v5 }
   0xe   : > { %s6046_s12 = smov (!%p179_p4, %s5483_s12), 1 }
   0xf   : > { %s5280_s24 = smul.u32 816, %s6046_s12  ;;  %s4501_s16 = sshll.u32 %s6046_s12, 7 }
  0x10   : > { %s5927_s19 = scalar_lea.vmem %s6040_s3, %s4501_s16 }
  0x11   : > { %s5559_s4 = scalar_lea.vmem %s6037_s0, %s5280_s24 }
  0x12   : > { %v5309_v6 = vld [vmem:[%s5559_s4 + $0x110] sm:$0xff]   ;;  %v5310_v7 = vld [vmem:[%s5559_s4 + $0x198] sm:$0xff]   ;;  %v5313_v10 = vld [vmem:[%s5559_s4 + $0x1a0] sm:$0xff]  }
  0x13   : > { %4700 = vmatprep.mubr.msk.bf16.mxu1 %vm368_vm0, %v5309_v6  ;;  %v5311_v9 = vld [vmem:[%s5559_s4 + $0x118] sm:$0xff]   ;;  %4844 = vmatprep.mubr.msk.bf16.mxu0 %vm368_vm0, %v5310_v7  ;;  %v5315_v11 = vld [vmem:[%s5559_s4 + $0x120] sm:$0xff]   ;;  %v5316_v12 = vld [vmem:[%s5559_s4 + $0x1a8] sm:$0xff]  }
  0x14   : > { %4701 = vmatmul.mubr.msk.bf16.vlgmr.msra.gmra.mrb[0].mxu1 %vm368_vm0, %v5311_v9  ;;  %4845 = vmatmul.mubr.msk.bf16.vlgmr.msra.gmra.mrb[0].mxu0 %vm368_vm0, %v5313_v10  ;;  %v5317_v13 = vld [vmem:[%s5559_s4 + $0x128] sm:$0xff]   ;;  %v5318_v14 = vld [vmem:[%s5559_s4 + $0x1b0] sm:$0xff]   ;;  %v5320_v16 = vld [vmem:[%s5559_s4 + $0x1b8] sm:$0xff]  }
  0x15   : > { %4733 = vmatpush3.bf16.msra.mxu1 %v5312_v4  ;;  %4877 = vmatpush3.bf16.msra.mxu0 %v5314_v5  ;;  %v5319_v15 = vld [vmem:[%s5559_s4 + $0x130] sm:$0xff]   ;;  %v5321_v17 = vld [vmem:[%s5559_s4 + $0x138] sm:$0xff]   ;;  %v5322_v18 = vld [vmem:[%s5559_s4 + $0x1c0] sm:$0xff]  }
  0x16   : > { %4704 = vmatprep.mubr.msk.bf16.mxu1 %vm368_vm0, %v5315_v11  ;;  %4848 = vmatprep.mubr.msk.bf16.mxu0 %vm368_vm0, %v5316_v12  ;;  %v5324_v19 = vld [vmem:[%s5559_s4 + $0x140] sm:$0xff]   ;;  %v5325_v20 = vld [vmem:[%s5559_s4 + $0x1c8] sm:$0xff]   ;;  %v5327_v24 = vld [vmem:[%s5559_s4 + $0x1d0] sm:$0xff]  }
  0x17   : > { %4878 = vmatprep.subr.bf16.mxu0 %v5323_v8  ;;  %4734 = vmatprep.subr.bf16.mxu1 %v5331_v21  ;;  %v5326_v23 = vld [vmem:[%s5559_s4 + $0x148] sm:$0xff]   ;;  %v5328_v25 = vld [vmem:[%s5559_s4 + $0x150] sm:$0xff]   ;;  %v5330_v27 = vld [vmem:[%s5559_s4 + $0x158] sm:$0xff]  }
  0x18   : > { %v5329_v26 = vld [vmem:[%s5559_s4 + $0x2a8] sm:$0xff]   ;;  %v5332_v28 = vld [vmem:[%s5559_s4 + $0x2b0] sm:$0xff]   ;;  %v5334_v29 = vld [vmem:[%s5559_s4 + $0x160] sm:$0xff]  }
  0x19   : > { %4879 = vmatpush3.bf16.msra.mxu0 %v5323_v8  ;;  %4735 = vmatpush3.bf16.msra.mxu1 %v5331_v21  ;;  %v5335_v30 = vld [vmem:[%s5559_s4 + $0x2b8] sm:$0xff]   ;;  %v5336_v32 = vld [vmem:[%s5559_s4 + $0x168] sm:$0xff]   ;;  %v5337_v34 = vld [vmem:[%s5559_s4 + $0x2c0] sm:$0xff]  }
  0x1a   : > { %4912 = vmatprep.subr.bf16.mxu0 %v5333_v22  ;;  %4768 = vmatprep.subr.bf16.mxu1 %v5349_v31  ;;  %v5338_v35 = vld [vmem:[%s5559_s4 + $0x170] sm:$0xff]   ;;  %v5339_v36 = vld [vmem:[%s5559_s4 + $0x2c8] sm:$0xff]   ;;  %v5340_v37 = vld [vmem:[%s5559_s4 + $0x178] sm:$0xff]  }
  0x1b   : > { %v5341_v38 = vld [vmem:[%s5559_s4 + $0x2d0] sm:$0xff]   ;;  %v5342_v39 = vld [vmem:[%s5559_s4 + $0x180] sm:$0xff]   ;;  %v5343_v40 = vld [vmem:[%s5559_s4 + $0x2d8] sm:$0xff]  }
  0x1c   : > { %4705 = vmatmul.mubr.msk.bf16.gmra.mrb[4].mxu1 %vm368_vm0, %v5317_v13  ;;  %4849 = vmatmul.mubr.msk.bf16.gmra.mrb[4].mxu0 %vm368_vm0, %v5318_v14  ;;  %v5344_v41 = vld [vmem:[%s5559_s4 + $0x188] sm:$0xff]   ;;  %v5345_v42 = vld [vmem:[%s5559_s4 + $0x2e0] sm:$0xff]   ;;  %v5350_v47 = vld [vmem:[%s5559_s4 + $0x2f0] sm:$0xff]  }
  0x1d   : > { %4708 = vmatprep.mubr.msk.bf16.mxu1 %vm368_vm0, %v5319_v15  ;;  %4852 = vmatprep.mubr.msk.bf16.mxu0 %vm368_vm0, %v5320_v16  ;;  %v5346_v43 = vld [vmem:[%s5559_s4] sm:$0xff]   ;;  %v5347_v45 = vld [vmem:[%s5559_s4 + $0x2e8] sm:$0xff]   ;;  %v5352_v48 = vld [vmem:[%s5559_s4 + $0x10] sm:$0xff]  }
  0x1e   : > { %v5348_v46 = vld [vmem:[%s5559_s4 + $0x8] sm:$0xff]   ;;  %v5353_v49 = vld [vmem:[%s5559_s4 + $0x2f8] sm:$0xff]   ;;  %v5355_v52 = vld [vmem:[%s5559_s4 + $0x300] sm:$0xff]  }
  0x1f   : > { %v5354_v51 = vld [vmem:[%s5559_s4 + $0x18] sm:$0xff]   ;;  %v5356_v53 = vld [vmem:[%s5559_s4 + $0x20] sm:$0xff]   ;;  %v5357_v55 = vld [vmem:[%s5559_s4 + $0x308] sm:$0xff]  }
  0x20   : > { %v5358_v56 = vld [vmem:[%s5559_s4 + $0x28] sm:$0xff]   ;;  %v5359_v57 = vld [vmem:[%s5559_s4 + $0x310] sm:$0xff]   ;;  %v5361_v59 = vld [vmem:[%s5559_s4 + $0x318] sm:$0xff]  }
  0x21   : > { %v5360_v58 = vld [vmem:[%s5559_s4 + $0x30] sm:$0xff]   ;;  %v5362_v60 = vld [vmem:[%s5559_s4 + $0x38] sm:$0xff]   ;;  %v5363_v61 = vld [vmem:[%s5559_s4 + $0x320] sm:$0xff]  }
  0x22   : > { %v5364_v62 = vld [vmem:[%s5559_s4 + $0x40] sm:$0xff]   ;;  %v5365_v63 = vld [vmem:[%s5559_s4 + $0x8] sm:$0xff]   ;;  %v5368_v2 = vld [vmem:[%s5559_s4 + $0x10] sm:$0xff]  }
  0x23   : > { %v5366_v0 = vld [vmem:[%s5559_s4 + $0x48] sm:$0xff]   ;;  %v5370_v3 = vld [vmem:[%s5559_s4 + $0x50] sm:$0xff]   ;;  %v5371_v4 = vld [vmem:[%s5559_s4 + $0x18] sm:$0xff]  }
  0x24   : > { %4709 = vmatmul.mubr.msk.bf16.gmra.mrb[8].mxu1 %vm368_vm0, %v5321_v17  ;;  %4853 = vmatmul.mubr.msk.bf16.gmra.mrb[8].mxu0 %vm368_vm0, %v5322_v18  ;;  %v5387_v5 = vld [vmem:[%s6038_s1 + $0x78] sm:$0xff]   ;;  %v5703_v7 = vld [vmem:[%s6038_s1 + $0x80] sm:$0xff]   ;;  %v5375_v10 = vld [vmem:[%s5559_s4 + $0x28] sm:$0xff]  }
  0x25   : > { %4712 = vmatprep.mubr.msk.bf16.mxu1 %vm368_vm0, %v5324_v19  ;;  %4856 = vmatprep.mubr.msk.bf16.mxu0 %vm368_vm0, %v5325_v20  ;;  %v5372_v6 = vld [vmem:[%s5559_s4 + $0x58] sm:$0xff]   ;;  %v5373_v8 = vld [vmem:[%s5559_s4 + $0x20] sm:$0xff]   ;;  %v5376_v11 = vld [vmem:[%s5559_s4 + $0x68] sm:$0xff]  }
  0x26   : > { %v5374_v9 = vld [vmem:[%s5559_s4 + $0x60] sm:$0xff]   ;;  %v5377_v12 = vld [vmem:[%s5559_s4 + $0x30] sm:$0xff]   ;;  %v5379_v14 = vld [vmem:[%s5559_s4 + $0x38] sm:$0xff]  }
  0x27   : > { %v5378_v13 = vld [vmem:[%s5559_s4 + $0x70] sm:$0xff]   ;;  %v5380_v15 = vld [vmem:[%s5559_s4 + $0x78] sm:$0xff]   ;;  %v5381_v16 = vld [vmem:[%s5559_s4 + $0x40] sm:$0xff]  }
  0x28   : > { %v5382_v17 = vld [vmem:[%s5559_s4 + $0x220] sm:$0xff]   ;;  %v5383_v18 = vld [vmem:[%s5559_s4 + $0x48] sm:$0xff]   ;;  %v5386_v20 = vld [vmem:[%s5559_s4 + $0x50] sm:$0xff]  }
  0x29   : > { %v5384_v19 = vld [vmem:[%s5559_s4 + $0x228] sm:$0xff]   ;;  %v5388_v21 = vld [vmem:[%s5559_s4 + $0x230] sm:$0xff]  }
  0x2c   : > { %4713 = vmatmul.mubr.msk.bf16.gmra.mrb[12].mxu1 %vm368_vm0, %v5326_v23  ;;  %4857 = vmatmul.mubr.msk.bf16.gmra.mrb[12].mxu0 %vm368_vm0, %v5327_v24  ;;  %v5403_v23 = vld [vmem:[%s6038_s1 + $0x38] sm:$0xff]  }
  0x2d   : > { %4716 = vmatprep.mubr.msk.bf16.mxu1 %vm368_vm0, %v5328_v25  ;;  %4880 = vmatprep.mubr.msk.bf16.mxu0 %vm368_vm0, %v5329_v26  ;;  %v5390_v24 = vld [vmem:[%s5559_s4 + $0x238] sm:$0xff]   ;;  %v5391_v25 = vld [vmem:[%s5559_s4 + $0x60] sm:$0xff]  }
  0x2e   : > { %v5392_v26 = vld [vmem:[%s5559_s4 + $0x240] sm:$0xff]  }
  0x34   : > { %4717 = vmatmul.mubr.msk.bf16.gmra.mrb[16].mxu1 %vm368_vm0, %v5330_v27  ;;  %4881 = vmatmul.mubr.msk.bf16.vlgmr.msra.gmra.mrb[0].mxu0 %vm368_vm0, %v5332_v28  ;;  %v5393_v27 = vld [vmem:[%s5559_s4 + $0x68] sm:$0xff]  }
  0x35   : > { %4720 = vmatprep.mubr.msk.bf16.mxu1 %vm368_vm0, %v5334_v29  ;;  %4913 = vmatpush3.bf16.msra.mxu0 %v5333_v22  ;;  %v5389_v22 = vld [vmem:[%s5559_s4 + $0x58] sm:$0xff]   ;;  %v5394_v28 = vld [vmem:[%s5559_s4 + $0x248] sm:$0xff]   ;;  %v5395_v29 = vld [vmem:[%s5559_s4 + $0x70] sm:$0xff]  }
  0x36   : > { %4884 = vmatprep.mubr.msk.bf16.mxu0 %vm368_vm0, %v5335_v30  ;;  %4914 = vmatprep.subr.bf16.mxu0 %v5351_v33  ;;  %v5396_v30 = vld [vmem:[%s5559_s4 + $0x250] sm:$0xff]  }
  0x39   : > { %4915 = vmatpush3.bf16.msra.mxu0 %v5351_v33  ;;  %v5400_v33 = vld [vmem:[%s5559_s4 + $0x260] sm:$0xff]  }
  0x3a   : > { %4948 = vmatprep.subr.bf16.mxu0 %v5369_v44 }
  0x3c   : > { %4721 = vmatmul.mubr.msk.bf16.gmra.mrb[20].mxu1 %vm368_vm0, %v5336_v32  ;;  %4885 = vmatmul.mubr.msk.bf16.gmra.mrb[4].mxu0 %vm368_vm0, %v5337_v34  ;;  %v5399_v32 = vld [vmem:[%s5559_s4 + $0x80] sm:$0xff]   ;;  %v5401_v34 = vld [vmem:[%s5559_s4 + $0x118] sm:$0xff]  }
  0x3d   : > { %4724 = vmatprep.mubr.msk.bf16.mxu1 %vm368_vm0, %v5338_v35  ;;  %4888 = vmatprep.mubr.msk.bf16.mxu0 %vm368_vm0, %v5339_v36  ;;  %v5402_v35 = vld [vmem:[%s5559_s4 + $0x268] sm:$0xff]   ;;  %v5404_v36 = vld [vmem:[%s5559_s4 + $0x120] sm:$0xff]  }
  0x44   : > { %4725 = vmatmul.mubr.msk.bf16.gmra.mrb[24].mxu1 %vm368_vm0, %v5340_v37  ;;  %4889 = vmatmul.mubr.msk.bf16.gmra.mrb[8].mxu0 %vm368_vm0, %v5341_v38  ;;  %v5406_v37 = vld [vmem:[%s5559_s4 + $0x270] sm:$0xff]   ;;  %v5407_v38 = vld [vmem:[%s5559_s4 + $0x128] sm:$0xff]  }
  0x45   : > { %4728 = vmatprep.mubr.msk.bf16.mxu1 %vm368_vm0, %v5342_v39  ;;  %4892 = vmatprep.mubr.msk.bf16.mxu0 %vm368_vm0, %v5343_v40  ;;  %v5422_v39 = vld [vmem:[%s6038_s1 + $0x88] sm:$0xff]   ;;  %v5408_v40 = vld [vmem:[%s5559_s4 + $0x278] sm:$0xff]  }
  0x4c   : > { %4729 = vmatmul.mubr.msk.bf16.gmra.mrb[28].mxu1 %vm368_vm0, %v5344_v41  ;;  %4893 = vmatmul.mubr.msk.bf16.gmra.mrb[12].mxu0 %vm368_vm0, %v5345_v42  ;;  %v5409_v41 = vld [vmem:[%s5559_s4 + $0x130] sm:$0xff]   ;;  %v5410_v42 = vld [vmem:[%s5559_s4 + $0x280] sm:$0xff]  }
  0x4d   : > { %4736 = vmatprep.mubr.msk.bf16.mxu1 %vm368_vm0, %v5346_v43  ;;  %4896 = vmatprep.mubr.msk.bf16.mxu0 %vm368_vm0, %v5347_v45  ;;  %v5411_v43 = vld [vmem:[%s5559_s4 + $0x138] sm:$0xff]   ;;  %v5413_v45 = vld [vmem:[%s5559_s4 + $0x140] sm:$0xff]  }
  0x54   : > { %4737 = vmatmul.mubr.msk.bf16.vlgmr.msra.gmra.mrb[0].mxu1 %vm368_vm0, %v5348_v46  ;;  %4897 = vmatmul.mubr.msk.bf16.gmra.mrb[16].mxu0 %vm368_vm0, %v5350_v47  ;;  %v5414_v46 = vld [vmem:[%s5559_s4 + $0x290] sm:$0xff]   ;;  %v5415_v47 = vld [vmem:[%s5559_s4 + $0x148] sm:$0xff]  }
  0x55   : > { %4769 = vmatpush3.bf16.msra.mxu1 %v5349_v31  ;;  %4740 = vmatprep.mubr.msk.bf16.mxu1 %vm368_vm0, %v5352_v48  ;;  %v5397_v31 = vld [vmem:[%s5559_s4 + $0x78] sm:$0xff]  }
  0x56   : > { %4900 = vmatprep.mubr.msk.bf16.mxu0 %vm368_vm0, %v5353_v49  ;;  %4770 = vmatprep.subr.bf16.mxu1 %v5367_v50  ;;  %v5416_v48 = vld [vmem:[%s5559_s4 + $0x298] sm:$0xff]   ;;  %v5417_v49 = vld [vmem:[%s5559_s4 + $0x150] sm:$0xff]  }
  0x59   : > { %4771 = vmatpush3.bf16.msra.mxu1 %v5367_v50  ;;  %v5418_v50 = vld [vmem:[%s5559_s4 + $0x88] sm:$0xff]  }
  0x5a   : > { %4804 = vmatprep.subr.bf16.mxu1 %v5664_v54 }
  0x5c   : > { %4741 = vmatmul.mubr.msk.bf16.gmra.mrb[4].mxu1 %vm368_vm0, %v5354_v51  ;;  %4901 = vmatmul.mubr.msk.bf16.gmra.mrb[20].mxu0 %vm368_vm0, %v5355_v52  ;;  %v5419_v51 = vld [vmem:[%s5559_s4 + $0x158] sm:$0xff]   ;;  %v5420_v52 = vld [vmem:[%s5559_s4 + $0x90] sm:$0xff]  }
  0x5d   : > { %4744 = vmatprep.mubr.msk.bf16.mxu1 %vm368_vm0, %v5356_v53  ;;  %4904 = vmatprep.mubr.msk.bf16.mxu0 %vm368_vm0, %v5357_v55  ;;  %v5421_v53 = vld [vmem:[%s5559_s4 + $0x160] sm:$0xff]   ;;  %v5424_v55 = vld [vmem:[%s5559_s4 + $0x168] sm:$0xff]  }
  0x64   : > { %4745 = vmatmul.mubr.msk.bf16.gmra.mrb[8].mxu1 %vm368_vm0, %v5358_v56  ;;  %4905 = vmatmul.mubr.msk.bf16.gmra.mrb[24].mxu0 %vm368_vm0, %v5359_v57  ;;  %v5467_v56 = vld [vmem:[%s6038_s1 + $0x40] sm:$0xff]   ;;  %v5468_v57 = vld [vmem:[%s6038_s1 + $0x48] sm:$0xff]  }
  0x65   : > { %4748 = vmatprep.mubr.msk.bf16.mxu1 %vm368_vm0, %v5360_v58  ;;  %4908 = vmatprep.mubr.msk.bf16.mxu0 %vm368_vm0, %v5361_v59  ;;  %v5425_v58 = vld [vmem:[%s5559_s4 + $0xa0] sm:$0xff]   ;;  %v5426_v59 = vld [vmem:[%s5559_s4 + $0x170] sm:$0xff]  }
  0x6c   : > { %4749 = vmatmul.mubr.msk.bf16.gmra.mrb[12].mxu1 %vm368_vm0, %v5362_v60  ;;  %4909 = vmatmul.mubr.msk.bf16.gmra.mrb[28].mxu0 %vm368_vm0, %v5363_v61  ;;  %v5427_v60 = vld [vmem:[%s5559_s4 + $0xa8] sm:$0xff]   ;;  %v5428_v61 = vld [vmem:[%s5559_s4 + $0x178] sm:$0xff]  }
  0x6d   : > { %4752 = vmatprep.mubr.msk.bf16.mxu1 %vm368_vm0, %v5364_v62  ;;  %4916 = vmatprep.mubr.msk.bf16.mxu0 %vm368_vm0, %v5365_v63  ;;  %v5429_v62 = vld [vmem:[%s5559_s4 + $0xb0] sm:$0xff]   ;;  %v5430_v63 = vld [vmem:[%s5559_s4 + $0x180] sm:$0xff]  }
  0x74   : > { %4753 = vmatmul.mubr.msk.bf16.gmra.mrb[16].mxu1 %vm368_vm0, %v5366_v0  ;;  %4917 = vmatmul.mubr.msk.bf16.vlgmr.msra.gmra.mrb[0].mxu0 %vm368_vm0, %v5368_v2  ;;  %v5431_v0 = vld [vmem:[%s5559_s4 + $0xb8] sm:$0xff]   ;;  %v5432_v2 = vld [vmem:[%s5559_s4 + $0x188] sm:$0xff]  }
  0x75   : > { %4756 = vmatprep.mubr.msk.bf16.mxu1 %vm368_vm0, %v5370_v3  ;;  %4949 = vmatpush3.bf16.msra.mxu0 %v5369_v44  ;;  %v5412_v44 = vld [vmem:[%s5559_s4 + $0x288] sm:$0xff]   ;;  %v5433_v3 = vld [vmem:[%s5559_s4 + $0xc0] sm:$0xff]  }
  0x76   : > { %4920 = vmatprep.mubr.msk.bf16.mxu0 %vm368_vm0, %v5371_v4  ;;  %4950 = vmatprep.subr.bf16.mxu0 %v5387_v5  ;;  %v5434_v4 = vld [vmem:[%s5559_s4 + $0x190] sm:$0xff]  }
  0x79   : > { %4951 = vmatpush3.bf16.msra.mxu0 %v5387_v5  ;;  %v5435_v5 = vld [vmem:[%s5559_s4 + $0xc8] sm:$0xff]  }
  0x7a   : > { %4984 = vmatprep.subr.bf16.mxu0 %v5703_v7 }
  0x7c   : > { %4757 = vmatmul.mubr.msk.bf16.gmra.mrb[20].mxu1 %vm368_vm0, %v5372_v6  ;;  %4921 = vmatmul.mubr.msk.bf16.gmra.mrb[4].mxu0 %vm368_vm0, %v5373_v8  ;;  %v5436_v6 = vld [vmem:[%s5559_s4 + $0x228] sm:$0xff]   ;;  %v5438_v8 = vld [vmem:[%s5559_s4 + $0x230] sm:$0xff]  }
  0x7d   : > { %4760 = vmatprep.mubr.msk.bf16.mxu1 %vm368_vm0, %v5374_v9  ;;  %4924 = vmatprep.mubr.msk.bf16.mxu0 %vm368_vm0, %v5375_v10  ;;  %v5439_v9 = vld [vmem:[%s5559_s4 + $0xd8] sm:$0xff]  }
  0x7e   : > { %v5440_v10 = vld [vmem:[%s5559_s4 + $0x238] sm:$0xff]  }
  0x84   : > { %4761 = vmatmul.mubr.msk.bf16.gmra.mrb[24].mxu1 %vm368_vm0, %v5376_v11  ;;  %4925 = vmatmul.mubr.msk.bf16.gmra.mrb[8].mxu0 %vm368_vm0, %v5377_v12  ;;  %v5441_v11 = vld [vmem:[%s5559_s4 + $0xe0] sm:$0xff]  }
  0x85   : > { %4764 = vmatprep.mubr.msk.bf16.mxu1 %vm368_vm0, %v5378_v13  ;;  %4928 = vmatprep.mubr.msk.bf16.mxu0 %vm368_vm0, %v5379_v14  ;;  %v5442_v12 = vld [vmem:[%s5559_s4 + $0x240] sm:$0xff]   ;;  %v5443_v13 = vld [vmem:[%s5559_s4 + $0xe8] sm:$0xff]  }
  0x86   : > { %v5444_v14 = vld [vmem:[%s5559_s4 + $0x248] sm:$0xff]  }
  0x8c   : > { %4765 = vmatmul.mubr.msk.bf16.gmra.mrb[28].mxu1 %vm368_vm0, %v5380_v15  ;;  %4929 = vmatmul.mubr.msk.bf16.gmra.mrb[12].mxu0 %vm368_vm0, %v5381_v16  ;;  %v5445_v15 = vld [vmem:[%s5559_s4 + $0xf0] sm:$0xff]  }
  0x8d   : > { %4772 = vmatprep.mubr.msk.bf16.mxu1 %vm368_vm0, %v5382_v17  ;;  %4932 = vmatprep.mubr.msk.bf16.mxu0 %vm368_vm0, %v5383_v18  ;;  %v5446_v16 = vld [vmem:[%s5559_s4 + $0x250] sm:$0xff]   ;;  %v5447_v17 = vld [vmem:[%s5559_s4 + $0xf8] sm:$0xff]  }
  0x8e   : > { %v5448_v18 = vld [vmem:[%s5559_s4 + $0x258] sm:$0xff]  }
  0x94   : > { %4773 = vmatmul.mubr.msk.bf16.vlgmr.msra.gmra.mrb[0].mxu1 %vm368_vm0, %v5384_v19  ;;  %4933 = vmatmul.mubr.msk.bf16.gmra.mrb[16].mxu0 %vm368_vm0, %v5386_v20  ;;  %v5449_v19 = vld [vmem:[%s5559_s4 + $0x100] sm:$0xff]  }
  0x95   : > { %4805 = vmatpush3.bf16.msra.mxu1 %v5664_v54  ;;  %4776 = vmatprep.mubr.msk.bf16.mxu1 %vm368_vm0, %v5388_v21  ;;  %v5423_v54 = vld [vmem:[%s5559_s4 + $0x98] sm:$0xff]   ;;  %v5450_v20 = vld [vmem:[%s5559_s4 + $0x260] sm:$0xff]  }
  0x96   : > { %4936 = vmatprep.mubr.msk.bf16.mxu0 %vm368_vm0, %v5389_v22  ;;  %4806 = vmatprep.subr.bf16.mxu1 %v5403_v23  ;;  %v5451_v21 = vld [vmem:[%s5559_s4 + $0x1d8] sm:$0xff]   ;;  %v5452_v22 = vld [vmem:[%s5559_s4 + $0x268] sm:$0xff]  }
  0x99   : > { %4807 = vmatpush3.bf16.msra.mxu1 %v5403_v23  ;;  %v5453_v23 = vld [vmem:[%s5559_s4 + $0x1e0] sm:$0xff]  }
  0x9a   : > { %5020 = vmatprep.subr.bf16.mxu1 %v5537_v1  ;;  %v5398_v1 = vld [vmem:[%s5559_s4 + $0x258] sm:$0xff]  }
  0x9c   : > { %4777 = vmatmul.mubr.msk.bf16.gmra.mrb[4].mxu1 %vm368_vm0, %v5390_v24  ;;  %4937 = vmatmul.mubr.msk.bf16.gmra.mrb[20].mxu0 %vm368_vm0, %v5391_v25  ;;  %v5454_v24 = vld [vmem:[%s5559_s4 + $0x270] sm:$0xff]   ;;  %v5455_v25 = vld [vmem:[%s5559_s4 + $0x1e8] sm:$0xff]  }
  0x9d   : > { %4780 = vmatprep.mubr.msk.bf16.mxu1 %vm368_vm0, %v5392_v26  ;;  %4940 = vmatprep.mubr.msk.bf16.mxu0 %vm368_vm0, %v5393_v27  ;;  %v5456_v26 = vld [vmem:[%s5559_s4 + $0x278] sm:$0xff]   ;;  %v5457_v27 = vld [vmem:[%s5559_s4 + $0x1f0] sm:$0xff]  }
  0xa4   : > { %4781 = vmatmul.mubr.msk.bf16.gmra.mrb[8].mxu1 %vm368_vm0, %v5394_v28  ;;  %4941 = vmatmul.mubr.msk.bf16.gmra.mrb[24].mxu0 %vm368_vm0, %v5395_v29  ;;  %v5458_v28 = vld [vmem:[%s5559_s4 + $0x280] sm:$0xff]   ;;  %v5459_v29 = vld [vmem:[%s5559_s4 + $0x1f8] sm:$0xff]  }
  0xa5   : > { %4784 = vmatprep.mubr.msk.bf16.mxu1 %vm368_vm0, %v5396_v30  ;;  %4944 = vmatprep.mubr.msk.bf16.mxu0 %vm368_vm0, %v5397_v31  ;;  %v5460_v30 = vld [vmem:[%s5559_s4 + $0x288] sm:$0xff]   ;;  %v5461_v31 = vld [vmem:[%s5559_s4 + $0x200] sm:$0xff]  }
  0xac   : > { %4785 = vmatmul.mubr.msk.bf16.gmra.mrb[12].mxu1 %vm368_vm0, %v5398_v1  ;;  %4945 = vmatmul.mubr.msk.bf16.gmra.mrb[28].mxu0 %vm368_vm0, %v5399_v32  ;;  %v5462_v1 = vld [vmem:[%s5559_s4 + $0x290] sm:$0xff]   ;;  %v5463_v32 = vld [vmem:[%s5559_s4 + $0x208] sm:$0xff]  }
  0xad   : > { %4788 = vmatprep.mubr.msk.bf16.mxu1 %vm368_vm0, %v5400_v33  ;;  %4952 = vmatprep.mubr.msk.bf16.mxu0 %vm368_vm0, %v5401_v34  ;;  %v5464_v33 = vld [vmem:[%s5559_s4 + $0x298] sm:$0xff]   ;;  %v5465_v34 = vld [vmem:[%s5559_s4 + $0x210] sm:$0xff]  }
  0xb4   : > { %4789 = vmatmul.mubr.msk.bf16.gmra.mrb[16].mxu1 %vm368_vm0, %v5402_v35  ;;  %4953 = vmatmul.mubr.msk.bf16.vlgmr.msra.gmra.mrb[0].mxu0 %vm368_vm0, %v5404_v36  ;;  %v5466_v35 = vld [vmem:[%s5559_s4 + $0x2a0] sm:$0xff]  }
  0xb5   : > { %4792 = vmatprep.mubr.msk.bf16.mxu1 %vm368_vm0, %v5406_v37  ;;  %4985 = vmatpush3.bf16.msra.mxu0 %v5703_v7  ;;  %v5437_v7 = vld [vmem:[%s5559_s4 + $0xd0] sm:$0xff]  }
  0xb6   : > { %4956 = vmatprep.mubr.msk.bf16.mxu0 %vm368_vm0, %v5407_v38  ;;  %4986 = vmatprep.subr.bf16.mxu0 %v5422_v39 }
  0xb9   : > { %4987 = vmatpush3.bf16.msra.mxu0 %v5422_v39 }
  0xbc   : > { %4793 = vmatmul.mubr.msk.bf16.gmra.mrb[20].mxu1 %vm368_vm0, %v5408_v40  ;;  %4957 = vmatmul.mubr.msk.bf16.gmra.mrb[4].mxu0 %vm368_vm0, %v5409_v41 }
  0xbd   : > { %4796 = vmatprep.mubr.msk.bf16.mxu1 %vm368_vm0, %v5410_v42  ;;  %4960 = vmatprep.mubr.msk.bf16.mxu0 %vm368_vm0, %v5411_v43 }
  0xc4   : > { %4797 = vmatmul.mubr.msk.bf16.gmra.mrb[24].mxu1 %vm368_vm0, %v5412_v44  ;;  %4961 = vmatmul.mubr.msk.bf16.gmra.mrb[8].mxu0 %vm368_vm0, %v5413_v45 }
  0xc5   : > { %4800 = vmatprep.mubr.msk.bf16.mxu1 %vm368_vm0, %v5414_v46  ;;  %4964 = vmatprep.mubr.msk.bf16.mxu0 %vm368_vm0, %v5415_v47 }
  0xcc   : > { %4801 = vmatmul.mubr.msk.bf16.gmra.mrb[28].mxu1 %vm368_vm0, %v5416_v48  ;;  %4965 = vmatmul.mubr.msk.bf16.gmra.mrb[12].mxu0 %vm368_vm0, %v5417_v49 }
  0xcd   : > { %4808 = vmatprep.mubr.msk.bf16.mxu1 %vm368_vm0, %v5418_v50  ;;  %4968 = vmatprep.mubr.msk.bf16.mxu0 %vm368_vm0, %v5419_v51 }
  0xd4   : > { %4809 = vmatmul.mubr.msk.bf16.vlgmr.msra.gmra.mrb[0].mxu1 %vm368_vm0, %v5420_v52  ;;  %4969 = vmatmul.mubr.msk.bf16.gmra.mrb[16].mxu0 %vm368_vm0, %v5421_v53  ;;  %v5917_v53 = vld [vmem:[%s6039_s2] ss:$0 sm:$0xff] }
  0xd5   : > { %5022 = vmatpush3.bf16.msra.mxu1 %v5467_v56  ;;  %4812 = vmatprep.mubr.msk.bf16.mxu1 %vm368_vm0, %v5423_v54 }
  0xd6   : > { %4972 = vmatprep.mubr.msk.bf16.mxu0 %vm368_vm0, %v5424_v55  ;;  %5021 = vmatprep.subr.bf16.mxu1 %v5468_v57 }
  0xd9   : > { %5023 = vmatpush3.bf16.msra.mxu1 %v5468_v57 }
  0xdc   : > { %4813 = vmatmul.mubr.msk.bf16.gmra.mrb[4].mxu1 %vm368_vm0, %v5425_v58  ;;  %4973 = vmatmul.mubr.msk.bf16.gmra.mrb[20].mxu0 %vm368_vm0, %v5426_v59 }
  0xdd   : > { %4816 = vmatprep.mubr.msk.bf16.mxu1 %vm368_vm0, %v5427_v60  ;;  %4976 = vmatprep.mubr.msk.bf16.mxu0 %vm368_vm0, %v5428_v61 }
  0xe4   : > { %4817 = vmatmul.mubr.msk.bf16.gmra.mrb[8].mxu1 %vm368_vm0, %v5429_v62  ;;  %4977 = vmatmul.mubr.msk.bf16.gmra.mrb[24].mxu0 %vm368_vm0, %v5430_v63 }
  0xe5   : > { %4820 = vmatprep.mubr.msk.bf16.mxu1 %vm368_vm0, %v5431_v0  ;;  %4980 = vmatprep.mubr.msk.bf16.mxu0 %vm368_vm0, %v5432_v2 }
  0xec   : > { %4821 = vmatmul.mubr.msk.bf16.gmra.mrb[12].mxu1 %vm368_vm0, %v5433_v3  ;;  %4981 = vmatmul.mubr.msk.bf16.gmra.mrb[28].mxu0 %vm368_vm0, %v5434_v4 }
  0xed   : > { %4824 = vmatprep.mubr.msk.bf16.mxu1 %vm368_vm0, %v5435_v5  ;;  %4988 = vmatprep.mubr.msk.bf16.mxu0 %vm368_vm0, %v5436_v6 }
  0xf4   : > { %4825 = vmatmul.mubr.msk.bf16.gmra.mrb[16].mxu1 %vm368_vm0, %v5437_v7  ;;  %4989 = vmatmul.mubr.msk.bf16.vlgmr.msra.gmra.mrb[0].mxu0 %vm368_vm0, %v5438_v8 }
  0xf5   : > { %4828 = vmatprep.mubr.msk.bf16.mxu1 %vm368_vm0, %v5439_v9  ;;  %4992 = vmatprep.mubr.msk.bf16.mxu0 %vm368_vm0, %v5440_v10 }
  0xfc   : > { %4829 = vmatmul.mubr.msk.bf16.gmra.mrb[20].mxu1 %vm368_vm0, %v5441_v11  ;;  %4993 = vmatmul.mubr.msk.bf16.gmra.mrb[4].mxu0 %vm368_vm0, %v5442_v12 }
  0xfd   : > { %4832 = vmatprep.mubr.msk.bf16.mxu1 %vm368_vm0, %v5443_v13  ;;  %4996 = vmatprep.mubr.msk.bf16.mxu0 %vm368_vm0, %v5444_v14 }
 0x104   : > { %4833 = vmatmul.mubr.msk.bf16.gmra.mrb[24].mxu1 %vm368_vm0, %v5445_v15  ;;  %4997 = vmatmul.mubr.msk.bf16.gmra.mrb[8].mxu0 %vm368_vm0, %v5446_v16 }
 0x105   : > { %4836 = vmatprep.mubr.msk.bf16.mxu1 %vm368_vm0, %v5447_v17  ;;  %5000 = vmatprep.mubr.msk.bf16.mxu0 %vm368_vm0, %v5448_v18 }
 0x10c   : > { %4837 = vmatmul.mubr.msk.bf16.gmra.mrb[28].mxu1 %vm368_vm0, %v5449_v19  ;;  %5001 = vmatmul.mubr.msk.bf16.gmra.mrb[12].mxu0 %vm368_vm0, %v5450_v20 }
 0x10d   : > { %4860 = vmatprep.mubr.msk.bf16.mxu1 %vm368_vm0, %v5451_v21  ;;  %5004 = vmatprep.mubr.msk.bf16.mxu0 %vm368_vm0, %v5452_v22 }
 0x114   : > { %4861 = vmatmul.mubr.msk.bf16.vlgmr.msra.gmra.mrb[16].mxu1 %vm368_vm0, %v5453_v23  ;;  %5005 = vmatmul.mubr.msk.bf16.gmra.mrb[16].mxu0 %vm368_vm0, %v5454_v24 }
 0x115   : > { %4864 = vmatprep.mubr.msk.bf16.mxu1 %vm368_vm0, %v5455_v25  ;;  %5008 = vmatprep.mubr.msk.bf16.mxu0 %vm368_vm0, %v5456_v26 }
 0x11c   : > { %4865 = vmatmul.mubr.msk.bf16.gmra.mrb[20].mxu1 %vm368_vm0, %v5457_v27  ;;  %5009 = vmatmul.mubr.msk.bf16.gmra.mrb[20].mxu0 %vm368_vm0, %v5458_v28 }
 0x11d   : > { %4868 = vmatprep.mubr.msk.bf16.mxu1 %vm368_vm0, %v5459_v29  ;;  %5012 = vmatprep.mubr.msk.bf16.mxu0 %vm368_vm0, %v5460_v30 }
 0x124   : > { %4869 = vmatmul.mubr.msk.bf16.gmra.mrb[24].mxu1 %vm368_vm0, %v5461_v31  ;;  %5013 = vmatmul.mubr.msk.bf16.gmra.mrb[24].mxu0 %vm368_vm0, %v5462_v1 }
 0x125   : > { %4872 = vmatprep.mubr.msk.bf16.mxu1 %vm368_vm0, %v5463_v32  ;;  %5016 = vmatprep.mubr.msk.bf16.mxu0 %vm368_vm0, %v5464_v33 }
 0x12c   : > { %4873 = vmatmul.mubr.msk.bf16.gmra.mrb[28].mxu1 %vm368_vm0, %v5465_v34  ;;  %5017 = vmatmul.mubr.msk.bf16.gmra.mrb[28].mxu0 %vm368_vm0, %v5466_v35 }
 0x1a7   : > { %v4810_v36 = vpop.f32.mrb[0].mxu1 }
 0x1a8   : > { %v1466_v37 = vpop.f32.mrb[1].mxu1 }
 0x1a9   : > { %v4811_v38 = vpop.f32.mrb[2].mxu1 }
 0x1aa   : > { %v1469_v39 = vpop.f32.mrb[3].mxu1 }
 0x1af   : > { %v4814_v40 = vpop.f32.mrb[4].mxu1 }
 0x1b0   : > { %v1482_v41 = vpop.f32.mrb[5].mxu1 }
 0x1b1   : > { %v4815_v42 = vpop.f32.mrb[6].mxu1 }
 0x1b2   : > { %v1485_v43 = vpop.f32.mrb[7].mxu1 }
 0x1b7   : > { %v4818_v44 = vpop.f32.mrb[8].mxu1 }
 0x1b8   : > { %v5900_v45 = vpop.f32.mrb[9].mxu1 }
 0x1b9   : > { %v5902_v46 = vpop.f32.mrb[10].mxu1 }
 0x1ba   : > { %v5904_v47 = vpop.f32.mrb[11].mxu1 }
 0x1bf   : > { %v5906_v48 = vpop.f32.mrb[12].mxu1 }
 0x1c0   : > { %v5908_v49 = vpop.f32.mrb[13].mxu1 }
 0x1c1   : > { %v5910_v50 = vpop.f32.mrb[14].mxu1 }
 0x1c2   : > { %v5912_v51 = vpop.f32.mrb[15].mxu1 }
 0x1c7   : > { %v4990_v52 = vpop.f32.mrb[0].mxu0 }
 0x1c8   : > { %v5024_v54 = vadd.f32 %v4990_v52, %v4810_v36  ;;  %v3333_v55 = vpop.f32.mrb[1].mxu0 }
 0x1c9   : > { %v5025_v56 = vadd.f32 %v3333_v55, %v1466_v37  ;;  %v4991_v57 = vpop.f32.mrb[2].mxu0 }
 0x1ca   : > { %v3501_v58 = vadd.f32 %v5024_v54, %v5917_v53  ;;  %v5026_v59 = vadd.f32 %v4991_v57, %v4811_v38  ;;  %v3336_v60 = vpop.f32.mrb[3].mxu0 }
 0x1cb   : > { %v3499_v61 = vadd.f32 %v5025_v56, %v5917_v53  ;;  %v5027_v62 = vadd.f32 %v3336_v60, %v1469_v39 }
 0x1cc   : > { %v3533_v63 = vmul.f32 0.01, %v3501_v58  ;;  %v3502_v0 = vadd.f32 %v5026_v59, %v5917_v53 }
 0x1cd   : > { %v3531_v2 = vmul.f32 0.01, %v3499_v61  ;;  %v3500_v3 = vadd.f32 %v5027_v62, %v5917_v53 }
 0x1ce   : > { %v3565_v4 = vmax.f32 %v3501_v58, %v3533_v63  ;;  %v3534_v5 = vmul.f32 0.01, %v3502_v0 }
 0x1cf   : > { %v3563_v6 = vmax.f32 %v3499_v61, %v3531_v2  ;;  %v3532_v7 = vmul.f32 0.01, %v3500_v3  ;;  %v4994_v8 = vpop.f32.mrb[4].mxu0 }
 0x1d0   : > { %v4504_v9 = vpack.c.bf16 %v3565_v4, %v3565_v4  ;;  %v3566_v10 = vmax.f32 %v3502_v0, %v3534_v5  ;;  %v5028_v11 = vadd.f32 %v4994_v8, %v4814_v40  ;;  %v3349_v12 = vpop.f32.mrb[5].mxu0 }
 0x1d1   : > { %v4502_v13 = vpack.c.bf16 %v3563_v6, %v3563_v6  ;;  %v3564_v14 = vmax.f32 %v3500_v3, %v3532_v7  ;;  %v5029_v15 = vadd.f32 %v3349_v12, %v1482_v41  ;;  %v4995_v16 = vpop.f32.mrb[6].mxu0 }
 0x1d2   : > { %3726 = vst.msk [vmem:[%s5927_s19 + $0x8] sm:$0xf] %vm3723_vm1, %v4504_v9  ;;  %v4505_v17 = vpack.c.bf16 %v3566_v10, %v3566_v10  ;;  %v3505_v18 = vadd.f32 %v5028_v11, %v5917_v53  ;;  %v5030_v19 = vadd.f32 %v4995_v16, %v4815_v42  ;;  %v3352_v20 = vpop.f32.mrb[7].mxu0 }
 0x1d3   : > { %3724 = vst.msk [vmem:[%s5927_s19] sm:$0xf] %vm3723_vm1, %v4502_v13  ;;  %v4503_v21 = vpack.c.bf16 %v3564_v14, %v3564_v14  ;;  %v3503_v22 = vadd.f32 %v5029_v15, %v5917_v53  ;;  %v5031_v23 = vadd.f32 %v3352_v20, %v1485_v43 }
 0x1d4   : > { %3727 = vst.msk [vmem:[%s5927_s19 + $0xc] sm:$0xf] %vm3723_vm1, %v4505_v17  ;;  %v3537_v24 = vmul.f32 0.01, %v3505_v18  ;;  %v3506_v25 = vadd.f32 %v5030_v19, %v5917_v53 }
 0x1d5   : > { %3725 = vst.msk [vmem:[%s5927_s19 + $0x4] sm:$0xf] %vm3723_vm1, %v4503_v21  ;;  %v3535_v26 = vmul.f32 0.01, %v3503_v22  ;;  %v3504_v27 = vadd.f32 %v5031_v23, %v5917_v53 }
 0x1d6   : > { %v3569_v28 = vmax.f32 %v3505_v18, %v3537_v24  ;;  %v3538_v29 = vmul.f32 0.01, %v3506_v25 }
 0x1d7   : > { %v3567_v30 = vmax.f32 %v3503_v22, %v3535_v26  ;;  %v3536_v31 = vmul.f32 0.01, %v3504_v27  ;;  %v4998_v1 = vpop.f32.mrb[8].mxu0 }
 0x1d8   : > { %v4508_v32 = vpack.c.bf16 %v3569_v28, %v3569_v28  ;;  %v3570_v33 = vmax.f32 %v3506_v25, %v3538_v29  ;;  %v5032_v34 = vadd.f32 %v4998_v1, %v4818_v44  ;;  %v3365_v35 = vpop.f32.mrb[9].mxu0 }
 0x1d9   : > { %v4506_v36 = vpack.c.bf16 %v3567_v30, %v3567_v30  ;;  %v3568_v37 = vmax.f32 %v3504_v27, %v3536_v31  ;;  %v5033_v38 = vadd.f32 %v3365_v35, %v5900_v45  ;;  %v4999_v39 = vpop.f32.mrb[10].mxu0 }
 0x1da   : > { %3730 = vst.msk [vmem:[%s5927_s19 + $0x18] sm:$0xf] %vm3723_vm1, %v4508_v32  ;;  %v4509_v40 = vpack.c.bf16 %v3570_v33, %v3570_v33  ;;  %v3509_v41 = vadd.f32 %v5032_v34, %v5917_v53  ;;  %v5034_v42 = vadd.f32 %v4999_v39, %v5902_v46  ;;  %v3368_v43 = vpop.f32.mrb[11].mxu0 }
 0x1db   : > { %3728 = vst.msk [vmem:[%s5927_s19 + $0x10] sm:$0xf] %vm3723_vm1, %v4506_v36  ;;  %v4507_v52 = vpack.c.bf16 %v3568_v37, %v3568_v37  ;;  %v3507_v44 = vadd.f32 %v5033_v38, %v5917_v53  ;;  %v5035_v54 = vadd.f32 %v3368_v43, %v5904_v47 }
 0x1dc   : > { %3731 = vst.msk [vmem:[%s5927_s19 + $0x1c] sm:$0xf] %vm3723_vm1, %v4509_v40  ;;  %v3541_v55 = vmul.f32 0.01, %v3509_v41  ;;  %v3510_v45 = vadd.f32 %v5034_v42, %v5917_v53 }
 0x1dd   : > { %3729 = vst.msk [vmem:[%s5927_s19 + $0x14] sm:$0xf] %vm3723_vm1, %v4507_v52  ;;  %v3539_v56 = vmul.f32 0.01, %v3507_v44  ;;  %v3508_v57 = vadd.f32 %v5035_v54, %v5917_v53 }
 0x1de   : > { %v3573_v46 = vmax.f32 %v3509_v41, %v3541_v55  ;;  %v3542_v58 = vmul.f32 0.01, %v3510_v45 }
 0x1df   : > { %v3571_v59 = vmax.f32 %v3507_v44, %v3539_v56  ;;  %v3540_v60 = vmul.f32 0.01, %v3508_v57  ;;  %v5002_v61 = vpop.f32.mrb[12].mxu0 }
 0x1e0   : > { %v4512_v62 = vpack.c.bf16 %v3573_v46, %v3573_v46  ;;  %v3574_v63 = vmax.f32 %v3510_v45, %v3542_v58  ;;  %v5036_v47 = vadd.f32 %v5002_v61, %v5906_v48  ;;  %v3381_v0 = vpop.f32.mrb[13].mxu0 }
 0x1e1   : > { %v4510_v2 = vpack.c.bf16 %v3571_v59, %v3571_v59  ;;  %v3572_v3 = vmax.f32 %v3508_v57, %v3540_v60  ;;  %v5037_v4 = vadd.f32 %v3381_v0, %v5908_v49  ;;  %v5003_v5 = vpop.f32.mrb[14].mxu0 }
 0x1e2   : > { %3734 = vst.msk [vmem:[%s5927_s19 + $0x28] sm:$0xf] %vm3723_vm1, %v4512_v62  ;;  %v4513_v6 = vpack.c.bf16 %v3574_v63, %v3574_v63  ;;  %v3513_v7 = vadd.f32 %v5036_v47, %v5917_v53  ;;  %v5038_v8 = vadd.f32 %v5003_v5, %v5910_v50  ;;  %v3384_v9 = vpop.f32.mrb[15].mxu0 }
 0x1e3   : > { %3732 = vst.msk [vmem:[%s5927_s19 + $0x20] sm:$0xf] %vm3723_vm1, %v4510_v2  ;;  %v4511_v10 = vpack.c.bf16 %v3572_v3, %v3572_v3  ;;  %v3511_v48 = vadd.f32 %v5037_v4, %v5917_v53  ;;  %v5039_v11 = vadd.f32 %v3384_v9, %v5912_v51 }
 0x1e4   : > { %3735 = vst.msk [vmem:[%s5927_s19 + $0x2c] sm:$0xf] %vm3723_vm1, %v4513_v6  ;;  %v3545_v12 = vmul.f32 0.01, %v3513_v7  ;;  %v3514_v49 = vadd.f32 %v5038_v8, %v5917_v53 }
 0x1e5   : > { %3733 = vst.msk [vmem:[%s5927_s19 + $0x24] sm:$0xf] %vm3723_vm1, %v4511_v10  ;;  %v3543_v13 = vmul.f32 0.01, %v3511_v48  ;;  %v3512_v14 = vadd.f32 %v5039_v11, %v5917_v53 }
 0x1e6   : > { %v3577_v15 = vmax.f32 %v3513_v7, %v3545_v12  ;;  %v3546_v50 = vmul.f32 0.01, %v3514_v49 }
 0x1e7   : > { %v4862_v16 = vpop.f32.mrb[16].mxu1  ;;  %v3575_v17 = vmax.f32 %v3511_v48, %v3543_v13  ;;  %v3544_v18 = vmul.f32 0.01, %v3512_v14  ;;  %v5006_v19 = vpop.f32.mrb[16].mxu0 }
 0x1e8   : > { %v1903_v20 = vpop.f32.mrb[17].mxu1  ;;  %v4516_v51 = vpack.c.bf16 %v3577_v15, %v3577_v15  ;;  %v3578_v21 = vmax.f32 %v3514_v49, %v3546_v50  ;;  %v5040_v22 = vadd.f32 %v5006_v19, %v4862_v16  ;;  %v3397_v23 = vpop.f32.mrb[17].mxu0 }
 0x1e9   : > { %v4863_v24 = vpop.f32.mrb[18].mxu1  ;;  %v4514_v25 = vpack.c.bf16 %v3575_v17, %v3575_v17  ;;  %v3576_v26 = vmax.f32 %v3512_v14, %v3544_v18  ;;  %v5041_v27 = vadd.f32 %v3397_v23, %v1903_v20  ;;  %v5007_v28 = vpop.f32.mrb[18].mxu0 }
 0x1ea   : > { %v1906_v29 = vpop.f32.mrb[19].mxu1  ;;  %3738 = vst.msk [vmem:[%s5927_s19 + $0x38] sm:$0xf] %vm3723_vm1, %v4516_v51  ;;  %v4517_v30 = vpack.c.bf16 %v3578_v21, %v3578_v21  ;;  %v3517_v31 = vadd.f32 %v5040_v22, %v5917_v53  ;;  %v5042_v1 = vadd.f32 %v5007_v28, %v4863_v24  ;;  %v3400_v32 = vpop.f32.mrb[19].mxu0 }
 0x1eb   : > { %3736 = vst.msk [vmem:[%s5927_s19 + $0x30] sm:$0xf] %vm3723_vm1, %v4514_v25  ;;  %v4515_v33 = vpack.c.bf16 %v3576_v26, %v3576_v26  ;;  %v3515_v34 = vadd.f32 %v5041_v27, %v5917_v53  ;;  %v5043_v35 = vadd.f32 %v3400_v32, %v1906_v29 }
 0x1ec   : > { %3739 = vst.msk [vmem:[%s5927_s19 + $0x3c] sm:$0xf] %vm3723_vm1, %v4517_v30  ;;  %v3549_v36 = vmul.f32 0.01, %v3517_v31  ;;  %v3518_v37 = vadd.f32 %v5042_v1, %v5917_v53 }
 0x1ed   : > { %3737 = vst.msk [vmem:[%s5927_s19 + $0x34] sm:$0xf] %vm3723_vm1, %v4515_v33  ;;  %v3547_v38 = vmul.f32 0.01, %v3515_v34  ;;  %v3516_v39 = vadd.f32 %v5043_v35, %v5917_v53 }
 0x1ee   : > { %v3581_v40 = vmax.f32 %v3517_v31, %v3549_v36  ;;  %v3550_v41 = vmul.f32 0.01, %v3518_v37 }
 0x1ef   : > { %v4866_v42 = vpop.f32.mrb[20].mxu1  ;;  %v3579_v43 = vmax.f32 %v3515_v34, %v3547_v38  ;;  %v3548_v52 = vmul.f32 0.01, %v3516_v39  ;;  %v5010_v44 = vpop.f32.mrb[20].mxu0 }
 0x1f0   : > { %v1919_v54 = vpop.f32.mrb[21].mxu1  ;;  %v4520_v55 = vpack.c.bf16 %v3581_v40, %v3581_v40  ;;  %v3582_v45 = vmax.f32 %v3518_v37, %v3550_v41  ;;  %v5044_v56 = vadd.f32 %v5010_v44, %v4866_v42  ;;  %v3413_v57 = vpop.f32.mrb[21].mxu0 }
 0x1f1   : > { %v4867_v46 = vpop.f32.mrb[22].mxu1  ;;  %v4518_v58 = vpack.c.bf16 %v3579_v43, %v3579_v43  ;;  %v3580_v59 = vmax.f32 %v3516_v39, %v3548_v52  ;;  %v5045_v60 = vadd.f32 %v3413_v57, %v1919_v54  ;;  %v5011_v61 = vpop.f32.mrb[22].mxu0 }
 0x1f2   : > { %v1922_v62 = vpop.f32.mrb[23].mxu1  ;;  %3742 = vst.msk [vmem:[%s5927_s19 + $0x48] sm:$0xf] %vm3723_vm1, %v4520_v55  ;;  %v4521_v63 = vpack.c.bf16 %v3582_v45, %v3582_v45  ;;  %v3521_v47 = vadd.f32 %v5044_v56, %v5917_v53  ;;  %v5046_v0 = vadd.f32 %v5011_v61, %v4867_v46  ;;  %v3416_v2 = vpop.f32.mrb[23].mxu0 }
 0x1f3   : > { %3740 = vst.msk [vmem:[%s5927_s19 + $0x40] sm:$0xf] %vm3723_vm1, %v4518_v58  ;;  %v4519_v3 = vpack.c.bf16 %v3580_v59, %v3580_v59  ;;  %v3519_v4 = vadd.f32 %v5045_v60, %v5917_v53  ;;  %v5047_v5 = vadd.f32 %v3416_v2, %v1922_v62 }
 0x1f4   : > { %3743 = vst.msk [vmem:[%s5927_s19 + $0x4c] sm:$0xf] %vm3723_vm1, %v4521_v63  ;;  %v3553_v6 = vmul.f32 0.01, %v3521_v47  ;;  %v3522_v7 = vadd.f32 %v5046_v0, %v5917_v53 }
 0x1f5   : > { %3741 = vst.msk [vmem:[%s5927_s19 + $0x44] sm:$0xf] %vm3723_vm1, %v4519_v3  ;;  %v3551_v8 = vmul.f32 0.01, %v3519_v4  ;;  %v3520_v9 = vadd.f32 %v5047_v5, %v5917_v53 }
 0x1f6   : > { %v3585_v10 = vmax.f32 %v3521_v47, %v3553_v6  ;;  %v3554_v48 = vmul.f32 0.01, %v3522_v7 }
 0x1f7   : > { %v4870_v11 = vpop.f32.mrb[24].mxu1  ;;  %v3583_v12 = vmax.f32 %v3519_v4, %v3551_v8  ;;  %v3552_v49 = vmul.f32 0.01, %v3520_v9  ;;  %v5014_v13 = vpop.f32.mrb[24].mxu0 }
 0x1f8   : > { %v1935_v14 = vpop.f32.mrb[25].mxu1  ;;  %v4524_v15 = vpack.c.bf16 %v3585_v10, %v3585_v10  ;;  %v3586_v50 = vmax.f32 %v3522_v7, %v3554_v48  ;;  %v5048_v16 = vadd.f32 %v5014_v13, %v4870_v11  ;;  %v3429_v17 = vpop.f32.mrb[25].mxu0 }
 0x1f9   : > { %v4871_v18 = vpop.f32.mrb[26].mxu1  ;;  %v4522_v19 = vpack.c.bf16 %v3583_v12, %v3583_v12  ;;  %v3584_v20 = vmax.f32 %v3520_v9, %v3552_v49  ;;  %v5049_v51 = vadd.f32 %v3429_v17, %v1935_v14  ;;  %v5015_v21 = vpop.f32.mrb[26].mxu0 }
 0x1fa   : > { %v1938_v22 = vpop.f32.mrb[27].mxu1  ;;  %3746 = vst.msk [vmem:[%s5927_s19 + $0x58] sm:$0xf] %vm3723_vm1, %v4524_v15  ;;  %v4525_v23 = vpack.c.bf16 %v3586_v50, %v3586_v50  ;;  %v3525_v24 = vadd.f32 %v5048_v16, %v5917_v53  ;;  %v5050_v25 = vadd.f32 %v5015_v21, %v4871_v18  ;;  %v3432_v26 = vpop.f32.mrb[27].mxu0 }
 0x1fb   : > { %3744 = vst.msk [vmem:[%s5927_s19 + $0x50] sm:$0xf] %vm3723_vm1, %v4522_v19  ;;  %v4523_v27 = vpack.c.bf16 %v3584_v20, %v3584_v20  ;;  %v3523_v28 = vadd.f32 %v5049_v51, %v5917_v53  ;;  %v5051_v29 = vadd.f32 %v3432_v26, %v1938_v22 }
 0x1fc   : > { %3747 = vst.msk [vmem:[%s5927_s19 + $0x5c] sm:$0xf] %vm3723_vm1, %v4525_v23  ;;  %v3557_v30 = vmul.f32 0.01, %v3525_v24  ;;  %v3526_v31 = vadd.f32 %v5050_v25, %v5917_v53 }
 0x1fd   : > { %3745 = vst.msk [vmem:[%s5927_s19 + $0x54] sm:$0xf] %vm3723_vm1, %v4523_v27  ;;  %v3555_v1 = vmul.f32 0.01, %v3523_v28  ;;  %v3524_v32 = vadd.f32 %v5051_v29, %v5917_v53 }
 0x1fe   : > { %v3589_v33 = vmax.f32 %v3525_v24, %v3557_v30  ;;  %v3558_v34 = vmul.f32 0.01, %v3526_v31 }
 0x1ff   : > { %v4874_v35 = vpop.f32.mrb[28].mxu1  ;;  %v3587_v36 = vmax.f32 %v3523_v28, %v3555_v1  ;;  %v3556_v37 = vmul.f32 0.01, %v3524_v32  ;;  %v5018_v38 = vpop.f32.mrb[28].mxu0 }
 0x200   : > { %v1951_v39 = vpop.f32.mrb[29].mxu1  ;;  %v4528_v40 = vpack.c.bf16 %v3589_v33, %v3589_v33  ;;  %v3590_v41 = vmax.f32 %v3526_v31, %v3558_v34  ;;  %v5052_v42 = vadd.f32 %v5018_v38, %v4874_v35  ;;  %v3445_v43 = vpop.f32.mrb[29].mxu0 }
 0x201   : > { %v4875_v52 = vpop.f32.mrb[30].mxu1  ;;  %v4526_v44 = vpack.c.bf16 %v3587_v36, %v3587_v36  ;;  %v3588_v54 = vmax.f32 %v3524_v32, %v3556_v37  ;;  %v5053_v55 = vadd.f32 %v3445_v43, %v1951_v39  ;;  %v5019_v45 = vpop.f32.mrb[30].mxu0 }
 0x202   : > { %v1954_v56 = vpop.f32.mrb[31].mxu1  ;;  %3750 = vst.msk [vmem:[%s5927_s19 + $0x68] sm:$0xf] %vm3723_vm1, %v4528_v40  ;;  %v4529_v57 = vpack.c.bf16 %v3590_v41, %v3590_v41  ;;  %v3529_v46 = vadd.f32 %v5052_v42, %v5917_v53  ;;  %v5054_v58 = vadd.f32 %v5019_v45, %v4875_v52  ;;  %v3448_v59 = vpop.f32.mrb[31].mxu0 }
 0x203   : > { %3748 = vst.msk [vmem:[%s5927_s19 + $0x60] sm:$0xf] %vm3723_vm1, %v4526_v44  ;;  %v4527_v60 = vpack.c.bf16 %v3588_v54, %v3588_v54  ;;  %v3527_v61 = vadd.f32 %v5053_v55, %v5917_v53  ;;  %v5055_v62 = vadd.f32 %v3448_v59, %v1954_v56 }
 0x204   : > { %3751 = vst.msk [vmem:[%s5927_s19 + $0x6c] sm:$0xf] %vm3723_vm1, %v4529_v57  ;;  %v3561_v63 = vmul.f32 0.01, %v3529_v46  ;;  %v3530_v47 = vadd.f32 %v5054_v58, %v5917_v53 }
 0x205   : > { %3749 = vst.msk [vmem:[%s5927_s19 + $0x64] sm:$0xf] %vm3723_vm1, %v4527_v60  ;;  %v3559_v0 = vmul.f32 0.01, %v3527_v61  ;;  %v3528_v2 = vadd.f32 %v5055_v62, %v5917_v53 }
 0x206   : > { %v3593_v3 = vmax.f32 %v3529_v46, %v3561_v63  ;;  %v3562_v4 = vmul.f32 0.01, %v3530_v47 }
 0x207   : > { %v3591_v5 = vmax.f32 %v3527_v61, %v3559_v0  ;;  %v3560_v6 = vmul.f32 0.01, %v3528_v2 }
 0x208   : > { %v4532_v7 = vpack.c.bf16 %v3593_v3, %v3593_v3  ;;  %v3594_v8 = vmax.f32 %v3530_v47, %v3562_v4 }
 0x209   : > { %v4530_v9 = vpack.c.bf16 %v3591_v5, %v3591_v5  ;;  %v3592_v10 = vmax.f32 %v3528_v2, %v3560_v6 }
 0x20a   : > { %3754 = vst.msk [vmem:[%s5927_s19 + $0x78] sm:$0xf] %vm3723_vm1, %v4532_v7  ;;  %v4533_v48 = vpack.c.bf16 %v3594_v8, %v3594_v8 }
 0x20b   : > { %3752 = vst.msk [vmem:[%s5927_s19 + $0x70] sm:$0xf] %vm3723_vm1, %v4530_v9  ;;  %v4531_v11 = vpack.c.bf16 %v3592_v10, %v3592_v10 }
 0x20c   : > { %3755 = vst.msk [vmem:[%s5927_s19 + $0x7c] sm:$0xf] %vm3723_vm1, %v4533_v48 }
 0x20d   : > { %3753 = vst.msk [vmem:[%s5927_s19 + $0x74] sm:$0xf] %vm3723_vm1, %v4531_v11 }
 0x20e PF: > { %s13_s14 = sadd.s32 1, %s5491_s14   ;;  %s6041_s12 = smov %s5487_s13 }
 0x20f   : > { %p10_p5 = scmp.ge.s32.totalorder %s13_s14, 4   ;;  %s6042_s13 = smov %s6044_s15 }
 0x211   :  { %12 = sbr.rel (!%p10_p5) target bundleno = 2 (0x2), region = 79 }

// kernel: forward.8
= control target key start
LH: loop header
LB: loop body
LE: loop exit
PB: predicated region body
PF: predicated region fallthrough
CT: control target
= control target key end

     0   :  { %s2397_s12 = smov 0   ;;  %s2399_s13 = smov 0   ;;  %s2627_s0 = inlined_call_operand.vmem [shape: bf16[2,6,72,64], index: 0, kind: input, shape index: {}]   ;;  %s2628_s1 = inlined_call_operand.vmem [shape: bf16[9,64,64], index: 1, kind: input, shape index: {}]   ;;  %s2629_s2 = inlined_call_operand.vmem [shape: f32[1,64], index: 2, kind: input, shape index: {}]   ;;  %s2630_s3 = inlined_call_operand.vmem [shape: bf16[2,64,64], index: 3, kind: output, shape index: {}]  }
   0x1   :  { %s2401_s14 = smov 0  }
   0x2 LB: > { %s25_s15 = sadd.s32 1, %s2371_s13  ;;  %p1706_p0 = scmp.ge.s32.totalorder %s2375_s14, 1  ;;  %s2375_s14 = sphi %s2401_s14, %s13_s14   ;;  %s2371_s13 = sphi %s2399_s13, %s2632_s13   ;;  %s2367_s12 = sphi %s2397_s12, %s2631_s12  }
   0x3   : > { %p27_p1 = scmp.ge.s32.totalorder %s25_s15, 2  ;;  %p151_p2 = scmp.lt.s32.totalorder %s2375_s14, 3 }
   0x5   : > { %s2634_s15 = smov (%p27_p1, %s25_s15), 0  ;;  %p152_p3 = pnand %p1706_p0, %p151_p2 }
   0x6   : > { %v2281_v0 = vld [vmem:[%s2628_s1 + $0x20] sm:$0xff] (!%p152_p3)   ;;  %p179_p4 = scmp.lt.s32.totalorder (!%p152_p3), %s2367_s12, 1  ;;  %v2283_v2 = vld [vmem:[%s2628_s1 + $0x28] sm:$0xff] (!%p152_p3)   ;;  %v2285_v4 = vld [vmem:[%s2628_s1 + $0x30] sm:$0xff] (!%p152_p3)   ;;  %vm280_vm0 = vcmask (!%p152_p3), 523264   ;;  %vm1587_vm1 = vcmask (!%p152_p3), 519168  }
   0x7   : > { %155 = sbr.rel (%p152_p3) target bundleno = 314 (0x13a), region = 32  ;;  %v2282_v1 = vld [vmem:[%s2628_s1 + $0x80] sm:$0xff] (!%p152_p3)   ;;  %2040 = vmatprep.subr.bf16.mxu1 (!%p152_p3), %v2281_v0  ;;  %v2284_v3 = vld [vmem:[%s2628_s1 + $0x88] sm:$0xff] (!%p152_p3)   ;;  %v2286_v5 = vld [vmem:[%s2628_s1 + $0x90] sm:$0xff] (!%p152_p3)  }
   0x8   : > { %2104 = vmatprep.subr.bf16.mxu0 (!%p152_p3), %v2282_v1  ;;  %2041 = vmatpush3.bf16.msra.mxu1 (!%p152_p3), %v2281_v0  ;;  %v2287_v6 = vld [vmem:[%s2628_s1 + $0x38] sm:$0xff] (!%p152_p3)   ;;  %v2292_v11 = vld [vmem:[%s2628_s1] sm:$0xff] (!%p152_p3)   ;;  %v2295_v14 = vld [vmem:[%s2628_s1 + $0x8] sm:$0xff] (!%p152_p3)  }
   0x9   : > { %2105 = vmatpush3.bf16.msra.mxu0 (!%p152_p3), %v2282_v1  ;;  %2042 = vmatprep.subr.bf16.mxu1 (!%p152_p3), %v2283_v2  ;;  %v2288_v7 = vld [vmem:[%s2628_s1 + $0x98] sm:$0xff] (!%p152_p3)   ;;  %v2294_v12 = vld [vmem:[%s2628_s1 + $0xa0] sm:$0xff] (!%p152_p3)   ;;  %v2296_v15 = vld [vmem:[%s2628_s1 + $0xa8] sm:$0xff] (!%p152_p3)  }
   0xa   : > { %2106 = vmatprep.subr.bf16.mxu0 (!%p152_p3), %v2284_v3  ;;  %v2300_v19 = vld [vmem:[%s2628_s1 + $0x10] sm:$0xff] (!%p152_p3)   ;;  %v2303_v22 = vld [vmem:[%s2628_s1 + $0x18] sm:$0xff] (!%p152_p3)   ;;  %v2308_v27 = vld [vmem:[%s2628_s1 + $0x40] sm:$0xff] (!%p152_p3)  }
   0xb   : > { %v2302_v20 = vld [vmem:[%s2628_s1 + $0xb0] sm:$0xff] (!%p152_p3)   ;;  %v2304_v23 = vld [vmem:[%s2628_s1 + $0xb8] sm:$0xff] (!%p152_p3)   ;;  %v2310_v28 = vld [vmem:[%s2628_s1 + $0xc0] sm:$0xff] (!%p152_p3)  }
   0xc   : > { %2043 = vmatpush3.bf16.msra.mxu1 (!%p152_p3), %v2283_v2  ;;  %v2311_v30 = vld [vmem:[%s2628_s1 + $0x48] sm:$0xff] (!%p152_p3)   ;;  %v2316_v35 = vld [vmem:[%s2628_s1 + $0x50] sm:$0xff] (!%p152_p3)   ;;  %v2319_v38 = vld [vmem:[%s2628_s1 + $0x58] sm:$0xff] (!%p152_p3)  }
   0xd   : > { %2107 = vmatpush3.bf16.msra.mxu0 (!%p152_p3), %v2284_v3  ;;  %2044 = vmatprep.subr.bf16.mxu1 (!%p152_p3), %v2285_v4  ;;  %v2312_v31 = vld [vmem:[%s2628_s1 + $0xc8] sm:$0xff] (!%p152_p3)   ;;  %v2318_v36 = vld [vmem:[%s2628_s1 + $0xd0] sm:$0xff] (!%p152_p3)   ;;  %v2320_v39 = vld [vmem:[%s2628_s1 + $0xd8] sm:$0xff] (!%p152_p3)  }
   0xe   : > { %s2636_s12 = smov (!%p179_p4, %s2367_s12), 1  ;;  %2108 = vmatprep.subr.bf16.mxu0 %v2286_v5  ;;  %v2324_v43 = vld [vmem:[%s2628_s1 + $0x60] sm:$0xff]   ;;  %v2327_v46 = vld [vmem:[%s2628_s1 + $0x68] sm:$0xff]   ;;  %v2332_v51 = vld [vmem:[%s2628_s1 + $0x70] sm:$0xff]  }
   0xf   : > { %s2256_s26 = smul.u32 216, %s2636_s12  ;;  %v2326_v44 = vld [vmem:[%s2628_s1 + $0xe0] sm:$0xff]   ;;  %v2328_v47 = vld [vmem:[%s2628_s1 + $0xe8] sm:$0xff]   ;;  %v2334_v52 = vld [vmem:[%s2628_s1 + $0xf0] sm:$0xff]  }
  0x10   : > { %2045 = vmatpush3.bf16.msra.mxu1 %v2285_v4  ;;  %v2335_v54 = vld [vmem:[%s2628_s1 + $0x78] sm:$0xff]   ;;  %v2341_v58 = vld [vmem:[%s2628_s1 + $0x100] sm:$0xff]   ;;  %v2342_v61 = vld [vmem:[%s2628_s1 + $0x108] sm:$0xff]  }
  0x11   : > { %s2442_s6 = scalar_lea.vmem %s2627_s0, %s2256_s26  ;;  %2109 = vmatpush3.bf16.msra.mxu0 %v2286_v5  ;;  %2046 = vmatprep.subr.bf16.mxu1 %v2287_v6  ;;  %v2336_v55 = vld [vmem:[%s2628_s1 + $0xf8] sm:$0xff]   ;;  %v2347_v0 = vld [vmem:[%s2628_s1 + $0x110] sm:$0xff]   ;;  %s1959_s26 = sshll.u32 %s2636_s12, 5 }
  0x12   : > { %v2289_v8 = vld [vmem:[%s2442_s6 + $0x48] sm:$0xff]   ;;  %v2291_v10 = vld [vmem:[%s2442_s6 + $0x50] sm:$0xff]   ;;  %2110 = vmatprep.subr.bf16.mxu0 %v2288_v7  ;;  %v2297_v16 = vld [vmem:[%s2442_s6 + $0x58] sm:$0xff]   ;;  %s192_s29 = scalar_lea.vmem %s2630_s3, %s1959_s26 }
  0x13   : > { %v2290_v9 = vld [vmem:[%s2442_s6 + $0x6c] sm:$0xff]   ;;  %2048 = vmatprep.mubr.msk.bf16.mxu1 %vm280_vm0, %v2289_v8  ;;  %v2293_v13 = vld [vmem:[%s2442_s6 + $0x74] sm:$0xff]   ;;  %v2298_v17 = vld [vmem:[%s2442_s6 + $0x7c] sm:$0xff]  }
  0x14   : > { %2112 = vmatprep.mubr.msk.bf16.mxu0 %vm280_vm0, %v2290_v9  ;;  %2047 = vmatpush3.bf16.msra.mxu1 %v2287_v6  ;;  %v2299_v18 = vld [vmem:[%s2442_s6 + $0x60] sm:$0xff]   ;;  %v2306_v25 = vld [vmem:[%s2442_s6 + $0xb4] sm:$0xff]   ;;  %v2307_v26 = vld [vmem:[%s2442_s6 + $0x8] sm:$0xff]  }
  0x15   : > { %2111 = vmatpush3.bf16.msra.mxu0 %v2288_v7  ;;  %2056 = vmatprep.subr.bf16.mxu1 %v2292_v11  ;;  %v2301_v21 = vld [vmem:[%s2442_s6 + $0x84] sm:$0xff]   ;;  %v2309_v29 = vld [vmem:[%s2442_s6 + $0xbc] sm:$0xff]   ;;  %v2313_v32 = vld [vmem:[%s2442_s6 + $0x10] sm:$0xff]  }
  0x16   : > { %2120 = vmatprep.subr.bf16.mxu0 %v2294_v12  ;;  %v2305_v24 = vld [vmem:[%s2442_s6] sm:$0xff]   ;;  %v2315_v34 = vld [vmem:[%s2442_s6 + $0x18] sm:$0xff]   ;;  %v2317_v37 = vld [vmem:[%s2442_s6 + $0xcc] sm:$0xff]  }
  0x17   : > { %2049 = vmatmul.mubr.msk.bf16.vlgmr.msra.gmra.mrb[0].mxu1 %vm280_vm0, %v2291_v10  ;;  %v2314_v33 = vld [vmem:[%s2442_s6 + $0xc4] sm:$0xff]   ;;  %v2321_v40 = vld [vmem:[%s2442_s6 + $0x90] sm:$0xff]   ;;  %v2323_v42 = vld [vmem:[%s2442_s6 + $0x98] sm:$0xff]  }
  0x18   : > { %2113 = vmatmul.mubr.msk.bf16.vlgmr.msra.gmra.mrb[0].mxu0 %vm280_vm0, %v2293_v13  ;;  %2057 = vmatpush3.bf16.msra.mxu1 %v2292_v11  ;;  %v2322_v41 = vld [vmem:[%s2442_s6 + $0x4] sm:$0xff]   ;;  %v2325_v45 = vld [vmem:[%s2442_s6 + $0xc] sm:$0xff]   ;;  %v2330_v49 = vld [vmem:[%s2442_s6 + $0x14] sm:$0xff]  }
  0x19   : > { %2121 = vmatpush3.bf16.msra.mxu0 %v2294_v12  ;;  %2058 = vmatprep.subr.bf16.mxu1 %v2295_v14  ;;  %v2329_v48 = vld [vmem:[%s2442_s6 + $0xa0] sm:$0xff]   ;;  %v2331_v50 = vld [vmem:[%s2442_s6 + $0xa8] sm:$0xff]   ;;  %v2340_v60 = vld [vmem:[%s2442_s6 + $0x54] sm:$0xff]  }
  0x1a   : > { %2122 = vmatprep.subr.bf16.mxu0 %v2296_v15  ;;  %2052 = vmatprep.mubr.msk.bf16.mxu1 %vm280_vm0, %v2297_v16  ;;  %v2333_v53 = vld [vmem:[%s2442_s6 + $0x1c] sm:$0xff]   ;;  %v2337_v56 = vld [vmem:[%s2442_s6 + $0x24] sm:$0xff]   ;;  %v2338_v57 = vld [vmem:[%s2442_s6 + $0x4c] sm:$0xff]  }
  0x1b   : > { %2116 = vmatprep.mubr.msk.bf16.mxu0 %vm280_vm0, %v2298_v17  ;;  %v2339_v59 = vld [vmem:[%s2442_s6 + $0x2c] sm:$0xff]   ;;  %v2343_v62 = vld [vmem:[%s2442_s6 + $0x34] sm:$0xff]   ;;  %v2344_v63 = vld [vmem:[%s2442_s6 + $0x5c] sm:$0xff]  }
  0x1c   : > { %2059 = vmatpush3.bf16.msra.mxu1 %v2295_v14  ;;  %v2345_v1 = vld [vmem:[%s2442_s6 + $0x3c] sm:$0xff]   ;;  %v2346_v2 = vld [vmem:[%s2442_s6 + $0x64] sm:$0xff]   ;;  %v2349_v4 = vld [vmem:[%s2442_s6 + $0x94] sm:$0xff]  }
  0x1d   : > { %2123 = vmatpush3.bf16.msra.mxu0 %v2296_v15  ;;  %2060 = vmatprep.subr.bf16.mxu1 %v2300_v19  ;;  %v2348_v3 = vld [vmem:[%s2628_s1 + $0x118] sm:$0xff]   ;;  %v2350_v5 = vld [vmem:[%s2442_s6 + $0xa4] sm:$0xff]   ;;  %v2352_v6 = vld [vmem:[%s2442_s6 + $0xac] sm:$0xff]  }
  0x1e   : > { %2124 = vmatprep.subr.bf16.mxu0 %v2302_v20  ;;  %v2351_v7 = vld [vmem:[%s2442_s6 + $0x9c] sm:$0xff]  }
  0x1f   : > { %2053 = vmatmul.mubr.msk.bf16.gmra.mrb[4].mxu1 %vm280_vm0, %v2299_v18 }
  0x20   : > { %2117 = vmatmul.mubr.msk.bf16.gmra.mrb[4].mxu0 %vm280_vm0, %v2301_v21  ;;  %2061 = vmatpush3.bf16.msra.mxu1 %v2300_v19 }
  0x21   : > { %2125 = vmatpush3.bf16.msra.mxu0 %v2302_v20  ;;  %2062 = vmatprep.subr.bf16.mxu1 %v2303_v22 }
  0x22   : > { %2126 = vmatprep.subr.bf16.mxu0 %v2304_v23  ;;  %2064 = vmatprep.mubr.msk.bf16.mxu1 %vm280_vm0, %v2305_v24  ;;  %v1948_v24 = vld [vmem:[%s2629_s2] ss:$0 sm:$0xff] }
  0x23   : > { %2128 = vmatprep.mubr.msk.bf16.mxu0 %vm280_vm0, %v2306_v25 }
  0x24   : > { %2063 = vmatpush3.bf16.msra.mxu1 %v2303_v22 }
  0x25   : > { %2127 = vmatpush3.bf16.msra.mxu0 %v2304_v23  ;;  %2072 = vmatprep.subr.bf16.mxu1 %v2308_v27 }
  0x26   : > { %2136 = vmatprep.subr.bf16.mxu0 %v2310_v28 }
  0x27   : > { %2065 = vmatmul.mubr.msk.bf16.vlgmr.msra.gmra.mrb[0].mxu1 %vm280_vm0, %v2307_v26 }
  0x28   : > { %2129 = vmatmul.mubr.msk.bf16.vlgmr.msra.gmra.mrb[0].mxu0 %vm280_vm0, %v2309_v29  ;;  %2073 = vmatpush3.bf16.msra.mxu1 %v2308_v27 }
  0x29   : > { %2137 = vmatpush3.bf16.msra.mxu0 %v2310_v28  ;;  %2074 = vmatprep.subr.bf16.mxu1 %v2311_v30 }
  0x2a   : > { %2138 = vmatprep.subr.bf16.mxu0 %v2312_v31  ;;  %2068 = vmatprep.mubr.msk.bf16.mxu1 %vm280_vm0, %v2313_v32 }
  0x2b   : > { %2132 = vmatprep.mubr.msk.bf16.mxu0 %vm280_vm0, %v2314_v33 }
  0x2c   : > { %2075 = vmatpush3.bf16.msra.mxu1 %v2311_v30 }
  0x2d   : > { %2139 = vmatpush3.bf16.msra.mxu0 %v2312_v31  ;;  %2076 = vmatprep.subr.bf16.mxu1 %v2316_v35 }
  0x2e   : > { %2140 = vmatprep.subr.bf16.mxu0 %v2318_v36 }
  0x2f   : > { %2069 = vmatmul.mubr.msk.bf16.gmra.mrb[4].mxu1 %vm280_vm0, %v2315_v34 }
  0x30   : > { %2133 = vmatmul.mubr.msk.bf16.gmra.mrb[4].mxu0 %vm280_vm0, %v2317_v37  ;;  %2077 = vmatpush3.bf16.msra.mxu1 %v2316_v35 }
  0x31   : > { %2141 = vmatpush3.bf16.msra.mxu0 %v2318_v36  ;;  %2078 = vmatprep.subr.bf16.mxu1 %v2319_v38 }
  0x32   : > { %2142 = vmatprep.subr.bf16.mxu0 %v2320_v39  ;;  %2080 = vmatprep.mubr.msk.bf16.mxu1 %vm280_vm0, %v2321_v40 }
  0x33   : > { %2144 = vmatprep.mubr.msk.bf16.mxu0 %vm280_vm0, %v2322_v41 }
  0x34   : > { %2079 = vmatpush3.bf16.msra.mxu1 %v2319_v38 }
  0x35   : > { %2143 = vmatpush3.bf16.msra.mxu0 %v2320_v39  ;;  %2088 = vmatprep.subr.bf16.mxu1 %v2324_v43 }
  0x36   : > { %2152 = vmatprep.subr.bf16.mxu0 %v2326_v44 }
  0x37   : > { %2081 = vmatmul.mubr.msk.bf16.vlgmr.msra.gmra.mrb[0].mxu1 %vm280_vm0, %v2323_v42 }
  0x38   : > { %2145 = vmatmul.mubr.msk.bf16.vlgmr.msra.gmra.mrb[0].mxu0 %vm280_vm0, %v2325_v45  ;;  %2089 = vmatpush3.bf16.msra.mxu1 %v2324_v43 }
  0x39   : > { %2153 = vmatpush3.bf16.msra.mxu0 %v2326_v44  ;;  %2090 = vmatprep.subr.bf16.mxu1 %v2327_v46 }
  0x3a   : > { %2154 = vmatprep.subr.bf16.mxu0 %v2328_v47  ;;  %2084 = vmatprep.mubr.msk.bf16.mxu1 %vm280_vm0, %v2329_v48 }
  0x3b   : > { %2148 = vmatprep.mubr.msk.bf16.mxu0 %vm280_vm0, %v2330_v49 }
  0x3c   : > { %2091 = vmatpush3.bf16.msra.mxu1 %v2327_v46 }
  0x3d   : > { %2155 = vmatpush3.bf16.msra.mxu0 %v2328_v47  ;;  %2092 = vmatprep.subr.bf16.mxu1 %v2332_v51 }
  0x3e   : > { %2156 = vmatprep.subr.bf16.mxu0 %v2334_v52 }
  0x3f   : > { %2085 = vmatmul.mubr.msk.bf16.gmra.mrb[4].mxu1 %vm280_vm0, %v2331_v50 }
  0x40   : > { %2149 = vmatmul.mubr.msk.bf16.gmra.mrb[4].mxu0 %vm280_vm0, %v2333_v53  ;;  %2093 = vmatpush3.bf16.msra.mxu1 %v2332_v51 }
  0x41   : > { %2157 = vmatpush3.bf16.msra.mxu0 %v2334_v52  ;;  %2094 = vmatprep.subr.bf16.mxu1 %v2335_v54 }
  0x42   : > { %2158 = vmatprep.subr.bf16.mxu0 %v2336_v55  ;;  %2096 = vmatprep.mubr.msk.bf16.mxu1 %vm280_vm0, %v2337_v56 }
  0x43   : > { %2160 = vmatprep.mubr.msk.bf16.mxu0 %vm280_vm0, %v2338_v57 }
  0x44   : > { %2095 = vmatpush3.bf16.msra.mxu1 %v2335_v54 }
  0x45   : > { %2159 = vmatpush3.bf16.msra.mxu0 %v2336_v55  ;;  %2184 = vmatprep.subr.bf16.mxu1 %v2341_v58 }
  0x46   : > { %2168 = vmatprep.subr.bf16.mxu0 %v2341_v58 }
  0x47   : > { %2097 = vmatmul.mubr.msk.bf16.vlgmr.msra.gmra.mrb[0].mxu1 %vm280_vm0, %v2339_v59 }
  0x48   : > { %2161 = vmatmul.mubr.msk.bf16.vlgmr.msra.gmra.mrb[0].mxu0 %vm280_vm0, %v2340_v60  ;;  %2188 = vmatpush3.bf16.msra.mxu1 %v2341_v58 }
  0x49   : > { %2169 = vmatpush3.bf16.msra.mxu0 %v2341_v58  ;;  %2185 = vmatprep.subr.bf16.mxu1 %v2342_v61 }
  0x4a   : > { %2170 = vmatprep.subr.bf16.mxu0 %v2342_v61  ;;  %2100 = vmatprep.mubr.msk.bf16.mxu1 %vm280_vm0, %v2343_v62 }
  0x4b   : > { %2164 = vmatprep.mubr.msk.bf16.mxu0 %vm280_vm0, %v2344_v63 }
  0x4c   : > { %2189 = vmatpush3.bf16.msra.mxu1 %v2342_v61 }
  0x4d   : > { %2171 = vmatpush3.bf16.msra.mxu0 %v2342_v61  ;;  %2186 = vmatprep.subr.bf16.mxu1 %v2347_v0 }
  0x4e   : > { %2172 = vmatprep.subr.bf16.mxu0 %v2347_v0 }
  0x4f   : > { %2101 = vmatmul.mubr.msk.bf16.gmra.mrb[4].mxu1 %vm280_vm0, %v2345_v1 }
  0x50   : > { %2165 = vmatmul.mubr.msk.bf16.gmra.mrb[4].mxu0 %vm280_vm0, %v2346_v2  ;;  %2190 = vmatpush3.bf16.msra.mxu1 %v2347_v0 }
  0x51   : > { %2173 = vmatpush3.bf16.msra.mxu0 %v2347_v0  ;;  %2187 = vmatprep.subr.bf16.mxu1 %v2348_v3 }
  0x52   : > { %2174 = vmatprep.subr.bf16.mxu0 %v2348_v3  ;;  %2176 = vmatprep.mubr.msk.bf16.mxu0 %vm280_vm0, %v2349_v4 }
  0x53   : > { %2180 = vmatprep.mubr.msk.bf16.mxu1 %vm280_vm0, %v2350_v5 }
  0x54   : > { %2191 = vmatpush3.bf16.msra.mxu1 %v2348_v3 }
  0x55   : > { %2175 = vmatpush3.bf16.msra.mxu0 %v2348_v3 }
  0x57   : > { %2181 = vmatmul.mubr.msk.bf16.vlgmr.msra.gmra.mrb[8].mxu1 %vm280_vm0, %v2352_v6 }
  0x58   : > { %2177 = vmatmul.mubr.msk.bf16.vlgmr.msra.gmra.mrb[0].mxu0 %vm280_vm0, %v2351_v7 }
 0x11a   : > { %v2098_v8 = vpop.f32.mrb[0].mxu1 }
 0x11b   : > { %v738_v9 = vpop.f32.mrb[1].mxu1 }
 0x11c   : > { %v2099_v10 = vpop.f32.mrb[2].mxu1 }
 0x11d   : > { %v741_v11 = vpop.f32.mrb[3].mxu1 }
 0x122   : > { %v2102_v12 = vpop.f32.mrb[4].mxu1 }
 0x123   : > { %v2166_v13 = vpop.f32.mrb[4].mxu0  ;;  %v754_v14 = vpop.f32.mrb[5].mxu1 }
 0x124   : > { %v2196_v15 = vadd.f32 %v2166_v13, %v2102_v12  ;;  %v1352_v16 = vpop.f32.mrb[5].mxu0  ;;  %v2103_v17 = vpop.f32.mrb[6].mxu1 }
 0x125   : > { %v2198_v18 = vadd.f32 %v1352_v16, %v754_v14  ;;  %v2167_v19 = vpop.f32.mrb[6].mxu0  ;;  %v757_v20 = vpop.f32.mrb[7].mxu1 }
 0x126   : > { %v2200_v21 = vadd.f32 %v2167_v19, %v2103_v17  ;;  %v1355_v22 = vpop.f32.mrb[7].mxu0 }
 0x127   : > { %v2202_v23 = vadd.f32 %v1355_v22, %v757_v20 }
 0x12a   : > { %v2182_v25 = vpop.f32.mrb[8].mxu1 }
 0x12b   : > { %v2178_v26 = vpop.f32.mrb[0].mxu0  ;;  %v2197_v27 = vadd.f32 %v2196_v15, %v2182_v25  ;;  %v1501_v28 = vpop.f32.mrb[9].mxu1 }
 0x12c   : > { %v2192_v29 = vadd.f32 %v2178_v26, %v2098_v8  ;;  %v1485_v30 = vpop.f32.mrb[1].mxu0  ;;  %v2199_v31 = vadd.f32 %v2198_v18, %v1501_v28  ;;  %v2183_v32 = vpop.f32.mrb[10].mxu1 }
 0x12d   : > { %v1537_v33 = vadd.f32 %v2197_v27, %v1948_v24  ;;  %v2193_v34 = vadd.f32 %v1485_v30, %v738_v9  ;;  %v2179_v35 = vpop.f32.mrb[2].mxu0  ;;  %v2201_v36 = vadd.f32 %v2200_v21, %v2183_v32  ;;  %v1504_v37 = vpop.f32.mrb[11].mxu1 }
 0x12e   : > { %v1533_v38 = vadd.f32 %v2192_v29, %v1948_v24  ;;  %v1535_v39 = vadd.f32 %v2199_v31, %v1948_v24  ;;  %v2194_v40 = vadd.f32 %v2179_v35, %v2099_v10  ;;  %v1488_v41 = vpop.f32.mrb[3].mxu0  ;;  %v2203_v42 = vadd.f32 %v2202_v23, %v1504_v37 }
 0x12f   : > { %v1545_v43 = vmul.f32 0.01, %v1537_v33  ;;  %v1531_v44 = vadd.f32 %v2193_v34, %v1948_v24  ;;  %v1538_v45 = vadd.f32 %v2201_v36, %v1948_v24  ;;  %v2195_v46 = vadd.f32 %v1488_v41, %v741_v11 }
 0x130   : > { %v1541_v47 = vmul.f32 0.01, %v1533_v38  ;;  %v1543_v48 = vmul.f32 0.01, %v1535_v39  ;;  %v1534_v49 = vadd.f32 %v2194_v40, %v1948_v24  ;;  %v1536_v50 = vadd.f32 %v2203_v42, %v1948_v24 }
 0x131   : > { %v1553_v51 = vmax.f32 %v1537_v33, %v1545_v43  ;;  %v1539_v52 = vmul.f32 0.01, %v1531_v44  ;;  %v1546_v53 = vmul.f32 0.01, %v1538_v45  ;;  %v1532_v54 = vadd.f32 %v2195_v46, %v1948_v24 }
 0x132   : > { %v1549_v55 = vmax.f32 %v1533_v38, %v1541_v47  ;;  %v1551_v56 = vmax.f32 %v1535_v39, %v1543_v48  ;;  %v1542_v57 = vmul.f32 0.01, %v1534_v49  ;;  %v1544_v58 = vmul.f32 0.01, %v1536_v50 }
 0x133   : > { %v1966_v59 = vpack.c.bf16 %v1553_v51, %v1553_v51  ;;  %v1547_v60 = vmax.f32 %v1531_v44, %v1539_v52  ;;  %v1554_v61 = vmax.f32 %v1538_v45, %v1546_v53  ;;  %v1540_v62 = vmul.f32 0.01, %v1532_v54 }
 0x134   : > { %v1962_v63 = vpack.c.bf16 %v1549_v55, %v1549_v55  ;;  %v1964_v0 = vpack.c.bf16 %v1551_v56, %v1551_v56  ;;  %v1550_v1 = vmax.f32 %v1534_v49, %v1542_v57  ;;  %v1552_v2 = vmax.f32 %v1536_v50, %v1544_v58 }
 0x135   : > { %1594 = vst.msk [vmem:[%s192_s29 + $0x18] sm:$0xf] %vm1587_vm1, %v1966_v59  ;;  %v1960_v3 = vpack.c.bf16 %v1547_v60, %v1547_v60  ;;  %v1967_v4 = vpack.c.bf16 %v1554_v61, %v1554_v61  ;;  %v1548_v5 = vmax.f32 %v1532_v54, %v1540_v62 }
 0x136   : > { %1590 = vst.msk [vmem:[%s192_s29 + $0x8] sm:$0xf] %vm1587_vm1, %v1962_v63  ;;  %1592 = vst.msk [vmem:[%s192_s29 + $0x10] sm:$0xf] %vm1587_vm1, %v1964_v0  ;;  %v1963_v6 = vpack.c.bf16 %v1550_v1, %v1550_v1  ;;  %v1965_v7 = vpack.c.bf16 %v1552_v2, %v1552_v2 }
 0x137   : > { %1588 = vst.msk [vmem:[%s192_s29] sm:$0xf] %vm1587_vm1, %v1960_v3  ;;  %1595 = vst.msk [vmem:[%s192_s29 + $0x1c] sm:$0xf] %vm1587_vm1, %v1967_v4  ;;  %v1961_v8 = vpack.c.bf16 %v1548_v5, %v1548_v5 }
 0x138   : > { %1591 = vst.msk [vmem:[%s192_s29 + $0xc] sm:$0xf] %vm1587_vm1, %v1963_v6  ;;  %1593 = vst.msk [vmem:[%s192_s29 + $0x14] sm:$0xf] %vm1587_vm1, %v1965_v7 }
 0x139   : > { %1589 = vst.msk [vmem:[%s192_s29 + $0x4] sm:$0xf] %vm1587_vm1, %v1961_v8 }
 0x13a PF: > { %s13_s14 = sadd.s32 1, %s2375_s14   ;;  %s2631_s12 = smov %s2371_s13 }
 0x13b   : > { %p10_p5 = scmp.ge.s32.totalorder %s13_s14, 4   ;;  %s2632_s13 = smov %s2634_s15 }
 0x13d   :  { %12 = sbr.rel (!%p10_p5) target bundleno = 2 (0x2), region = 79 }

// kernel: forward.7
= control target key start
LH: loop header
LB: loop body
LE: loop exit
PB: predicated region body
PF: predicated region fallthrough
CT: control target
= control target key end

     0   :  { %s5516_s12 = smov 0   ;;  %s5518_s13 = smov 0   ;;  %s6040_s0 = inlined_call_operand.vmem [shape: bf16[2,3,288,32], index: 0, kind: input, shape index: {}]   ;;  %s6041_s1 = inlined_call_operand.vmem [shape: bf16[9,32,64], index: 1, kind: input, shape index: {}]   ;;  %s6042_s2 = inlined_call_operand.vmem [shape: f32[1,64], index: 2, kind: input, shape index: {}]   ;;  %s6043_s3 = inlined_call_operand.vmem [shape: bf16[2,256,64], index: 3, kind: output, shape index: {}]  }
   0x1   :  { %s5520_s14 = smov 0  }
   0x2 LB: > { %s25_s15 = sadd.s32 1, %s5490_s13  ;;  %p3867_p0 = scmp.ge.s32.totalorder %s5494_s14, 1  ;;  %s5494_s14 = sphi %s5520_s14, %s13_s14   ;;  %s5490_s13 = sphi %s5518_s13, %s6045_s13   ;;  %s5486_s12 = sphi %s5516_s12, %s6044_s12  }
   0x3   : > { %p27_p1 = scmp.ge.s32.totalorder %s25_s15, 2  ;;  %p151_p2 = scmp.lt.s32.totalorder %s5494_s14, 3 }
   0x5   : > { %s6047_s15 = smov (%p27_p1, %s25_s15), 0  ;;  %p152_p3 = pnand %p3867_p0, %p151_p2 }
   0x6   : > { %v5308_v0 = vld [vmem:[%s6041_s1 + $0x10] sm:$0xff] (!%p152_p3)   ;;  %p179_p4 = scmp.lt.s32.totalorder (!%p152_p3), %s5486_s12, 1  ;;  %v5540_v1 = vld [vmem:[%s6041_s1 + $0x40] sm:$0xff] (!%p152_p3)   ;;  %v5310_v2 = vld [vmem:[%s6041_s1 + $0x18] sm:$0xff] (!%p152_p3)   ;;  %vm368_vm0 = vcmask (!%p152_p3), 261120   ;;  %vm3725_vm1 = vcmask (!%p152_p3), 519168  }
   0x7   : > { %155 = sbr.rel (%p152_p3) target bundleno = 526 (0x20e), region = 32  ;;  %4699 = vmatprep.subr.bf16.mxu1 (!%p152_p3), %v5308_v0  ;;  %4843 = vmatprep.subr.bf16.mxu0 (!%p152_p3), %v5540_v1  ;;  %v5311_v3 = vld [vmem:[%s6041_s1 + $0x48] sm:$0xff] (!%p152_p3)   ;;  %v5315_v4 = vld [vmem:[%s6041_s1] sm:$0xff] (!%p152_p3)   ;;  %v5317_v5 = vld [vmem:[%s6041_s1 + $0x50] sm:$0xff] (!%p152_p3)  }
   0x8   : > { %4700 = vmatpush3.bf16.msra.mxu1 (!%p152_p3), %v5308_v0  ;;  %4844 = vmatpush3.bf16.msra.mxu0 (!%p152_p3), %v5540_v1  ;;  %v5326_v8 = vld [vmem:[%s6041_s1 + $0x58] sm:$0xff] (!%p152_p3)   ;;  %v5334_v21 = vld [vmem:[%s6041_s1 + $0x8] sm:$0xff] (!%p152_p3)   ;;  %v5336_v22 = vld [vmem:[%s6041_s1 + $0x60] sm:$0xff] (!%p152_p3)  }
   0x9   : > { %4701 = vmatprep.subr.bf16.mxu1 (!%p152_p3), %v5310_v2  ;;  %4845 = vmatprep.subr.bf16.mxu0 (!%p152_p3), %v5311_v3  ;;  %v5352_v31 = vld [vmem:[%s6041_s1 + $0x20] sm:$0xff] (!%p152_p3)   ;;  %v5354_v33 = vld [vmem:[%s6041_s1 + $0x68] sm:$0xff] (!%p152_p3)   ;;  %v5372_v44 = vld [vmem:[%s6041_s1 + $0x70] sm:$0xff] (!%p152_p3)  }
   0xa   : > { %v5370_v50 = vld [vmem:[%s6041_s1 + $0x28] sm:$0xff] (!%p152_p3)   ;;  %v5667_v54 = vld [vmem:[%s6041_s1 + $0x30] sm:$0xff] (!%p152_p3)  }
   0xc   : > { %4702 = vmatpush3.bf16.msra.mxu1 (!%p152_p3), %v5310_v2  ;;  %4846 = vmatpush3.bf16.msra.mxu0 (!%p152_p3), %v5311_v3 }
   0xd   : > { %4735 = vmatprep.subr.bf16.mxu1 (!%p152_p3), %v5315_v4  ;;  %4879 = vmatprep.subr.bf16.mxu0 (!%p152_p3), %v5317_v5 }
   0xe   : > { %s6049_s12 = smov (!%p179_p4, %s5486_s12), 1 }
   0xf   : > { %s5283_s24 = smul.u32 432, %s6049_s12  ;;  %s4504_s16 = sshll.u32 %s6049_s12, 7 }
  0x10   : > { %s5930_s19 = scalar_lea.vmem %s6043_s3, %s4504_s16 }
  0x11   : > { %s5562_s4 = scalar_lea.vmem %s6040_s0, %s5283_s24 }
  0x12   : > { %v5312_v6 = vld [vmem:[%s5562_s4 + $0x90] sm:$0xff]   ;;  %v5313_v7 = vld [vmem:[%s5562_s4 + $0x98] sm:$0xff]   ;;  %v5316_v10 = vld [vmem:[%s5562_s4 + $0xa0] sm:$0xff]  }
  0x13   : > { %4703 = vmatprep.mubr.msk.bf16.mxu1 %vm368_vm0, %v5312_v6  ;;  %v5314_v9 = vld [vmem:[%s5562_s4 + $0x98] sm:$0xff]   ;;  %4847 = vmatprep.mubr.msk.bf16.mxu0 %vm368_vm0, %v5313_v7  ;;  %v5318_v11 = vld [vmem:[%s5562_s4 + $0xa0] sm:$0xff]   ;;  %v5319_v12 = vld [vmem:[%s5562_s4 + $0xa8] sm:$0xff]  }
  0x14   : > { %4704 = vmatmul.mubr.msk.bf16.vlgmr.msra.gmra.mrb[0].mxu1 %vm368_vm0, %v5314_v9  ;;  %4848 = vmatmul.mubr.msk.bf16.vlgmr.msra.gmra.mrb[0].mxu0 %vm368_vm0, %v5316_v10  ;;  %v5320_v13 = vld [vmem:[%s5562_s4 + $0xa8] sm:$0xff]   ;;  %v5321_v14 = vld [vmem:[%s5562_s4 + $0xb0] sm:$0xff]   ;;  %v5323_v16 = vld [vmem:[%s5562_s4 + $0xb8] sm:$0xff]  }
  0x15   : > { %4736 = vmatpush3.bf16.msra.mxu1 %v5315_v4  ;;  %4880 = vmatpush3.bf16.msra.mxu0 %v5317_v5  ;;  %v5322_v15 = vld [vmem:[%s5562_s4 + $0xb0] sm:$0xff]   ;;  %v5324_v17 = vld [vmem:[%s5562_s4 + $0xb8] sm:$0xff]   ;;  %v5325_v18 = vld [vmem:[%s5562_s4 + $0xc0] sm:$0xff]  }
  0x16   : > { %4707 = vmatprep.mubr.msk.bf16.mxu1 %vm368_vm0, %v5318_v11  ;;  %4851 = vmatprep.mubr.msk.bf16.mxu0 %vm368_vm0, %v5319_v12  ;;  %v5327_v19 = vld [vmem:[%s5562_s4 + $0xc0] sm:$0xff]   ;;  %v5328_v20 = vld [vmem:[%s5562_s4 + $0xc8] sm:$0xff]   ;;  %v5330_v24 = vld [vmem:[%s5562_s4 + $0xd0] sm:$0xff]  }
  0x17   : > { %4881 = vmatprep.subr.bf16.mxu0 %v5326_v8  ;;  %4737 = vmatprep.subr.bf16.mxu1 %v5334_v21  ;;  %v5329_v23 = vld [vmem:[%s5562_s4 + $0xc8] sm:$0xff]   ;;  %v5331_v25 = vld [vmem:[%s5562_s4 + $0xd0] sm:$0xff]   ;;  %v5333_v27 = vld [vmem:[%s5562_s4 + $0xd8] sm:$0xff]  }
  0x18   : > { %v5332_v26 = vld [vmem:[%s5562_s4 + $0x128] sm:$0xff]   ;;  %v5335_v28 = vld [vmem:[%s5562_s4 + $0x130] sm:$0xff]   ;;  %v5337_v29 = vld [vmem:[%s5562_s4 + $0xe0] sm:$0xff]  }
  0x19   : > { %4882 = vmatpush3.bf16.msra.mxu0 %v5326_v8  ;;  %4738 = vmatpush3.bf16.msra.mxu1 %v5334_v21  ;;  %v5338_v30 = vld [vmem:[%s5562_s4 + $0x138] sm:$0xff]   ;;  %v5339_v32 = vld [vmem:[%s5562_s4 + $0xe8] sm:$0xff]   ;;  %v5340_v34 = vld [vmem:[%s5562_s4 + $0x140] sm:$0xff]  }
  0x1a   : > { %4915 = vmatprep.subr.bf16.mxu0 %v5336_v22  ;;  %4771 = vmatprep.subr.bf16.mxu1 %v5352_v31  ;;  %v5341_v35 = vld [vmem:[%s5562_s4 + $0xf0] sm:$0xff]   ;;  %v5342_v36 = vld [vmem:[%s5562_s4 + $0x148] sm:$0xff]   ;;  %v5343_v37 = vld [vmem:[%s5562_s4 + $0xf8] sm:$0xff]  }
  0x1b   : > { %v5344_v38 = vld [vmem:[%s5562_s4 + $0x150] sm:$0xff]   ;;  %v5345_v39 = vld [vmem:[%s5562_s4 + $0x100] sm:$0xff]   ;;  %v5346_v40 = vld [vmem:[%s5562_s4 + $0x158] sm:$0xff]  }
  0x1c   : > { %4708 = vmatmul.mubr.msk.bf16.gmra.mrb[4].mxu1 %vm368_vm0, %v5320_v13  ;;  %4852 = vmatmul.mubr.msk.bf16.gmra.mrb[4].mxu0 %vm368_vm0, %v5321_v14  ;;  %v5347_v41 = vld [vmem:[%s5562_s4 + $0x108] sm:$0xff]   ;;  %v5348_v42 = vld [vmem:[%s5562_s4 + $0x160] sm:$0xff]   ;;  %v5353_v47 = vld [vmem:[%s5562_s4 + $0x170] sm:$0xff]  }
  0x1d   : > { %4711 = vmatprep.mubr.msk.bf16.mxu1 %vm368_vm0, %v5322_v15  ;;  %4855 = vmatprep.mubr.msk.bf16.mxu0 %vm368_vm0, %v5323_v16  ;;  %v5349_v43 = vld [vmem:[%s5562_s4] sm:$0xff]   ;;  %v5350_v45 = vld [vmem:[%s5562_s4 + $0x168] sm:$0xff]   ;;  %v5355_v48 = vld [vmem:[%s5562_s4 + $0x10] sm:$0xff]  }
  0x1e   : > { %v5351_v46 = vld [vmem:[%s5562_s4 + $0x8] sm:$0xff]   ;;  %v5356_v49 = vld [vmem:[%s5562_s4 + $0x178] sm:$0xff]   ;;  %v5358_v52 = vld [vmem:[%s5562_s4 + $0x180] sm:$0xff]  }
  0x1f   : > { %v5357_v51 = vld [vmem:[%s5562_s4 + $0x18] sm:$0xff]   ;;  %v5359_v53 = vld [vmem:[%s5562_s4 + $0x20] sm:$0xff]   ;;  %v5360_v55 = vld [vmem:[%s5562_s4 + $0x188] sm:$0xff]  }
  0x20   : > { %v5361_v56 = vld [vmem:[%s5562_s4 + $0x28] sm:$0xff]   ;;  %v5362_v57 = vld [vmem:[%s5562_s4 + $0x190] sm:$0xff]   ;;  %v5364_v59 = vld [vmem:[%s5562_s4 + $0x198] sm:$0xff]  }
  0x21   : > { %v5363_v58 = vld [vmem:[%s5562_s4 + $0x30] sm:$0xff]   ;;  %v5365_v60 = vld [vmem:[%s5562_s4 + $0x38] sm:$0xff]   ;;  %v5366_v61 = vld [vmem:[%s5562_s4 + $0x1a0] sm:$0xff]  }
  0x22   : > { %v5367_v62 = vld [vmem:[%s5562_s4 + $0x40] sm:$0xff]   ;;  %v5368_v63 = vld [vmem:[%s5562_s4 + $0x10] sm:$0xff]   ;;  %v5369_v0 = vld [vmem:[%s5562_s4 + $0x48] sm:$0xff]  }
  0x23   : > { %v5371_v2 = vld [vmem:[%s5562_s4 + $0x18] sm:$0xff]   ;;  %v5373_v3 = vld [vmem:[%s5562_s4 + $0x50] sm:$0xff]   ;;  %v5374_v4 = vld [vmem:[%s5562_s4 + $0x20] sm:$0xff]  }
  0x24   : > { %4712 = vmatmul.mubr.msk.bf16.gmra.mrb[8].mxu1 %vm368_vm0, %v5324_v17  ;;  %4856 = vmatmul.mubr.msk.bf16.gmra.mrb[8].mxu0 %vm368_vm0, %v5325_v18  ;;  %v5390_v5 = vld [vmem:[%s6041_s1 + $0x78] sm:$0xff]   ;;  %v5706_v7 = vld [vmem:[%s6041_s1 + $0x80] sm:$0xff]   ;;  %v5376_v8 = vld [vmem:[%s5562_s4 + $0x28] sm:$0xff]  }
  0x25   : > { %4715 = vmatprep.mubr.msk.bf16.mxu1 %vm368_vm0, %v5327_v19  ;;  %4859 = vmatprep.mubr.msk.bf16.mxu0 %vm368_vm0, %v5328_v20  ;;  %v5375_v6 = vld [vmem:[%s5562_s4 + $0x58] sm:$0xff]   ;;  %v5377_v9 = vld [vmem:[%s5562_s4 + $0x60] sm:$0xff]   ;;  %v5378_v10 = vld [vmem:[%s5562_s4 + $0x30] sm:$0xff]  }
  0x26   : > { %v5379_v11 = vld [vmem:[%s5562_s4 + $0x68] sm:$0xff]   ;;  %v5380_v12 = vld [vmem:[%s5562_s4 + $0x38] sm:$0xff]   ;;  %v5381_v13 = vld [vmem:[%s5562_s4 + $0x70] sm:$0xff]  }
  0x27   : > { %v5382_v14 = vld [vmem:[%s5562_s4 + $0x40] sm:$0xff]   ;;  %v5383_v15 = vld [vmem:[%s5562_s4 + $0x78] sm:$0xff]   ;;  %v5384_v16 = vld [vmem:[%s5562_s4 + $0x48] sm:$0xff]  }
  0x28   : > { %v5385_v17 = vld [vmem:[%s5562_s4 + $0x120] sm:$0xff]   ;;  %v5386_v18 = vld [vmem:[%s5562_s4 + $0x50] sm:$0xff]   ;;  %v5387_v19 = vld [vmem:[%s5562_s4 + $0x128] sm:$0xff]  }
  0x29   : > { %v5389_v20 = vld [vmem:[%s5562_s4 + $0x58] sm:$0xff]   ;;  %v5391_v21 = vld [vmem:[%s5562_s4 + $0x130] sm:$0xff]  }
  0x2c   : > { %4716 = vmatmul.mubr.msk.bf16.gmra.mrb[12].mxu1 %vm368_vm0, %v5329_v23  ;;  %4860 = vmatmul.mubr.msk.bf16.gmra.mrb[12].mxu0 %vm368_vm0, %v5330_v24  ;;  %v5406_v23 = vld [vmem:[%s6041_s1 + $0x38] sm:$0xff]  }
  0x2d   : > { %4719 = vmatprep.mubr.msk.bf16.mxu1 %vm368_vm0, %v5331_v25  ;;  %4883 = vmatprep.mubr.msk.bf16.mxu0 %vm368_vm0, %v5332_v26  ;;  %v5393_v24 = vld [vmem:[%s5562_s4 + $0x138] sm:$0xff]   ;;  %v5394_v25 = vld [vmem:[%s5562_s4 + $0x68] sm:$0xff]   ;;  %v5395_v26 = vld [vmem:[%s5562_s4 + $0x140] sm:$0xff]  }
  0x34   : > { %4720 = vmatmul.mubr.msk.bf16.gmra.mrb[16].mxu1 %vm368_vm0, %v5333_v27  ;;  %4884 = vmatmul.mubr.msk.bf16.vlgmr.msra.gmra.mrb[0].mxu0 %vm368_vm0, %v5335_v28  ;;  %v5396_v27 = vld [vmem:[%s5562_s4 + $0x70] sm:$0xff]   ;;  %v5397_v28 = vld [vmem:[%s5562_s4 + $0x148] sm:$0xff]  }
  0x35   : > { %4723 = vmatprep.mubr.msk.bf16.mxu1 %vm368_vm0, %v5337_v29  ;;  %4916 = vmatpush3.bf16.msra.mxu0 %v5336_v22  ;;  %v5392_v22 = vld [vmem:[%s5562_s4 + $0x60] sm:$0xff]   ;;  %v5398_v29 = vld [vmem:[%s5562_s4 + $0x78] sm:$0xff]  }
  0x36   : > { %4887 = vmatprep.mubr.msk.bf16.mxu0 %vm368_vm0, %v5338_v30  ;;  %4917 = vmatprep.subr.bf16.mxu0 %v5354_v33  ;;  %v5399_v30 = vld [vmem:[%s5562_s4 + $0x150] sm:$0xff]  }
  0x39   : > { %4918 = vmatpush3.bf16.msra.mxu0 %v5354_v33  ;;  %v5403_v33 = vld [vmem:[%s5562_s4 + $0x160] sm:$0xff]  }
  0x3a   : > { %4951 = vmatprep.subr.bf16.mxu0 %v5372_v44 }
  0x3c   : > { %4724 = vmatmul.mubr.msk.bf16.gmra.mrb[20].mxu1 %vm368_vm0, %v5339_v32  ;;  %4888 = vmatmul.mubr.msk.bf16.gmra.mrb[4].mxu0 %vm368_vm0, %v5340_v34  ;;  %v5402_v32 = vld [vmem:[%s5562_s4 + $0x88] sm:$0xff]   ;;  %v5404_v34 = vld [vmem:[%s5562_s4 + $0xa0] sm:$0xff]  }
  0x3d   : > { %4727 = vmatprep.mubr.msk.bf16.mxu1 %vm368_vm0, %v5341_v35  ;;  %4891 = vmatprep.mubr.msk.bf16.mxu0 %vm368_vm0, %v5342_v36  ;;  %v5405_v35 = vld [vmem:[%s5562_s4 + $0x168] sm:$0xff]  }
  0x3e   : > { %v5407_v36 = vld [vmem:[%s5562_s4 + $0xa8] sm:$0xff]  }
  0x44   : > { %4728 = vmatmul.mubr.msk.bf16.gmra.mrb[24].mxu1 %vm368_vm0, %v5343_v37  ;;  %4892 = vmatmul.mubr.msk.bf16.gmra.mrb[8].mxu0 %vm368_vm0, %v5344_v38  ;;  %v5409_v37 = vld [vmem:[%s5562_s4 + $0x170] sm:$0xff]  }
  0x45   : > { %4731 = vmatprep.mubr.msk.bf16.mxu1 %vm368_vm0, %v5345_v39  ;;  %4895 = vmatprep.mubr.msk.bf16.mxu0 %vm368_vm0, %v5346_v40  ;;  %v5410_v38 = vld [vmem:[%s5562_s4 + $0xb0] sm:$0xff]   ;;  %v5425_v39 = vld [vmem:[%s6041_s1 + $0x88] sm:$0xff]   ;;  %v5411_v40 = vld [vmem:[%s5562_s4 + $0x178] sm:$0xff]  }
  0x4c   : > { %4732 = vmatmul.mubr.msk.bf16.gmra.mrb[28].mxu1 %vm368_vm0, %v5347_v41  ;;  %4896 = vmatmul.mubr.msk.bf16.gmra.mrb[12].mxu0 %vm368_vm0, %v5348_v42  ;;  %v5412_v41 = vld [vmem:[%s5562_s4 + $0xb8] sm:$0xff]   ;;  %v5413_v42 = vld [vmem:[%s5562_s4 + $0x180] sm:$0xff]  }
  0x4d   : > { %4739 = vmatprep.mubr.msk.bf16.mxu1 %vm368_vm0, %v5349_v43  ;;  %4899 = vmatprep.mubr.msk.bf16.mxu0 %vm368_vm0, %v5350_v45  ;;  %v5414_v43 = vld [vmem:[%s5562_s4 + $0xc0] sm:$0xff]   ;;  %v5416_v45 = vld [vmem:[%s5562_s4 + $0xc8] sm:$0xff]  }
  0x54   : > { %4740 = vmatmul.mubr.msk.bf16.vlgmr.msra.gmra.mrb[0].mxu1 %vm368_vm0, %v5351_v46  ;;  %4900 = vmatmul.mubr.msk.bf16.gmra.mrb[16].mxu0 %vm368_vm0, %v5353_v47  ;;  %v5417_v46 = vld [vmem:[%s5562_s4 + $0x190] sm:$0xff]  }
  0x55   : > { %4772 = vmatpush3.bf16.msra.mxu1 %v5352_v31  ;;  %4743 = vmatprep.mubr.msk.bf16.mxu1 %vm368_vm0, %v5355_v48  ;;  %v5400_v31 = vld [vmem:[%s5562_s4 + $0x80] sm:$0xff]   ;;  %v5418_v47 = vld [vmem:[%s5562_s4 + $0xd0] sm:$0xff]   ;;  %v5419_v48 = vld [vmem:[%s5562_s4 + $0x198] sm:$0xff]  }
  0x56   : > { %4903 = vmatprep.mubr.msk.bf16.mxu0 %vm368_vm0, %v5356_v49  ;;  %4773 = vmatprep.subr.bf16.mxu1 %v5370_v50  ;;  %v5420_v49 = vld [vmem:[%s5562_s4 + $0xd8] sm:$0xff]  }
  0x59   : > { %4774 = vmatpush3.bf16.msra.mxu1 %v5370_v50  ;;  %v5421_v50 = vld [vmem:[%s5562_s4 + $0x8] sm:$0xff]  }
  0x5a   : > { %4807 = vmatprep.subr.bf16.mxu1 %v5667_v54 }
  0x5c   : > { %4744 = vmatmul.mubr.msk.bf16.gmra.mrb[4].mxu1 %vm368_vm0, %v5357_v51  ;;  %4904 = vmatmul.mubr.msk.bf16.gmra.mrb[20].mxu0 %vm368_vm0, %v5358_v52  ;;  %v5422_v51 = vld [vmem:[%s5562_s4 + $0xe0] sm:$0xff]   ;;  %v5423_v52 = vld [vmem:[%s5562_s4 + $0x10] sm:$0xff]  }
  0x5d   : > { %4747 = vmatprep.mubr.msk.bf16.mxu1 %vm368_vm0, %v5359_v53  ;;  %4907 = vmatprep.mubr.msk.bf16.mxu0 %vm368_vm0, %v5360_v55  ;;  %v5424_v53 = vld [vmem:[%s5562_s4 + $0xe8] sm:$0xff]   ;;  %v5427_v55 = vld [vmem:[%s5562_s4 + $0xf0] sm:$0xff]  }
  0x64   : > { %4748 = vmatmul.mubr.msk.bf16.gmra.mrb[8].mxu1 %vm368_vm0, %v5361_v56  ;;  %4908 = vmatmul.mubr.msk.bf16.gmra.mrb[24].mxu0 %vm368_vm0, %v5362_v57  ;;  %v5470_v56 = vld [vmem:[%s6041_s1 + $0x40] sm:$0xff]   ;;  %v5471_v57 = vld [vmem:[%s6041_s1 + $0x48] sm:$0xff]  }
  0x65   : > { %4751 = vmatprep.mubr.msk.bf16.mxu1 %vm368_vm0, %v5363_v58  ;;  %4911 = vmatprep.mubr.msk.bf16.mxu0 %vm368_vm0, %v5364_v59  ;;  %v5428_v58 = vld [vmem:[%s5562_s4 + $0x20] sm:$0xff]   ;;  %v5429_v59 = vld [vmem:[%s5562_s4 + $0xf8] sm:$0xff]  }
  0x6c   : > { %4752 = vmatmul.mubr.msk.bf16.gmra.mrb[12].mxu1 %vm368_vm0, %v5365_v60  ;;  %4912 = vmatmul.mubr.msk.bf16.gmra.mrb[28].mxu0 %vm368_vm0, %v5366_v61  ;;  %v5430_v60 = vld [vmem:[%s5562_s4 + $0x28] sm:$0xff]   ;;  %v5431_v61 = vld [vmem:[%s5562_s4 + $0x100] sm:$0xff]  }
  0x6d   : > { %4755 = vmatprep.mubr.msk.bf16.mxu1 %vm368_vm0, %v5367_v62  ;;  %4919 = vmatprep.mubr.msk.bf16.mxu0 %vm368_vm0, %v5368_v63  ;;  %v5432_v62 = vld [vmem:[%s5562_s4 + $0x30] sm:$0xff]   ;;  %v5433_v63 = vld [vmem:[%s5562_s4 + $0x108] sm:$0xff]  }
  0x74   : > { %4756 = vmatmul.mubr.msk.bf16.gmra.mrb[16].mxu1 %vm368_vm0, %v5369_v0  ;;  %4920 = vmatmul.mubr.msk.bf16.vlgmr.msra.gmra.mrb[0].mxu0 %vm368_vm0, %v5371_v2  ;;  %v5434_v0 = vld [vmem:[%s5562_s4 + $0x38] sm:$0xff]   ;;  %v5435_v2 = vld [vmem:[%s5562_s4 + $0x110] sm:$0xff]  }
  0x75   : > { %4759 = vmatprep.mubr.msk.bf16.mxu1 %vm368_vm0, %v5373_v3  ;;  %4952 = vmatpush3.bf16.msra.mxu0 %v5372_v44  ;;  %v5415_v44 = vld [vmem:[%s5562_s4 + $0x188] sm:$0xff]   ;;  %v5436_v3 = vld [vmem:[%s5562_s4 + $0x40] sm:$0xff]  }
  0x76   : > { %4923 = vmatprep.mubr.msk.bf16.mxu0 %vm368_vm0, %v5374_v4  ;;  %4953 = vmatprep.subr.bf16.mxu0 %v5390_v5  ;;  %v5437_v4 = vld [vmem:[%s5562_s4 + $0x118] sm:$0xff]  }
  0x79   : > { %4954 = vmatpush3.bf16.msra.mxu0 %v5390_v5  ;;  %v5438_v5 = vld [vmem:[%s5562_s4 + $0x48] sm:$0xff]  }
  0x7a   : > { %4987 = vmatprep.subr.bf16.mxu0 %v5706_v7 }
  0x7c   : > { %4760 = vmatmul.mubr.msk.bf16.gmra.mrb[20].mxu1 %vm368_vm0, %v5375_v6  ;;  %4924 = vmatmul.mubr.msk.bf16.gmra.mrb[4].mxu0 %vm368_vm0, %v5376_v8  ;;  %v5439_v6 = vld [vmem:[%s5562_s4 + $0x130] sm:$0xff]   ;;  %v5441_v8 = vld [vmem:[%s5562_s4 + $0x138] sm:$0xff]  }
  0x7d   : > { %4763 = vmatprep.mubr.msk.bf16.mxu1 %vm368_vm0, %v5377_v9  ;;  %4927 = vmatprep.mubr.msk.bf16.mxu0 %vm368_vm0, %v5378_v10  ;;  %v5442_v9 = vld [vmem:[%s5562_s4 + $0x58] sm:$0xff]   ;;  %v5443_v10 = vld [vmem:[%s5562_s4 + $0x140] sm:$0xff]  }
  0x84   : > { %4764 = vmatmul.mubr.msk.bf16.gmra.mrb[24].mxu1 %vm368_vm0, %v5379_v11  ;;  %4928 = vmatmul.mubr.msk.bf16.gmra.mrb[8].mxu0 %vm368_vm0, %v5380_v12  ;;  %v5444_v11 = vld [vmem:[%s5562_s4 + $0x60] sm:$0xff]   ;;  %v5445_v12 = vld [vmem:[%s5562_s4 + $0x148] sm:$0xff]  }
  0x85   : > { %4767 = vmatprep.mubr.msk.bf16.mxu1 %vm368_vm0, %v5381_v13  ;;  %4931 = vmatprep.mubr.msk.bf16.mxu0 %vm368_vm0, %v5382_v14  ;;  %v5446_v13 = vld [vmem:[%s5562_s4 + $0x68] sm:$0xff]   ;;  %v5447_v14 = vld [vmem:[%s5562_s4 + $0x150] sm:$0xff]  }
  0x8c   : > { %4768 = vmatmul.mubr.msk.bf16.gmra.mrb[28].mxu1 %vm368_vm0, %v5383_v15  ;;  %4932 = vmatmul.mubr.msk.bf16.gmra.mrb[12].mxu0 %vm368_vm0, %v5384_v16  ;;  %v5448_v15 = vld [vmem:[%s5562_s4 + $0x70] sm:$0xff]   ;;  %v5449_v16 = vld [vmem:[%s5562_s4 + $0x158] sm:$0xff]  }
  0x8d   : > { %4775 = vmatprep.mubr.msk.bf16.mxu1 %vm368_vm0, %v5385_v17  ;;  %4935 = vmatprep.mubr.msk.bf16.mxu0 %vm368_vm0, %v5386_v18  ;;  %v5450_v17 = vld [vmem:[%s5562_s4 + $0x78] sm:$0xff]   ;;  %v5451_v18 = vld [vmem:[%s5562_s4 + $0x160] sm:$0xff]  }
  0x94   : > { %4776 = vmatmul.mubr.msk.bf16.vlgmr.msra.gmra.mrb[0].mxu1 %vm368_vm0, %v5387_v19  ;;  %4936 = vmatmul.mubr.msk.bf16.gmra.mrb[16].mxu0 %vm368_vm0, %v5389_v20  ;;  %v5452_v19 = vld [vmem:[%s5562_s4 + $0x80] sm:$0xff]   ;;  %v5453_v20 = vld [vmem:[%s5562_s4 + $0x168] sm:$0xff]  }
  0x95   : > { %4808 = vmatpush3.bf16.msra.mxu1 %v5667_v54  ;;  %4779 = vmatprep.mubr.msk.bf16.mxu1 %vm368_vm0, %v5391_v21  ;;  %v5426_v54 = vld [vmem:[%s5562_s4 + $0x18] sm:$0xff]  }
  0x96   : > { %4939 = vmatprep.mubr.msk.bf16.mxu0 %vm368_vm0, %v5392_v22  ;;  %4809 = vmatprep.subr.bf16.mxu1 %v5406_v23  ;;  %v5454_v21 = vld [vmem:[%s5562_s4 + $0xd8] sm:$0xff]   ;;  %v5455_v22 = vld [vmem:[%s5562_s4 + $0x170] sm:$0xff]  }
  0x99   : > { %4810 = vmatpush3.bf16.msra.mxu1 %v5406_v23  ;;  %v5456_v23 = vld [vmem:[%s5562_s4 + $0xe0] sm:$0xff]  }
  0x9a   : > { %5023 = vmatprep.subr.bf16.mxu1 %v5540_v1  ;;  %v5401_v1 = vld [vmem:[%s5562_s4 + $0x158] sm:$0xff]  }
  0x9c   : > { %4780 = vmatmul.mubr.msk.bf16.gmra.mrb[4].mxu1 %vm368_vm0, %v5393_v24  ;;  %4940 = vmatmul.mubr.msk.bf16.gmra.mrb[20].mxu0 %vm368_vm0, %v5394_v25  ;;  %v5457_v24 = vld [vmem:[%s5562_s4 + $0x178] sm:$0xff]   ;;  %v5458_v25 = vld [vmem:[%s5562_s4 + $0xe8] sm:$0xff]  }
  0x9d   : > { %4783 = vmatprep.mubr.msk.bf16.mxu1 %vm368_vm0, %v5395_v26  ;;  %4943 = vmatprep.mubr.msk.bf16.mxu0 %vm368_vm0, %v5396_v27  ;;  %v5459_v26 = vld [vmem:[%s5562_s4 + $0x180] sm:$0xff]   ;;  %v5460_v27 = vld [vmem:[%s5562_s4 + $0xf0] sm:$0xff]  }
  0xa4   : > { %4784 = vmatmul.mubr.msk.bf16.gmra.mrb[8].mxu1 %vm368_vm0, %v5397_v28  ;;  %4944 = vmatmul.mubr.msk.bf16.gmra.mrb[24].mxu0 %vm368_vm0, %v5398_v29  ;;  %v5461_v28 = vld [vmem:[%s5562_s4 + $0x188] sm:$0xff]   ;;  %v5462_v29 = vld [vmem:[%s5562_s4 + $0xf8] sm:$0xff]  }
  0xa5   : > { %4787 = vmatprep.mubr.msk.bf16.mxu1 %vm368_vm0, %v5399_v30  ;;  %4947 = vmatprep.mubr.msk.bf16.mxu0 %vm368_vm0, %v5400_v31  ;;  %v5463_v30 = vld [vmem:[%s5562_s4 + $0x190] sm:$0xff]   ;;  %v5464_v31 = vld [vmem:[%s5562_s4 + $0x100] sm:$0xff]  }
  0xac   : > { %4788 = vmatmul.mubr.msk.bf16.gmra.mrb[12].mxu1 %vm368_vm0, %v5401_v1  ;;  %4948 = vmatmul.mubr.msk.bf16.gmra.mrb[28].mxu0 %vm368_vm0, %v5402_v32  ;;  %v5465_v1 = vld [vmem:[%s5562_s4 + $0x198] sm:$0xff]   ;;  %v5466_v32 = vld [vmem:[%s5562_s4 + $0x108] sm:$0xff]  }
  0xad   : > { %4791 = vmatprep.mubr.msk.bf16.mxu1 %vm368_vm0, %v5403_v33  ;;  %4955 = vmatprep.mubr.msk.bf16.mxu0 %vm368_vm0, %v5404_v34  ;;  %v5467_v33 = vld [vmem:[%s5562_s4 + $0x1a0] sm:$0xff]   ;;  %v5468_v34 = vld [vmem:[%s5562_s4 + $0x110] sm:$0xff]  }
  0xb4   : > { %4792 = vmatmul.mubr.msk.bf16.gmra.mrb[16].mxu1 %vm368_vm0, %v5405_v35  ;;  %4956 = vmatmul.mubr.msk.bf16.vlgmr.msra.gmra.mrb[0].mxu0 %vm368_vm0, %v5407_v36  ;;  %v5469_v35 = vld [vmem:[%s5562_s4 + $0x1a8] sm:$0xff]  }
  0xb5   : > { %4795 = vmatprep.mubr.msk.bf16.mxu1 %vm368_vm0, %v5409_v37  ;;  %4988 = vmatpush3.bf16.msra.mxu0 %v5706_v7  ;;  %v5440_v7 = vld [vmem:[%s5562_s4 + $0x50] sm:$0xff]  }
  0xb6   : > { %4959 = vmatprep.mubr.msk.bf16.mxu0 %vm368_vm0, %v5410_v38  ;;  %4989 = vmatprep.subr.bf16.mxu0 %v5425_v39 }
  0xb9   : > { %4990 = vmatpush3.bf16.msra.mxu0 %v5425_v39 }
  0xbc   : > { %4796 = vmatmul.mubr.msk.bf16.gmra.mrb[20].mxu1 %vm368_vm0, %v5411_v40  ;;  %4960 = vmatmul.mubr.msk.bf16.gmra.mrb[4].mxu0 %vm368_vm0, %v5412_v41 }
  0xbd   : > { %4799 = vmatprep.mubr.msk.bf16.mxu1 %vm368_vm0, %v5413_v42  ;;  %4963 = vmatprep.mubr.msk.bf16.mxu0 %vm368_vm0, %v5414_v43 }
  0xc4   : > { %4800 = vmatmul.mubr.msk.bf16.gmra.mrb[24].mxu1 %vm368_vm0, %v5415_v44  ;;  %4964 = vmatmul.mubr.msk.bf16.gmra.mrb[8].mxu0 %vm368_vm0, %v5416_v45 }
  0xc5   : > { %4803 = vmatprep.mubr.msk.bf16.mxu1 %vm368_vm0, %v5417_v46  ;;  %4967 = vmatprep.mubr.msk.bf16.mxu0 %vm368_vm0, %v5418_v47 }
  0xcc   : > { %4804 = vmatmul.mubr.msk.bf16.gmra.mrb[28].mxu1 %vm368_vm0, %v5419_v48  ;;  %4968 = vmatmul.mubr.msk.bf16.gmra.mrb[12].mxu0 %vm368_vm0, %v5420_v49 }
  0xcd   : > { %4811 = vmatprep.mubr.msk.bf16.mxu1 %vm368_vm0, %v5421_v50  ;;  %4971 = vmatprep.mubr.msk.bf16.mxu0 %vm368_vm0, %v5422_v51 }
  0xd4   : > { %4812 = vmatmul.mubr.msk.bf16.vlgmr.msra.gmra.mrb[0].mxu1 %vm368_vm0, %v5423_v52  ;;  %4972 = vmatmul.mubr.msk.bf16.gmra.mrb[16].mxu0 %vm368_vm0, %v5424_v53  ;;  %v5920_v53 = vld [vmem:[%s6042_s2] ss:$0 sm:$0xff] }
  0xd5   : > { %5025 = vmatpush3.bf16.msra.mxu1 %v5470_v56  ;;  %4815 = vmatprep.mubr.msk.bf16.mxu1 %vm368_vm0, %v5426_v54 }
  0xd6   : > { %4975 = vmatprep.mubr.msk.bf16.mxu0 %vm368_vm0, %v5427_v55  ;;  %5024 = vmatprep.subr.bf16.mxu1 %v5471_v57 }
  0xd9   : > { %5026 = vmatpush3.bf16.msra.mxu1 %v5471_v57 }
  0xdc   : > { %4816 = vmatmul.mubr.msk.bf16.gmra.mrb[4].mxu1 %vm368_vm0, %v5428_v58  ;;  %4976 = vmatmul.mubr.msk.bf16.gmra.mrb[20].mxu0 %vm368_vm0, %v5429_v59 }
  0xdd   : > { %4819 = vmatprep.mubr.msk.bf16.mxu1 %vm368_vm0, %v5430_v60  ;;  %4979 = vmatprep.mubr.msk.bf16.mxu0 %vm368_vm0, %v5431_v61 }
  0xe4   : > { %4820 = vmatmul.mubr.msk.bf16.gmra.mrb[8].mxu1 %vm368_vm0, %v5432_v62  ;;  %4980 = vmatmul.mubr.msk.bf16.gmra.mrb[24].mxu0 %vm368_vm0, %v5433_v63 }
  0xe5   : > { %4823 = vmatprep.mubr.msk.bf16.mxu1 %vm368_vm0, %v5434_v0  ;;  %4983 = vmatprep.mubr.msk.bf16.mxu0 %vm368_vm0, %v5435_v2 }
  0xec   : > { %4824 = vmatmul.mubr.msk.bf16.gmra.mrb[12].mxu1 %vm368_vm0, %v5436_v3  ;;  %4984 = vmatmul.mubr.msk.bf16.gmra.mrb[28].mxu0 %vm368_vm0, %v5437_v4 }
  0xed   : > { %4827 = vmatprep.mubr.msk.bf16.mxu1 %vm368_vm0, %v5438_v5  ;;  %4991 = vmatprep.mubr.msk.bf16.mxu0 %vm368_vm0, %v5439_v6 }
  0xf4   : > { %4828 = vmatmul.mubr.msk.bf16.gmra.mrb[16].mxu1 %vm368_vm0, %v5440_v7  ;;  %4992 = vmatmul.mubr.msk.bf16.vlgmr.msra.gmra.mrb[0].mxu0 %vm368_vm0, %v5441_v8 }
  0xf5   : > { %4831 = vmatprep.mubr.msk.bf16.mxu1 %vm368_vm0, %v5442_v9  ;;  %4995 = vmatprep.mubr.msk.bf16.mxu0 %vm368_vm0, %v5443_v10 }
  0xfc   : > { %4832 = vmatmul.mubr.msk.bf16.gmra.mrb[20].mxu1 %vm368_vm0, %v5444_v11  ;;  %4996 = vmatmul.mubr.msk.bf16.gmra.mrb[4].mxu0 %vm368_vm0, %v5445_v12 }
  0xfd   : > { %4835 = vmatprep.mubr.msk.bf16.mxu1 %vm368_vm0, %v5446_v13  ;;  %4999 = vmatprep.mubr.msk.bf16.mxu0 %vm368_vm0, %v5447_v14 }
 0x104   : > { %4836 = vmatmul.mubr.msk.bf16.gmra.mrb[24].mxu1 %vm368_vm0, %v5448_v15  ;;  %5000 = vmatmul.mubr.msk.bf16.gmra.mrb[8].mxu0 %vm368_vm0, %v5449_v16 }
 0x105   : > { %4839 = vmatprep.mubr.msk.bf16.mxu1 %vm368_vm0, %v5450_v17  ;;  %5003 = vmatprep.mubr.msk.bf16.mxu0 %vm368_vm0, %v5451_v18 }
 0x10c   : > { %4840 = vmatmul.mubr.msk.bf16.gmra.mrb[28].mxu1 %vm368_vm0, %v5452_v19  ;;  %5004 = vmatmul.mubr.msk.bf16.gmra.mrb[12].mxu0 %vm368_vm0, %v5453_v20 }
 0x10d   : > { %4863 = vmatprep.mubr.msk.bf16.mxu1 %vm368_vm0, %v5454_v21  ;;  %5007 = vmatprep.mubr.msk.bf16.mxu0 %vm368_vm0, %v5455_v22 }
 0x114   : > { %4864 = vmatmul.mubr.msk.bf16.vlgmr.msra.gmra.mrb[16].mxu1 %vm368_vm0, %v5456_v23  ;;  %5008 = vmatmul.mubr.msk.bf16.gmra.mrb[16].mxu0 %vm368_vm0, %v5457_v24 }
 0x115   : > { %4867 = vmatprep.mubr.msk.bf16.mxu1 %vm368_vm0, %v5458_v25  ;;  %5011 = vmatprep.mubr.msk.bf16.mxu0 %vm368_vm0, %v5459_v26 }
 0x11c   : > { %4868 = vmatmul.mubr.msk.bf16.gmra.mrb[20].mxu1 %vm368_vm0, %v5460_v27  ;;  %5012 = vmatmul.mubr.msk.bf16.gmra.mrb[20].mxu0 %vm368_vm0, %v5461_v28 }
 0x11d   : > { %4871 = vmatprep.mubr.msk.bf16.mxu1 %vm368_vm0, %v5462_v29  ;;  %5015 = vmatprep.mubr.msk.bf16.mxu0 %vm368_vm0, %v5463_v30 }
 0x124   : > { %4872 = vmatmul.mubr.msk.bf16.gmra.mrb[24].mxu1 %vm368_vm0, %v5464_v31  ;;  %5016 = vmatmul.mubr.msk.bf16.gmra.mrb[24].mxu0 %vm368_vm0, %v5465_v1 }
 0x125   : > { %4875 = vmatprep.mubr.msk.bf16.mxu1 %vm368_vm0, %v5466_v32  ;;  %5019 = vmatprep.mubr.msk.bf16.mxu0 %vm368_vm0, %v5467_v33 }
 0x12c   : > { %4876 = vmatmul.mubr.msk.bf16.gmra.mrb[28].mxu1 %vm368_vm0, %v5468_v34  ;;  %5020 = vmatmul.mubr.msk.bf16.gmra.mrb[28].mxu0 %vm368_vm0, %v5469_v35 }
 0x1a7   : > { %v4813_v36 = vpop.f32.mrb[0].mxu1 }
 0x1a8   : > { %v1468_v37 = vpop.f32.mrb[1].mxu1 }
 0x1a9   : > { %v4814_v38 = vpop.f32.mrb[2].mxu1 }
 0x1aa   : > { %v1471_v39 = vpop.f32.mrb[3].mxu1 }
 0x1af   : > { %v4817_v40 = vpop.f32.mrb[4].mxu1 }
 0x1b0   : > { %v1484_v41 = vpop.f32.mrb[5].mxu1 }
 0x1b1   : > { %v4818_v42 = vpop.f32.mrb[6].mxu1 }
 0x1b2   : > { %v1487_v43 = vpop.f32.mrb[7].mxu1 }
 0x1b7   : > { %v4821_v44 = vpop.f32.mrb[8].mxu1 }
 0x1b8   : > { %v5903_v45 = vpop.f32.mrb[9].mxu1 }
 0x1b9   : > { %v5905_v46 = vpop.f32.mrb[10].mxu1 }
 0x1ba   : > { %v5907_v47 = vpop.f32.mrb[11].mxu1 }
 0x1bf   : > { %v5909_v48 = vpop.f32.mrb[12].mxu1 }
 0x1c0   : > { %v5911_v49 = vpop.f32.mrb[13].mxu1 }
 0x1c1   : > { %v5913_v50 = vpop.f32.mrb[14].mxu1 }
 0x1c2   : > { %v5915_v51 = vpop.f32.mrb[15].mxu1 }
 0x1c7   : > { %v4993_v52 = vpop.f32.mrb[0].mxu0 }
 0x1c8   : > { %v5027_v54 = vadd.f32 %v4993_v52, %v4813_v36  ;;  %v3335_v55 = vpop.f32.mrb[1].mxu0 }
 0x1c9   : > { %v5028_v56 = vadd.f32 %v3335_v55, %v1468_v37  ;;  %v4994_v57 = vpop.f32.mrb[2].mxu0 }
 0x1ca   : > { %v3503_v58 = vadd.f32 %v5027_v54, %v5920_v53  ;;  %v5029_v59 = vadd.f32 %v4994_v57, %v4814_v38  ;;  %v3338_v60 = vpop.f32.mrb[3].mxu0 }
 0x1cb   : > { %v3501_v61 = vadd.f32 %v5028_v56, %v5920_v53  ;;  %v5030_v62 = vadd.f32 %v3338_v60, %v1471_v39 }
 0x1cc   : > { %v3535_v63 = vmul.f32 0.01, %v3503_v58  ;;  %v3504_v0 = vadd.f32 %v5029_v59, %v5920_v53 }
 0x1cd   : > { %v3533_v2 = vmul.f32 0.01, %v3501_v61  ;;  %v3502_v3 = vadd.f32 %v5030_v62, %v5920_v53 }
 0x1ce   : > { %v3567_v4 = vmax.f32 %v3503_v58, %v3535_v63  ;;  %v3536_v5 = vmul.f32 0.01, %v3504_v0 }
 0x1cf   : > { %v3565_v6 = vmax.f32 %v3501_v61, %v3533_v2  ;;  %v3534_v7 = vmul.f32 0.01, %v3502_v3  ;;  %v4997_v8 = vpop.f32.mrb[4].mxu0 }
 0x1d0   : > { %v4507_v9 = vpack.c.bf16 %v3567_v4, %v3567_v4  ;;  %v3568_v10 = vmax.f32 %v3504_v0, %v3536_v5  ;;  %v5031_v11 = vadd.f32 %v4997_v8, %v4817_v40  ;;  %v3351_v12 = vpop.f32.mrb[5].mxu0 }
 0x1d1   : > { %v4505_v13 = vpack.c.bf16 %v3565_v6, %v3565_v6  ;;  %v3566_v14 = vmax.f32 %v3502_v3, %v3534_v7  ;;  %v5032_v15 = vadd.f32 %v3351_v12, %v1484_v41  ;;  %v4998_v16 = vpop.f32.mrb[6].mxu0 }
 0x1d2   : > { %3728 = vst.msk [vmem:[%s5930_s19 + $0x8] sm:$0xf] %vm3725_vm1, %v4507_v9  ;;  %v4508_v17 = vpack.c.bf16 %v3568_v10, %v3568_v10  ;;  %v3507_v18 = vadd.f32 %v5031_v11, %v5920_v53  ;;  %v5033_v19 = vadd.f32 %v4998_v16, %v4818_v42  ;;  %v3354_v20 = vpop.f32.mrb[7].mxu0 }
 0x1d3   : > { %3726 = vst.msk [vmem:[%s5930_s19] sm:$0xf] %vm3725_vm1, %v4505_v13  ;;  %v4506_v21 = vpack.c.bf16 %v3566_v14, %v3566_v14  ;;  %v3505_v22 = vadd.f32 %v5032_v15, %v5920_v53  ;;  %v5034_v23 = vadd.f32 %v3354_v20, %v1487_v43 }
 0x1d4   : > { %3729 = vst.msk [vmem:[%s5930_s19 + $0xc] sm:$0xf] %vm3725_vm1, %v4508_v17  ;;  %v3539_v24 = vmul.f32 0.01, %v3507_v18  ;;  %v3508_v25 = vadd.f32 %v5033_v19, %v5920_v53 }
 0x1d5   : > { %3727 = vst.msk [vmem:[%s5930_s19 + $0x4] sm:$0xf] %vm3725_vm1, %v4506_v21  ;;  %v3537_v26 = vmul.f32 0.01, %v3505_v22  ;;  %v3506_v27 = vadd.f32 %v5034_v23, %v5920_v53 }
 0x1d6   : > { %v3571_v28 = vmax.f32 %v3507_v18, %v3539_v24  ;;  %v3540_v29 = vmul.f32 0.01, %v3508_v25 }
 0x1d7   : > { %v3569_v30 = vmax.f32 %v3505_v22, %v3537_v26  ;;  %v3538_v31 = vmul.f32 0.01, %v3506_v27  ;;  %v5001_v1 = vpop.f32.mrb[8].mxu0 }
 0x1d8   : > { %v4511_v32 = vpack.c.bf16 %v3571_v28, %v3571_v28  ;;  %v3572_v33 = vmax.f32 %v3508_v25, %v3540_v29  ;;  %v5035_v34 = vadd.f32 %v5001_v1, %v4821_v44  ;;  %v3367_v35 = vpop.f32.mrb[9].mxu0 }
 0x1d9   : > { %v4509_v36 = vpack.c.bf16 %v3569_v30, %v3569_v30  ;;  %v3570_v37 = vmax.f32 %v3506_v27, %v3538_v31  ;;  %v5036_v38 = vadd.f32 %v3367_v35, %v5903_v45  ;;  %v5002_v39 = vpop.f32.mrb[10].mxu0 }
 0x1da   : > { %3732 = vst.msk [vmem:[%s5930_s19 + $0x18] sm:$0xf] %vm3725_vm1, %v4511_v32  ;;  %v4512_v40 = vpack.c.bf16 %v3572_v33, %v3572_v33  ;;  %v3511_v41 = vadd.f32 %v5035_v34, %v5920_v53  ;;  %v5037_v42 = vadd.f32 %v5002_v39, %v5905_v46  ;;  %v3370_v43 = vpop.f32.mrb[11].mxu0 }
 0x1db   : > { %3730 = vst.msk [vmem:[%s5930_s19 + $0x10] sm:$0xf] %vm3725_vm1, %v4509_v36  ;;  %v4510_v52 = vpack.c.bf16 %v3570_v37, %v3570_v37  ;;  %v3509_v44 = vadd.f32 %v5036_v38, %v5920_v53  ;;  %v5038_v54 = vadd.f32 %v3370_v43, %v5907_v47 }
 0x1dc   : > { %3733 = vst.msk [vmem:[%s5930_s19 + $0x1c] sm:$0xf] %vm3725_vm1, %v4512_v40  ;;  %v3543_v55 = vmul.f32 0.01, %v3511_v41  ;;  %v3512_v45 = vadd.f32 %v5037_v42, %v5920_v53 }
 0x1dd   : > { %3731 = vst.msk [vmem:[%s5930_s19 + $0x14] sm:$0xf] %vm3725_vm1, %v4510_v52  ;;  %v3541_v56 = vmul.f32 0.01, %v3509_v44  ;;  %v3510_v57 = vadd.f32 %v5038_v54, %v5920_v53 }
 0x1de   : > { %v3575_v46 = vmax.f32 %v3511_v41, %v3543_v55  ;;  %v3544_v58 = vmul.f32 0.01, %v3512_v45 }
 0x1df   : > { %v3573_v59 = vmax.f32 %v3509_v44, %v3541_v56  ;;  %v3542_v60 = vmul.f32 0.01, %v3510_v57  ;;  %v5005_v61 = vpop.f32.mrb[12].mxu0 }
 0x1e0   : > { %v4515_v62 = vpack.c.bf16 %v3575_v46, %v3575_v46  ;;  %v3576_v63 = vmax.f32 %v3512_v45, %v3544_v58  ;;  %v5039_v47 = vadd.f32 %v5005_v61, %v5909_v48  ;;  %v3383_v0 = vpop.f32.mrb[13].mxu0 }
 0x1e1   : > { %v4513_v2 = vpack.c.bf16 %v3573_v59, %v3573_v59  ;;  %v3574_v3 = vmax.f32 %v3510_v57, %v3542_v60  ;;  %v5040_v4 = vadd.f32 %v3383_v0, %v5911_v49  ;;  %v5006_v5 = vpop.f32.mrb[14].mxu0 }
 0x1e2   : > { %3736 = vst.msk [vmem:[%s5930_s19 + $0x28] sm:$0xf] %vm3725_vm1, %v4515_v62  ;;  %v4516_v6 = vpack.c.bf16 %v3576_v63, %v3576_v63  ;;  %v3515_v7 = vadd.f32 %v5039_v47, %v5920_v53  ;;  %v5041_v8 = vadd.f32 %v5006_v5, %v5913_v50  ;;  %v3386_v9 = vpop.f32.mrb[15].mxu0 }
 0x1e3   : > { %3734 = vst.msk [vmem:[%s5930_s19 + $0x20] sm:$0xf] %vm3725_vm1, %v4513_v2  ;;  %v4514_v10 = vpack.c.bf16 %v3574_v3, %v3574_v3  ;;  %v3513_v48 = vadd.f32 %v5040_v4, %v5920_v53  ;;  %v5042_v11 = vadd.f32 %v3386_v9, %v5915_v51 }
 0x1e4   : > { %3737 = vst.msk [vmem:[%s5930_s19 + $0x2c] sm:$0xf] %vm3725_vm1, %v4516_v6  ;;  %v3547_v12 = vmul.f32 0.01, %v3515_v7  ;;  %v3516_v49 = vadd.f32 %v5041_v8, %v5920_v53 }
 0x1e5   : > { %3735 = vst.msk [vmem:[%s5930_s19 + $0x24] sm:$0xf] %vm3725_vm1, %v4514_v10  ;;  %v3545_v13 = vmul.f32 0.01, %v3513_v48  ;;  %v3514_v14 = vadd.f32 %v5042_v11, %v5920_v53 }
 0x1e6   : > { %v3579_v15 = vmax.f32 %v3515_v7, %v3547_v12  ;;  %v3548_v50 = vmul.f32 0.01, %v3516_v49 }
 0x1e7   : > { %v4865_v16 = vpop.f32.mrb[16].mxu1  ;;  %v3577_v17 = vmax.f32 %v3513_v48, %v3545_v13  ;;  %v3546_v18 = vmul.f32 0.01, %v3514_v14  ;;  %v5009_v19 = vpop.f32.mrb[16].mxu0 }
 0x1e8   : > { %v1905_v20 = vpop.f32.mrb[17].mxu1  ;;  %v4519_v51 = vpack.c.bf16 %v3579_v15, %v3579_v15  ;;  %v3580_v21 = vmax.f32 %v3516_v49, %v3548_v50  ;;  %v5043_v22 = vadd.f32 %v5009_v19, %v4865_v16  ;;  %v3399_v23 = vpop.f32.mrb[17].mxu0 }
 0x1e9   : > { %v4866_v24 = vpop.f32.mrb[18].mxu1  ;;  %v4517_v25 = vpack.c.bf16 %v3577_v17, %v3577_v17  ;;  %v3578_v26 = vmax.f32 %v3514_v14, %v3546_v18  ;;  %v5044_v27 = vadd.f32 %v3399_v23, %v1905_v20  ;;  %v5010_v28 = vpop.f32.mrb[18].mxu0 }
 0x1ea   : > { %v1908_v29 = vpop.f32.mrb[19].mxu1  ;;  %3740 = vst.msk [vmem:[%s5930_s19 + $0x38] sm:$0xf] %vm3725_vm1, %v4519_v51  ;;  %v4520_v30 = vpack.c.bf16 %v3580_v21, %v3580_v21  ;;  %v3519_v31 = vadd.f32 %v5043_v22, %v5920_v53  ;;  %v5045_v1 = vadd.f32 %v5010_v28, %v4866_v24  ;;  %v3402_v32 = vpop.f32.mrb[19].mxu0 }
 0x1eb   : > { %3738 = vst.msk [vmem:[%s5930_s19 + $0x30] sm:$0xf] %vm3725_vm1, %v4517_v25  ;;  %v4518_v33 = vpack.c.bf16 %v3578_v26, %v3578_v26  ;;  %v3517_v34 = vadd.f32 %v5044_v27, %v5920_v53  ;;  %v5046_v35 = vadd.f32 %v3402_v32, %v1908_v29 }
 0x1ec   : > { %3741 = vst.msk [vmem:[%s5930_s19 + $0x3c] sm:$0xf] %vm3725_vm1, %v4520_v30  ;;  %v3551_v36 = vmul.f32 0.01, %v3519_v31  ;;  %v3520_v37 = vadd.f32 %v5045_v1, %v5920_v53 }
 0x1ed   : > { %3739 = vst.msk [vmem:[%s5930_s19 + $0x34] sm:$0xf] %vm3725_vm1, %v4518_v33  ;;  %v3549_v38 = vmul.f32 0.01, %v3517_v34  ;;  %v3518_v39 = vadd.f32 %v5046_v35, %v5920_v53 }
 0x1ee   : > { %v3583_v40 = vmax.f32 %v3519_v31, %v3551_v36  ;;  %v3552_v41 = vmul.f32 0.01, %v3520_v37 }
 0x1ef   : > { %v4869_v42 = vpop.f32.mrb[20].mxu1  ;;  %v3581_v43 = vmax.f32 %v3517_v34, %v3549_v38  ;;  %v3550_v52 = vmul.f32 0.01, %v3518_v39  ;;  %v5013_v44 = vpop.f32.mrb[20].mxu0 }
 0x1f0   : > { %v1921_v54 = vpop.f32.mrb[21].mxu1  ;;  %v4523_v55 = vpack.c.bf16 %v3583_v40, %v3583_v40  ;;  %v3584_v45 = vmax.f32 %v3520_v37, %v3552_v41  ;;  %v5047_v56 = vadd.f32 %v5013_v44, %v4869_v42  ;;  %v3415_v57 = vpop.f32.mrb[21].mxu0 }
 0x1f1   : > { %v4870_v46 = vpop.f32.mrb[22].mxu1  ;;  %v4521_v58 = vpack.c.bf16 %v3581_v43, %v3581_v43  ;;  %v3582_v59 = vmax.f32 %v3518_v39, %v3550_v52  ;;  %v5048_v60 = vadd.f32 %v3415_v57, %v1921_v54  ;;  %v5014_v61 = vpop.f32.mrb[22].mxu0 }
 0x1f2   : > { %v1924_v62 = vpop.f32.mrb[23].mxu1  ;;  %3744 = vst.msk [vmem:[%s5930_s19 + $0x48] sm:$0xf] %vm3725_vm1, %v4523_v55  ;;  %v4524_v63 = vpack.c.bf16 %v3584_v45, %v3584_v45  ;;  %v3523_v47 = vadd.f32 %v5047_v56, %v5920_v53  ;;  %v5049_v0 = vadd.f32 %v5014_v61, %v4870_v46  ;;  %v3418_v2 = vpop.f32.mrb[23].mxu0 }
 0x1f3   : > { %3742 = vst.msk [vmem:[%s5930_s19 + $0x40] sm:$0xf] %vm3725_vm1, %v4521_v58  ;;  %v4522_v3 = vpack.c.bf16 %v3582_v59, %v3582_v59  ;;  %v3521_v4 = vadd.f32 %v5048_v60, %v5920_v53  ;;  %v5050_v5 = vadd.f32 %v3418_v2, %v1924_v62 }
 0x1f4   : > { %3745 = vst.msk [vmem:[%s5930_s19 + $0x4c] sm:$0xf] %vm3725_vm1, %v4524_v63  ;;  %v3555_v6 = vmul.f32 0.01, %v3523_v47  ;;  %v3524_v7 = vadd.f32 %v5049_v0, %v5920_v53 }
 0x1f5   : > { %3743 = vst.msk [vmem:[%s5930_s19 + $0x44] sm:$0xf] %vm3725_vm1, %v4522_v3  ;;  %v3553_v8 = vmul.f32 0.01, %v3521_v4  ;;  %v3522_v9 = vadd.f32 %v5050_v5, %v5920_v53 }
 0x1f6   : > { %v3587_v10 = vmax.f32 %v3523_v47, %v3555_v6  ;;  %v3556_v48 = vmul.f32 0.01, %v3524_v7 }
 0x1f7   : > { %v4873_v11 = vpop.f32.mrb[24].mxu1  ;;  %v3585_v12 = vmax.f32 %v3521_v4, %v3553_v8  ;;  %v3554_v49 = vmul.f32 0.01, %v3522_v9  ;;  %v5017_v13 = vpop.f32.mrb[24].mxu0 }
 0x1f8   : > { %v1937_v14 = vpop.f32.mrb[25].mxu1  ;;  %v4527_v15 = vpack.c.bf16 %v3587_v10, %v3587_v10  ;;  %v3588_v50 = vmax.f32 %v3524_v7, %v3556_v48  ;;  %v5051_v16 = vadd.f32 %v5017_v13, %v4873_v11  ;;  %v3431_v17 = vpop.f32.mrb[25].mxu0 }
 0x1f9   : > { %v4874_v18 = vpop.f32.mrb[26].mxu1  ;;  %v4525_v19 = vpack.c.bf16 %v3585_v12, %v3585_v12  ;;  %v3586_v20 = vmax.f32 %v3522_v9, %v3554_v49  ;;  %v5052_v51 = vadd.f32 %v3431_v17, %v1937_v14  ;;  %v5018_v21 = vpop.f32.mrb[26].mxu0 }
 0x1fa   : > { %v1940_v22 = vpop.f32.mrb[27].mxu1  ;;  %3748 = vst.msk [vmem:[%s5930_s19 + $0x58] sm:$0xf] %vm3725_vm1, %v4527_v15  ;;  %v4528_v23 = vpack.c.bf16 %v3588_v50, %v3588_v50  ;;  %v3527_v24 = vadd.f32 %v5051_v16, %v5920_v53  ;;  %v5053_v25 = vadd.f32 %v5018_v21, %v4874_v18  ;;  %v3434_v26 = vpop.f32.mrb[27].mxu0 }
 0x1fb   : > { %3746 = vst.msk [vmem:[%s5930_s19 + $0x50] sm:$0xf] %vm3725_vm1, %v4525_v19  ;;  %v4526_v27 = vpack.c.bf16 %v3586_v20, %v3586_v20  ;;  %v3525_v28 = vadd.f32 %v5052_v51, %v5920_v53  ;;  %v5054_v29 = vadd.f32 %v3434_v26, %v1940_v22 }
 0x1fc   : > { %3749 = vst.msk [vmem:[%s5930_s19 + $0x5c] sm:$0xf] %vm3725_vm1, %v4528_v23  ;;  %v3559_v30 = vmul.f32 0.01, %v3527_v24  ;;  %v3528_v31 = vadd.f32 %v5053_v25, %v5920_v53 }
 0x1fd   : > { %3747 = vst.msk [vmem:[%s5930_s19 + $0x54] sm:$0xf] %vm3725_vm1, %v4526_v27  ;;  %v3557_v1 = vmul.f32 0.01, %v3525_v28  ;;  %v3526_v32 = vadd.f32 %v5054_v29, %v5920_v53 }
 0x1fe   : > { %v3591_v33 = vmax.f32 %v3527_v24, %v3559_v30  ;;  %v3560_v34 = vmul.f32 0.01, %v3528_v31 }
 0x1ff   : > { %v4877_v35 = vpop.f32.mrb[28].mxu1  ;;  %v3589_v36 = vmax.f32 %v3525_v28, %v3557_v1  ;;  %v3558_v37 = vmul.f32 0.01, %v3526_v32  ;;  %v5021_v38 = vpop.f32.mrb[28].mxu0 }
 0x200   : > { %v1953_v39 = vpop.f32.mrb[29].mxu1  ;;  %v4531_v40 = vpack.c.bf16 %v3591_v33, %v3591_v33  ;;  %v3592_v41 = vmax.f32 %v3528_v31, %v3560_v34  ;;  %v5055_v42 = vadd.f32 %v5021_v38, %v4877_v35  ;;  %v3447_v43 = vpop.f32.mrb[29].mxu0 }
 0x201   : > { %v4878_v52 = vpop.f32.mrb[30].mxu1  ;;  %v4529_v44 = vpack.c.bf16 %v3589_v36, %v3589_v36  ;;  %v3590_v54 = vmax.f32 %v3526_v32, %v3558_v37  ;;  %v5056_v55 = vadd.f32 %v3447_v43, %v1953_v39  ;;  %v5022_v45 = vpop.f32.mrb[30].mxu0 }
 0x202   : > { %v1956_v56 = vpop.f32.mrb[31].mxu1  ;;  %3752 = vst.msk [vmem:[%s5930_s19 + $0x68] sm:$0xf] %vm3725_vm1, %v4531_v40  ;;  %v4532_v57 = vpack.c.bf16 %v3592_v41, %v3592_v41  ;;  %v3531_v46 = vadd.f32 %v5055_v42, %v5920_v53  ;;  %v5057_v58 = vadd.f32 %v5022_v45, %v4878_v52  ;;  %v3450_v59 = vpop.f32.mrb[31].mxu0 }
 0x203   : > { %3750 = vst.msk [vmem:[%s5930_s19 + $0x60] sm:$0xf] %vm3725_vm1, %v4529_v44  ;;  %v4530_v60 = vpack.c.bf16 %v3590_v54, %v3590_v54  ;;  %v3529_v61 = vadd.f32 %v5056_v55, %v5920_v53  ;;  %v5058_v62 = vadd.f32 %v3450_v59, %v1956_v56 }
 0x204   : > { %3753 = vst.msk [vmem:[%s5930_s19 + $0x6c] sm:$0xf] %vm3725_vm1, %v4532_v57  ;;  %v3563_v63 = vmul.f32 0.01, %v3531_v46  ;;  %v3532_v47 = vadd.f32 %v5057_v58, %v5920_v53 }
 0x205   : > { %3751 = vst.msk [vmem:[%s5930_s19 + $0x64] sm:$0xf] %vm3725_vm1, %v4530_v60  ;;  %v3561_v0 = vmul.f32 0.01, %v3529_v61  ;;  %v3530_v2 = vadd.f32 %v5058_v62, %v5920_v53 }
 0x206   : > { %v3595_v3 = vmax.f32 %v3531_v46, %v3563_v63  ;;  %v3564_v4 = vmul.f32 0.01, %v3532_v47 }
 0x207   : > { %v3593_v5 = vmax.f32 %v3529_v61, %v3561_v0  ;;  %v3562_v6 = vmul.f32 0.01, %v3530_v2 }
 0x208   : > { %v4535_v7 = vpack.c.bf16 %v3595_v3, %v3595_v3  ;;  %v3596_v8 = vmax.f32 %v3532_v47, %v3564_v4 }
 0x209   : > { %v4533_v9 = vpack.c.bf16 %v3593_v5, %v3593_v5  ;;  %v3594_v10 = vmax.f32 %v3530_v2, %v3562_v6 }
 0x20a   : > { %3756 = vst.msk [vmem:[%s5930_s19 + $0x78] sm:$0xf] %vm3725_vm1, %v4535_v7  ;;  %v4536_v48 = vpack.c.bf16 %v3596_v8, %v3596_v8 }
 0x20b   : > { %3754 = vst.msk [vmem:[%s5930_s19 + $0x70] sm:$0xf] %vm3725_vm1, %v4533_v9  ;;  %v4534_v11 = vpack.c.bf16 %v3594_v10, %v3594_v10 }
 0x20c   : > { %3757 = vst.msk [vmem:[%s5930_s19 + $0x7c] sm:$0xf] %vm3725_vm1, %v4536_v48 }
 0x20d   : > { %3755 = vst.msk [vmem:[%s5930_s19 + $0x74] sm:$0xf] %vm3725_vm1, %v4534_v11 }
 0x20e PF: > { %s13_s14 = sadd.s32 1, %s5494_s14   ;;  %s6044_s12 = smov %s5490_s13 }
 0x20f   : > { %p10_p5 = scmp.ge.s32.totalorder %s13_s14, 4   ;;  %s6045_s13 = smov %s6047_s15 }
 0x211   :  { %12 = sbr.rel (!%p10_p5) target bundleno = 2 (0x2), region = 79 }

// kernel: forward.9
= control target key start
LH: loop header
LB: loop body
LE: loop exit
PB: predicated region body
PF: predicated region fallthrough
CT: control target
= control target key end

     0   :  { %10 = vsyncpa [#allocation4], 0  ;;  %s1525_s18 = smov 0   ;;  %s1688_s0 = inlined_call_operand.vmem [shape: bf16[2,4096], index: 0, kind: input, shape index: {}]   ;;  %s1689_s1 = inlined_call_operand.vmem [shape: bf16[4096,128], index: 1, kind: input, shape index: {}]   ;;  %s1690_s2 = inlined_call_operand.vmem [shape: f32[1,128], index: 2, kind: input, shape index: {}]   ;;  %s1691_s3 = inlined_call_operand.vmem [shape: bf16[128,10], index: 3, kind: input, shape index: {}]   ;;  %s1692_s4 = inlined_call_operand.vmem [shape: f32[1,10], index: 4, kind: input, shape index: {}]   ;;  %s1693_s5 = inlined_call_operand.hbm [shape: f32[2,10], index: 5, kind: output, shape index: {}]  }
   0x1 LB: > { %s1531_s19 = sadd.s32 4294967295, %s1488_s18   ;;  %p1159_p0 = scmp.ge.s32.totalorder %s1488_s18, 1  ;;  %s1488_s18 = sphi %s1525_s18, %s16_s18  }
   0x2   : > { %p194_p1 = scmp.lt.s32.totalorder %s1488_s18, 5 }
   0x4   : > { %p195_p2 = pnand %p1159_p0, %p194_p1 }
   0x5   : > { %s1160_s20 = sshll.u32 (!%p195_p2), %s1531_s19, 3  ;;  %s1161_s21 = sshll.u32 (!%p195_p2), %s1531_s19, 7 }
   0x6   : > { %198 = sbr.rel (%p195_p2) target bundleno = 565 (0x235), region = 40  ;;  %p222_p3 = scmp.lt.s32.totalorder (!%p195_p2), %s1160_s20, 31 }
   0x7   : > { %p227_p4 = scmp.lt.s32.totalorder (!%p195_p2), %s1161_s21, 511  ;;  %p1163_p5 = scmp.ne.s32.totalorder (!%p195_p2), %s1531_s19, 0 }
   0xd   : > { %s1695_s20 = smov (!%p222_p3, %s1160_s20), 31  ;;  %s1697_s21 = smov (!%p227_p4, %s1161_s21), 511 }
   0xe   : > { %s224_s24 = scalar_lea.vmem %s1688_s0, %s1695_s20  ;;  %s1162_s25 = sshll.u32 %s1697_s21, 2  ;;  %v1490_v0 = vmov (!%p1163_p5), 0.0  }
   0xf   : > { %s1546_s28 = scalar_lea.vmem %s1689_s1, %s1162_s25  ;;  %236 = sbr.rel (%p1163_p5) target bundleno = 22 (0x16), region = 44  ;;  %237 = vst [vmem:[#allocation2] sm:$0x3] (!%p1163_p5), %v1490_v0 }
  0x16 PF: > { %v1379_v1 = vld [vmem:[%s1546_s28 + $0x40] sm:$0xff]   ;;  %v1383_v5 = vld [vmem:[%s1546_s28 + $0x48] sm:$0xff]   ;;  %v1387_v9 = vld [vmem:[%s1546_s28 + $0x50] sm:$0xff]   ;;  %v373_v29 = vlaneseq  ;;  %v1491_v37 = vmov 1966171168   ;;  %p1228_p6 = scmp.ne.s32.totalorder %s1531_s19, 3 }
  0x17   : > { %v1380_v2 = vld [vmem:[%s1546_s28 + $0xc0] sm:$0xff]   ;;  %1243 = vmatprep.subr.bf16.mxu0 %v1379_v1  ;;  %v1384_v6 = vld [vmem:[%s1546_s28 + $0xc8] sm:$0xff]   ;;  %v1388_v10 = vld [vmem:[%s1546_s28 + $0xd0] sm:$0xff]   ;;  %v371_v38 = vunpack.c.l.s4 %v1491_v37  ;;  %vm1493_vm0 = vmmov (!%p1228_p6), 0   ;;  %vm1099_vm1 = vcmask (!%p1228_p6), 74752  }
  0x18   : > { %v1381_v3 = vld [vmem:[%s1546_s28] sm:$0xff]   ;;  %1265 = vmatprep.subr.bf16.mxu1 %v1380_v2  ;;  %v1385_v7 = vld [vmem:[%s1546_s28 + $0x8] sm:$0xff]   ;;  %v1389_v11 = vld [vmem:[%s1546_s28 + $0x10] sm:$0xff]   ;;  %v374_v34 = vshrl.u32 %v373_v29, 7 }
  0x19   : > { %v1382_v4 = vld [vmem:[%s1546_s28 + $0x80] sm:$0xff]   ;;  %1244 = vmatpush3.bf16.msra.mxu0 %v1381_v3  ;;  %v1386_v8 = vld [vmem:[%s1546_s28 + $0x88] sm:$0xff]   ;;  %v1390_v12 = vld [vmem:[%s1546_s28 + $0x90] sm:$0xff]   ;;  %v372_v41 = vunpack.c.0.s8 %v371_v38 }
  0x1a   : > { %1266 = vmatpush3.bf16.msra.mxu1 %v1382_v4  ;;  %1245 = vmatprep.subr.bf16.mxu0 %v1383_v5  ;;  %v1391_v13 = vld [vmem:[%s1546_s28 + $0x58] sm:$0xff]   ;;  %v1395_v17 = vld [vmem:[%s1546_s28 + $0x60] sm:$0xff]   ;;  %v1399_v21 = vld [vmem:[%s1546_s28 + $0x68] sm:$0xff]  }
  0x1b   : > { %1267 = vmatprep.subr.bf16.mxu1 %v1384_v6  ;;  %v1392_v14 = vld [vmem:[%s1546_s28 + $0xd8] sm:$0xff]   ;;  %v1396_v18 = vld [vmem:[%s1546_s28 + $0xe0] sm:$0xff]   ;;  %v1400_v22 = vld [vmem:[%s1546_s28 + $0xe8] sm:$0xff]   ;;  %v1588_v42 = vsub.s32 %v372_v41, %v374_v34 }
  0x1c   : > { %v1393_v15 = vld [vmem:[%s1546_s28 + $0x18] sm:$0xff]   ;;  %v1397_v19 = vld [vmem:[%s1546_s28 + $0x20] sm:$0xff]   ;;  %v1401_v23 = vld [vmem:[%s1546_s28 + $0x28] sm:$0xff]  }
  0x1d   : > { %1246 = vmatpush3.bf16.msra.mxu0 %v1385_v7  ;;  %v1394_v16 = vld [vmem:[%s1546_s28 + $0x98] sm:$0xff]   ;;  %v1398_v20 = vld [vmem:[%s1546_s28 + $0xa0] sm:$0xff]   ;;  %v1402_v24 = vld [vmem:[%s1546_s28 + $0xa8] sm:$0xff]  }
  0x1e   : > { %1268 = vmatpush3.bf16.msra.mxu1 %v1386_v8  ;;  %1247 = vmatprep.subr.bf16.mxu0 %v1387_v9  ;;  %v1403_v25 = vld [vmem:[%s1546_s28 + $0x70] sm:$0xff]   ;;  %v1407_v30 = vld [vmem:[%s1546_s28 + $0x78] sm:$0xff]   ;;  %v239_v35 = vld [vmem:[%s224_s24] sm:$0xff] }
  0x1f   : > { %1269 = vmatprep.subr.bf16.mxu1 %v1388_v10  ;;  %v1404_v26 = vld [vmem:[%s1546_s28 + $0xf0] sm:$0xff]   ;;  %v1408_v31 = vld [vmem:[%s1546_s28 + $0xf8] sm:$0xff]   ;;  %v1412_v36 = vld [vmem:[%s1546_s28 + $0x140] sm:$0xff]   ;;  %v369_v40 = vcombine.high %v239_v35, %v239_v35  ;;  %v376_v43 = vrot.slane %v239_v35, %v1588_v42 }
  0x20   : > { %v1405_v27 = vld [vmem:[%s1546_s28 + $0x30] sm:$0xff]   ;;  %v1409_v32 = vld [vmem:[%s1546_s28 + $0x38] sm:$0xff]   ;;  %v1413_v39 = vld [vmem:[%s1546_s28 + $0x1c0] sm:$0xff]  }
  0x21   : > { %1248 = vmatpush3.bf16.msra.mxu0 %v1389_v11  ;;  %v1406_v28 = vld [vmem:[%s1546_s28 + $0xb0] sm:$0xff]   ;;  %v1410_v33 = vld [vmem:[%s1546_s28 + $0xb8] sm:$0xff]   ;;  %v1592_v44 = vrot.slane %v369_v40, %v1588_v42  ;;  %v384_v45 = vcombine.high %v376_v43, %v376_v43  ;;  %v392_v46 = vrot.slane %v376_v43, %v1588_v42  ;;  %v1414_v49 = vld [vmem:[%s1546_s28 + $0x100] sm:$0xff]  }
  0x22   : > { %1270 = vmatpush3.bf16.msra.mxu1 %v1390_v12  ;;  %1249 = vmatprep.subr.bf16.mxu0 %v1391_v13  ;;  %v1416_v52 = vld [vmem:[%s1546_s28 + $0x148] sm:$0xff]   ;;  %v1415_v54 = vld [vmem:[%s1546_s28 + $0x180] sm:$0xff]   ;;  %v1420_v58 = vld [vmem:[%s1546_s28 + $0x150] sm:$0xff]  }
  0x23   : > { %1271 = vmatprep.subr.bf16.mxu1 %v1392_v14  ;;  %v385_v47 = vcombine.high %v1592_v44, %v1592_v44  ;;  %v406_v48 = vrot.slane %v384_v45, %v1588_v42  ;;  %v414_v51 = vcombine.high %v392_v46, %v392_v46  ;;  %v1417_v55 = vld [vmem:[%s1546_s28 + $0x1c8] sm:$0xff]   ;;  %v1421_v60 = vld [vmem:[%s1546_s28 + $0x1d0] sm:$0xff]   ;;  %v1424_v62 = vld [vmem:[%s1546_s28 + $0x158] sm:$0xff]  }
  0x24   : > { %v1418_v57 = vld [vmem:[%s1546_s28 + $0x108] sm:$0xff]   ;;  %v1422_v61 = vld [vmem:[%s1546_s28 + $0x110] sm:$0xff]   ;;  %v1425_v0 = vld [vmem:[%s1546_s28 + $0x1d8] sm:$0xff]  }
  0x25   : > { %1250 = vmatpush3.bf16.msra.mxu0 %v1393_v15  ;;  %v413_v50 = vrot.slane %v385_v47, %v1588_v42  ;;  %842 = vmatprep.mubr.bf16.mxu0 %v406_v48  ;;  %v416_v53 = vcombine.high %v406_v48, %v406_v48  ;;  %v1419_v59 = vld [vmem:[%s1546_s28 + $0x188] sm:$0xff]   ;;  %v1423_v63 = vld [vmem:[%s1546_s28 + $0x190] sm:$0xff]   ;;  %v1426_v1 = vld [vmem:[%s1546_s28 + $0x118] sm:$0xff]   ;;  %v1492_v47 = vmov (!%p1228_p6), 0.0  }
  0x26   : > { %1272 = vmatpush3.bf16.msra.mxu1 %v1394_v16  ;;  %1251 = vmatprep.subr.bf16.mxu0 %v1395_v17  ;;  %v1428_v2 = vld [vmem:[%s1546_s28 + $0x160] sm:$0xff]   ;;  %v1427_v3 = vld [vmem:[%s1546_s28 + $0x198] sm:$0xff]   ;;  %v1432_v6 = vld [vmem:[%s1546_s28 + $0x168] sm:$0xff]  }
  0x27   : > { %1273 = vmatprep.subr.bf16.mxu1 %v1396_v18  ;;  %v417_v56 = vcombine.high %v413_v50, %v413_v50  ;;  %882 = vmatprep.mubr.bf16.mxu1 %v416_v53  ;;  %v1429_v4 = vld [vmem:[%s1546_s28 + $0x1e0] sm:$0xff]   ;;  %v1433_v8 = vld [vmem:[%s1546_s28 + $0x1e8] sm:$0xff]   ;;  %v1436_v10 = vld [vmem:[%s1546_s28 + $0x170] sm:$0xff]   ;;  %v399_v18 = vrot.slane %v1592_v44, %v1588_v42 }
  0x28   : > { %v1430_v5 = vld [vmem:[%s1546_s28 + $0x120] sm:$0xff]   ;;  %v1434_v9 = vld [vmem:[%s1546_s28 + $0x128] sm:$0xff]   ;;  %v1437_v12 = vld [vmem:[%s1546_s28 + $0x1f0] sm:$0xff]  }
  0x29   : > { %1252 = vmatpush3.bf16.msra.mxu0 %v1397_v19  ;;  %v1431_v7 = vld [vmem:[%s1546_s28 + $0x1a0] sm:$0xff]   ;;  %v1435_v11 = vld [vmem:[%s1546_s28 + $0x1a8] sm:$0xff]   ;;  %v1438_v13 = vld [vmem:[%s1546_s28 + $0x130] sm:$0xff]  }
  0x2a   : > { %1274 = vmatpush3.bf16.msra.mxu1 %v1398_v20  ;;  %1253 = vmatprep.subr.bf16.mxu0 %v1399_v21  ;;  %v1440_v14 = vld [vmem:[%s1546_s28 + $0x178] sm:$0xff]   ;;  %v1439_v15 = vld [vmem:[%s1546_s28 + $0x1b0] sm:$0xff]   ;;  %v415_v20 = vcombine.high %v399_v18, %v399_v18  ;;  %v238_v42 = vld [vmem:[#allocation2] sm:$0x3] }
  0x2b   : > { %1275 = vmatprep.subr.bf16.mxu1 %v1400_v22  ;;  %v1441_v16 = vld [vmem:[%s1546_s28 + $0x1f8] sm:$0xff]   ;;  %v1445_v48 = vld [vmem:[%s1691_s3 + $0x8] sm:$0xff] (!%p1228_p6)   ;;  %v1229_v53 = vld [vmem:[%s1690_s2] ss:$0 sm:$0xff] (!%p1228_p6) }
  0x2c   : > { %v1442_v17 = vld [vmem:[%s1546_s28 + $0x138] sm:$0xff]  }
  0x2d   : > { %1254 = vmatpush3.bf16.msra.mxu0 %v1401_v23  ;;  %v1443_v19 = vld [vmem:[%s1546_s28 + $0x1b8] sm:$0xff]  }
  0x2e   : > { %1276 = vmatpush3.bf16.msra.mxu1 %v1402_v24  ;;  %1255 = vmatprep.subr.bf16.mxu0 %v1403_v25 }
  0x2f   : > { %1277 = vmatprep.subr.bf16.mxu1 %v1404_v26 }
  0x31   : > { %1256 = vmatpush3.bf16.msra.mxu0 %v1405_v27 }
  0x32   : > { %1278 = vmatpush3.bf16.msra.mxu1 %v1406_v28  ;;  %1257 = vmatprep.subr.bf16.mxu0 %v1407_v30 }
  0x33   : > { %1279 = vmatprep.subr.bf16.mxu1 %v1408_v31 }
  0x35   : > { %1258 = vmatpush3.bf16.msra.mxu0 %v1409_v32 }
  0x36   : > { %1280 = vmatpush3.bf16.msra.mxu1 %v1410_v33  ;;  %1287 = vmatprep.subr.bf16.mxu0 %v1412_v36 }
  0x37   : > { %1309 = vmatprep.subr.bf16.mxu1 %v1413_v39 }
  0x38   : > { %843 = vmatmul.mubr.bf16.vlgmr.msra.gmra.mrb[0].mxu0 %v392_v46  ;;  %v1444_v46 = vld [vmem:[%s1691_s3] sm:$0xff] (!%p1228_p6)  }
  0x39   : > { %1288 = vmatpush3.bf16.msra.mxu0 %v1414_v49  ;;  %883 = vmatmul.mubr.bf16.vlgmr.msra.gmra.mrb[0].mxu1 %v414_v51  ;;  %v1446_v49 = vld [vmem:[%s1691_s3 + $0x10] sm:$0xff] (!%p1228_p6)   ;;  %v1448_v51 = vld [vmem:[%s1691_s3 + $0x20] sm:$0xff] (!%p1228_p6)  }
  0x3a   : > { %1289 = vmatprep.subr.bf16.mxu0 %v1416_v52  ;;  %1310 = vmatpush3.bf16.msra.mxu1 %v1415_v54 }
  0x3b   : > { %922 = vmatprep.mubr.bf16.mxu0 %v413_v50  ;;  %1311 = vmatprep.subr.bf16.mxu1 %v1417_v55  ;;  %v1447_v50 = vld [vmem:[%s1691_s3 + $0x18] sm:$0xff] (!%p1228_p6)   ;;  %v1449_v55 = vld [vmem:[%s1691_s3 + $0x28] sm:$0xff] (!%p1228_p6)  }
  0x3c   : > { %962 = vmatprep.mubr.bf16.mxu1 %v417_v56 }
  0x3d   : > { %1290 = vmatpush3.bf16.msra.mxu0 %v1418_v57  ;;  %v1450_v57 = vld [vmem:[%s1691_s3 + $0x30] sm:$0xff] (!%p1228_p6)  }
  0x3e   : > { %1291 = vmatprep.subr.bf16.mxu0 %v1420_v58  ;;  %1312 = vmatpush3.bf16.msra.mxu1 %v1419_v59  ;;  %v1451_v59 = vld [vmem:[%s1691_s3 + $0x38] sm:$0xff] (!%p1228_p6)  }
  0x3f   : > { %1313 = vmatprep.subr.bf16.mxu1 %v1421_v60 }
  0x41   : > { %1292 = vmatpush3.bf16.msra.mxu0 %v1422_v61  ;;  %v1230_v61 = vld [vmem:[%s1692_s4] ss:$0 sm:$0xff] (!%p1228_p6) }
  0x42   : > { %1293 = vmatprep.subr.bf16.mxu0 %v1424_v62  ;;  %1314 = vmatpush3.bf16.msra.mxu1 %v1423_v63 }
  0x43   : > { %1315 = vmatprep.subr.bf16.mxu1 %v1425_v0 }
  0x45   : > { %1294 = vmatpush3.bf16.msra.mxu0 %v1426_v1 }
  0x46   : > { %1295 = vmatprep.subr.bf16.mxu0 %v1428_v2  ;;  %1316 = vmatpush3.bf16.msra.mxu1 %v1427_v3 }
  0x47   : > { %1317 = vmatprep.subr.bf16.mxu1 %v1429_v4 }
  0x49   : > { %1296 = vmatpush3.bf16.msra.mxu0 %v1430_v5 }
  0x4a   : > { %1297 = vmatprep.subr.bf16.mxu0 %v1432_v6  ;;  %1318 = vmatpush3.bf16.msra.mxu1 %v1431_v7 }
  0x4b   : > { %1319 = vmatprep.subr.bf16.mxu1 %v1433_v8 }
  0x4d   : > { %1298 = vmatpush3.bf16.msra.mxu0 %v1434_v9 }
  0x4e   : > { %1299 = vmatprep.subr.bf16.mxu0 %v1436_v10  ;;  %1320 = vmatpush3.bf16.msra.mxu1 %v1435_v11 }
  0x4f   : > { %1321 = vmatprep.subr.bf16.mxu1 %v1437_v12 }
  0x51   : > { %1300 = vmatpush3.bf16.msra.mxu0 %v1438_v13 }
  0x52   : > { %1301 = vmatprep.subr.bf16.mxu0 %v1440_v14  ;;  %1322 = vmatpush3.bf16.msra.mxu1 %v1439_v15 }
  0x53   : > { %1323 = vmatprep.subr.bf16.mxu1 %v1441_v16 }
  0x55   : > { %1302 = vmatpush3.bf16.msra.mxu0 %v1442_v17 }
  0x56   : > { %1324 = vmatpush3.bf16.msra.mxu1 %v1443_v19  ;;  %1340 = vmatprep.subr.bf16.mxu0 (!%p1228_p6), %v1492_v47 }
  0x58   : > { %923 = vmatmul.mubr.bf16.vlgmr.msra.gmra.mrb[4].mxu0 %v399_v18 }
  0x59   : > { %963 = vmatmul.mubr.bf16.vlgmr.msra.gmra.mrb[4].mxu1 %v415_v20  ;;  %1341 = vmatpush3.bf16.msra.mxu0 (!%p1228_p6), %v1444_v46 }
  0x5a   : > { %1356 = vmatprep.mubr.msk.bf16.mxu0 (!%p1228_p6), %vm1493_vm0, %v1492_v47  ;;  %1342 = vmatprep.subr.bf16.mxu0 (!%p1228_p6), %v1492_v47 }
  0x5d   : > { %1343 = vmatpush3.bf16.msra.mxu0 (!%p1228_p6), %v1445_v48 }
  0x5e   : > { %1344 = vmatprep.subr.bf16.mxu0 (!%p1228_p6), %v1492_v47 }
  0x61   : > { %1345 = vmatpush3.bf16.msra.mxu0 (!%p1228_p6), %v1446_v49 }
  0x62   : > { %1346 = vmatprep.subr.bf16.mxu0 (!%p1228_p6), %v1492_v47 }
  0x65   : > { %1347 = vmatpush3.bf16.msra.mxu0 (!%p1228_p6), %v1447_v50 }
  0x66   : > { %1348 = vmatprep.subr.bf16.mxu0 (!%p1228_p6), %v1492_v47 }
  0x69   : > { %1349 = vmatpush3.bf16.msra.mxu0 (!%p1228_p6), %v1448_v51 }
  0x6a   : > { %1350 = vmatprep.subr.bf16.mxu0 (!%p1228_p6), %v1492_v47 }
  0x6d   : > { %1351 = vmatpush3.bf16.msra.mxu0 (!%p1228_p6), %v1449_v55 }
  0x6e   : > { %1352 = vmatprep.subr.bf16.mxu0 (!%p1228_p6), %v1492_v47 }
  0x71   : > { %1353 = vmatpush3.bf16.msra.mxu0 (!%p1228_p6), %v1450_v57 }
  0x72   : > { %1354 = vmatprep.subr.bf16.mxu0 (!%p1228_p6), %v1492_v47 }
  0x75   : > { %1355 = vmatpush3.bf16.msra.mxu0 (!%p1228_p6), %v1451_v59 }
 0x10b   : > { %v1259_v21 = vpop.f32.mrb[0].mxu0 }
 0x10c   : > { %v1260_v22 = vpop.f32.mrb[1].mxu0  ;;  %v1281_v23 = vpop.f32.mrb[0].mxu1 }
 0x10d   : > { %v1261_v24 = vadd.f32 %v1260_v22, %v1259_v21  ;;  %v1262_v25 = vpop.f32.mrb[2].mxu0  ;;  %v1282_v26 = vpop.f32.mrb[1].mxu1 }
 0x10e   : > { %v1263_v27 = vpop.f32.mrb[3].mxu0  ;;  %v1283_v28 = vadd.f32 %v1282_v26, %v1281_v23  ;;  %v1284_v29 = vpop.f32.mrb[2].mxu1 }
 0x10f   : > { %v1285_v30 = vpop.f32.mrb[3].mxu1 }
 0x110   : > { %v885_v31 = vadd.f32 %v1283_v28, %v1261_v24 }
 0x12b   : > { %v1303_v32 = vpop.f32.mrb[4].mxu0 }
 0x12c   : > { %v1304_v33 = vpop.f32.mrb[5].mxu0  ;;  %v1325_v34 = vpop.f32.mrb[4].mxu1 }
 0x12d   : > { %v1305_v35 = vadd.f32 %v1304_v33, %v1303_v32  ;;  %v1306_v36 = vpop.f32.mrb[6].mxu0  ;;  %v1326_v37 = vpop.f32.mrb[5].mxu1 }
 0x12e   : > { %v1307_v38 = vpop.f32.mrb[7].mxu0  ;;  %v1327_v40 = vadd.f32 %v1326_v37, %v1325_v34  ;;  %v1328_v41 = vpop.f32.mrb[6].mxu1 }
 0x12f   : > { %v925_v39 = vadd.f32 %v1305_v35, %v885_v31  ;;  %v1329_v43 = vpop.f32.mrb[7].mxu1  ;;  %975 = sbr.rel (%p1228_p6) target bundleno = 540 (0x21c), region = 48 }
 0x131   : > { %v965_v44 = vadd.f32 %v1327_v40, %v925_v39 }
 0x133   : > { %v970_v45 = vadd.f32 %v965_v44, %v238_v42 }
 0x135   : > { %971 = vst [vmem:[#allocation2] sm:$0x3] %v970_v45 }
 0x13c   : > { %v976_v52 = vld [vmem:[#allocation2] sm:$0x3] }
 0x13d   : > { %v984_v54 = vadd.f32 %v1229_v53, %v976_v52 }
 0x13f   : > { %v985_v56 = vmul.f32 0.01, %v984_v54 }
 0x141   : > { %v986_v58 = vmax.f32 %v984_v54, %v985_v56 }
 0x143   : > { %v987_v60 = vpack.c.bf16 %v986_v58, %v986_v58 }
 0x145   : > { %1357 = vmatmul.mubr.bf16.vlgmr.msra.gmra.mrb[0].mxu0 %v987_v60 }
 0x218   : > { %v1093_v62 = vpop.f32.mrb[0].mxu0 }
 0x219   : > { %v1094_v63 = vadd.f32 %v1230_v61, %v1093_v62  ;;  %v1358_v0 = vpop.f32.mrb[1].mxu0 }
 0x21a   : > { %v1096_v1 = vpop.f32.mrb[2].mxu0 }
 0x21b   : > { %1100 = vst.msk [vmem:[#allocation3] sm:$0x3] %vm1099_vm1, %v1094_v63  ;;  %v1359_v2 = vpop.f32.mrb[3].mxu0 }
 0x21c PF: > { %p1364_p7 = scmp.eq.s32.totalorder %s1531_s19, 3  ;;  %s1494_s28 = smov [#allocation3]  }
 0x21d   : > { %s1108_s29 = sshll.u32 %s1494_s28, 4  ;;  %s1109_s29 = int_to_ptr.vmem [resolvable:$true] %s1108_s29 }
 0x21e   : > { %s1452_s30 = scalar_lea.vmem %s1109_s29, 32  ;;  %p1459_p11 = scmp.lt.s32.totalorder %s1109_s29, %s1109_s29 }
 0x21f   : > { %p1453_p8 = scmp.ne.s32.totalorder %s1109_s29, %s1452_s30  ;;  %p1460_p12 = scmp.lt.s32.totalorder %s1452_s30, %s1452_s30 }
 0x221   : > { %p1454_p9 = pnand %p1453_p8, %p1364_p7  ;;  %p1461_p13 = por %p1460_p12, %p1459_p11 }
 0x223   : > { %p1455_p10 = pneg %p1454_p9 }
 0x225   : > { %p1462_p0 = pnand %p1461_p13, %p1455_p10 }
 0x227   : > { %1465 = shalt.err (!%p1462_p0)
}
 0x228   : > { %s1466_s8 = scalar_lea.hbm %s1693_s5, 32 }
 0x229   : > { %p1467_p1 = scmp.ne.s32.totalorder %s1693_s5, %s1466_s8  ;;  %p1472_p4 = scmp.lt.u32.totalorder %s1466_s8, %s1693_s5 }
 0x22b   : > { %p1468_p2 = pnand %p1467_p1, %p1364_p7 }
 0x22d   : > { %p1469_p3 = pneg %p1468_p2 }
 0x22f   : > { %p1474_p5 = pnand %p1472_p4, %p1469_p3 }
 0x231   : > { %1477 = shalt.err (!%p1474_p5)
}
 0x232   : > { %1361 = dma.vmem_to_hbm [thread:$0]  (%p1364_p7), %s1109_s29, 32, %s1693_s5, [#allocation4]  }
 0x233   : > { %1483 = dma.done.wait (%p1364_p7), [#allocation4], 32  }
 0x234   : > { %1485 = vsyncadd (%p1364_p7), [#allocation4], 4294967264 }
 0x235 PF: > { %s16_s18 = sadd.s32 1, %s1488_s18  }
 0x236   : > { %p13_p6 = scmp.ge.s32.totalorder %s16_s18, 6  }
 0x238   :  { %15 = sbr.rel (!%p13_p6) target bundleno = 1 (0x1), region = 78 }
 0x23f   :  { %1121 = vsyncpa [#allocation4], 1 }
 0x240   :  { %1123 = vsyncpa [#allocation4 + $0x1], 1 }

</bundles_post_ra>
